<compile_context>
chip_gen: v6e
topology: v6e:2x2x1
jax: 0.10.0
libtpu: 0.0.40
codegen_flags: <defaults>
</compile_context>

<pallas_src>
import jax
import jax.numpy as jnp
import numpy as np
from jax import lax
from jax.experimental import pallas as pl
from jax.experimental.pallas import tpu as pltpu


# ----------------------------------------------------------------------------
# Fused VGG block kernel: one image per grid step.
# ----------------------------------------------------------------------------
def _vgg_block_kernel(x_ref, w1_ref, b1_ref, w2_ref, b2_ref, o_ref,
                      xpad_ref, ypad_ref):
    # x_ref : (1, H, W, Cin)          input image (NHWC, unpadded)
    # w1_ref: (3, 3*Cin, Cout)        per-kh weights with (kw, Cin) folded in K
    # w2_ref: (3, 3*Cout, Cout)
    # b*_ref: (1, Cout)
    # o_ref : (1, Ho, Wo*Cout)        lane-dense output slab
    # xpad_ref: VMEM (H+2, W+2, Cin)  zero-haloed conv1 input
    # ypad_ref: VMEM (H+2, W+2, Cout) zero-haloed conv1 output (conv2 input)
    Hp, Wp, Cin = xpad_ref.shape
    H, W = Hp - 2, Wp - 2
    Cout = ypad_ref.shape[-1]
    Ho, Wo = H // 2, W // 2
    f32 = jnp.float32

    # --- halo-only zeroing (interior is fully overwritten below) -------------
    xpad_ref[pl.ds(0, 1)] = jnp.zeros((1, Wp, Cin), f32)
    xpad_ref[pl.ds(Hp - 1, 1)] = jnp.zeros((1, Wp, Cin), f32)
    xpad_ref[:, pl.ds(0, 1), :] = jnp.zeros((Hp, 1, Cin), f32)
    xpad_ref[:, pl.ds(Wp - 1, 1), :] = jnp.zeros((Hp, 1, Cin), f32)
    ypad_ref[pl.ds(0, 1)] = jnp.zeros((1, Wp, Cout), f32)
    ypad_ref[pl.ds(Hp - 1, 1)] = jnp.zeros((1, Wp, Cout), f32)
    ypad_ref[:, pl.ds(0, 1), :] = jnp.zeros((Hp, 1, Cout), f32)
    ypad_ref[:, pl.ds(Wp - 1, 1), :] = jnp.zeros((Hp, 1, Cout), f32)

    # Interior of the conv1 input (fusion: conv1/conv2 never touch HBM).
    xpad_ref[pl.ds(1, H), pl.ds(1, W), :] = x_ref[0].astype(f32)

    # Load + cast weights/biases once (hoisted out of the tap loops).
    w1 = w1_ref[...].astype(f32)          # (3, 3*Cin,  Cout)
    w2 = w2_ref[...].astype(f32)          # (3, 3*Cout, Cout)
    b1 = b1_ref[...].astype(f32)          # (1, Cout), broadcasts over H*W
    b2 = b2_ref[...].astype(f32)

    # TODO(synk): at realistic sizes keep this accumulator in a VMEM scratch
    # (P3 pattern) / row-strip tile the M dim; at (H*W, Cout)=(256, 8) it is
    # only a couple of vregs, so an SSA value is fine here.
    def conv3x3(pad_ref, w):
        acc = jnp.zeros((H * W, Cout), f32)
        for kh in range(3):
            rows = pad_ref[pl.ds(kh, H)]                     # (H, Wp, C)
            # Fold the 3 kw taps into the K dim: (H, W, 3*C) slab.
            slab = jnp.concatenate(
                [rows[:, kw:kw + W, :] for kw in range(3)], axis=-1)
            acc = acc + jnp.dot(slab.reshape(H * W, -1), w[kh],
                                preferred_element_type=f32)
        return acc

    # --- conv1 + ReLU; result goes straight into the padded conv2 input -----
    y1 = jnp.maximum(conv3x3(xpad_ref, w1) + b1, 0.0)        # (H*W, Cout)
    ypad_ref[pl.ds(1, H), pl.ds(1, W), :] = y1.reshape(H, W, Cout)

    # --- conv2 + ReLU --------------------------------------------------------
    y2 = jnp.maximum(conv3x3(ypad_ref, w2) + b2, 0.0)        # (H*W, Cout)

    # --- maxpool 2x2, stride 2: fully value-level (no scratch round trip) ----
    y3 = y2.reshape(Ho, 2, W, Cout)
    rowmax = jnp.maximum(y3[:, 0], y3[:, 1])                 # (Ho, W, Cout)
    z = rowmax.reshape(Ho, Wo, 2, Cout)
    pooled = jnp.maximum(z[:, :, 0, :], z[:, :, 1, :])       # (Ho, Wo, Cout)

    # Lane-dense output slab: Wo*Cout on the lane dim.
    o_ref[0] = pooled.reshape(Ho, Wo * Cout).astype(o_ref.dtype)


# ----------------------------------------------------------------------------
# Wrapper: NCHW in / NCHW out, single fused pallas_call.
# ----------------------------------------------------------------------------
def vgg_block(x_nchw, params):
    w1, b1, w2, b2 = params                      # w*: HWIO (3, 3, Cin, Cout)
    x = jnp.transpose(x_nchw, (0, 2, 3, 1))      # glue: NCHW -> NHWC
    N, H, W, Cin = x.shape
    Cout = w1.shape[-1]
    # nn.MaxPool2d floors odd spatial dims; this fused kernel assumes even H/W.
    assert H % 2 == 0 and W % 2 == 0, "fused kernel requires even H and W"
    Ho, Wo = H // 2, W // 2

    # Fold (kw, Cin) into one K dim so each conv is 3 matmuls with K=3*C.
    w1f = w1.reshape(3, 3 * Cin, Cout)
    w2f = w2.reshape(3, 3 * Cout, Cout)

    out = pl.pallas_call(
        _vgg_block_kernel,
        out_shape=jax.ShapeDtypeStruct((N, Ho, Wo * Cout), x.dtype),
        grid=(N,),
        in_specs=[
            pl.BlockSpec((1, H, W, Cin), lambda n: (n, 0, 0, 0)),
            pl.BlockSpec((3, 3 * Cin, Cout), lambda n: (0, 0, 0)),
            pl.BlockSpec((1, Cout), lambda n: (0, 0)),
            pl.BlockSpec((3, 3 * Cout, Cout), lambda n: (0, 0, 0)),
            pl.BlockSpec((1, Cout), lambda n: (0, 0)),
        ],
        out_specs=pl.BlockSpec((1, Ho, Wo * Cout), lambda n: (n, 0, 0)),
        scratch_shapes=[
            pltpu.VMEM((H + 2, W + 2, Cin), jnp.float32),    # padded conv1 in
            pltpu.VMEM((H + 2, W + 2, Cout), jnp.float32),   # padded conv1 out
        ],
        compiler_params=pltpu.CompilerParams(
            dimension_semantics=("parallel",)),              # v7x: 2 TCs
    )(x, w1f, b1.reshape(1, Cout), w2f, b2.reshape(1, Cout))

    out = out.reshape(N, Ho, Wo, Cout)           # free: Wo*Cout is contiguous
    return jnp.transpose(out, (0, 3, 1, 2))      # glue: NHWC -> NCHW


# ----------------------------------------------------------------------------
# Pure-JAX reference for correctness checking.
# ----------------------------------------------------------------------------
def ref_forward(x_nchw, w1, b1, w2, b2):
    x = jnp.transpose(x_nchw, (0, 2, 3, 1))

    def conv_relu(x, w, b):
        y = lax.conv_general_dilated(
            x, w, window_strides=(1, 1), padding="SAME",
            dimension_numbers=("NHWC", "HWIO", "NHWC"))
        return jax.nn.relu(y + b)

    y = conv_relu(conv_relu(x, w1, b1), w2, b2)
    y = lax.reduce_window(y, -jnp.inf, lax.max,
                          (1, 2, 2, 1), (1, 2, 2, 1), "VALID")
    return jnp.transpose(y, (0, 3, 1, 2))


if __name__ == "__main__":
    N, Cin, H, W = 2, 4, 16, 16
    Cout = 8

    key = jax.random.PRNGKey(0)
    k = jax.random.split(key, 5)
    x = jax.random.normal(k[0], (N, Cin, H, W), jnp.float32)

    # Deterministic PyTorch-style uniform init (bound = 1/sqrt(fan_in)).
    fan1 = float(Cin * 3 * 3)
    w1 = jax.random.uniform(k[1], (3, 3, Cin, Cout), jnp.float32, -1.0, 1.0) / jnp.sqrt(fan1)
    b1 = jax.random.uniform(k[2], (Cout,), jnp.float32, -1.0, 1.0) / jnp.sqrt(fan1)
    fan2 = float(Cout * 3 * 3)
    w2 = jax.random.uniform(k[3], (3, 3, Cout, Cout), jnp.float32, -1.0, 1.0) / jnp.sqrt(fan2)
    b2 = jax.random.uniform(k[4], (Cout,), jnp.float32, -1.0, 1.0) / jnp.sqrt(fan2)

    params = (w1, b1, w2, b2)
    out = jax.jit(vgg_block)(x, params)
    out = jax.block_until_ready(out)

    assert out.shape == (N, Cout, H // 2, W // 2), out.shape
    ref = jax.block_until_ready(ref_forward(x, w1, b1, w2, b2))
    np.testing.assert_allclose(np.asarray(out), np.asarray(ref), rtol=1e-5, atol=1e-5)

    print("KERNEL_OK")
</pallas_src>

<mosaic_0001>
module attributes {stable_mosaic.version = 11 : i64} {
  func.func @_vgg_block_kernel(%arg0: i32, %arg1: memref<1x16x16x4xf32, #tpu.memory_space<vmem>>, %arg2: memref<3x12x8xf32, #tpu.memory_space<vmem>>, %arg3: memref<1x8xf32, #tpu.memory_space<vmem>>, %arg4: memref<3x24x8xf32, #tpu.memory_space<vmem>>, %arg5: memref<1x8xf32, #tpu.memory_space<vmem>>, %arg6: memref<1x8x64xf32, #tpu.memory_space<vmem>>, %arg7: memref<18x18x4xf32, #tpu.memory_space<vmem>>, %arg8: memref<18x18x8xf32, #tpu.memory_space<vmem>>) attributes {dimension_semantics = [#tpu.dimension_semantics<parallel>], iteration_bounds = array<i64: 2>, scalar_prefetch = 0 : i64, scratch_operands = 2 : i64, tpu.core_type = #tpu.core_type<tc>, window_params = [{transform_indices = @transform_0, window_bounds = array<i64: 1, 16, 16, 4>}, {pipeline_mode = #tpu.pipeline_mode<synchronous>, transform_indices = @transform_1, window_bounds = array<i64: 3, 12, 8>}, {pipeline_mode = #tpu.pipeline_mode<synchronous>, transform_indices = @transform_2, window_bounds = array<i64: 1, 8>}, {pipeline_mode = #tpu.pipeline_mode<synchronous>, transform_indices = @transform_3, window_bounds = array<i64: 3, 24, 8>}, {pipeline_mode = #tpu.pipeline_mode<synchronous>, transform_indices = @transform_4, window_bounds = array<i64: 1, 8>}, {transform_indices = @transform_5, window_bounds = array<i64: 1, 8, 64>}]} {
    %cst = arith.constant 0.000000e+00 : f32
    %0 = vector.broadcast %cst : f32 to vector<1x18x4xf32>
    %c0 = arith.constant 0 : index
    %c0_0 = arith.constant 0 : index
    %c0_1 = arith.constant 0 : index
    %1 = vector.load %arg7[%c0, %c0_0, %c0_1] : memref<18x18x4xf32, #tpu.memory_space<vmem>>, vector<1x18x4xf32>
    tpu.vector_store %arg7[%c0, %c0_0, %c0_1], %0 {strides = array<i32>} : memref<18x18x4xf32, #tpu.memory_space<vmem>>, vector<1x18x4xf32>,
    %cst_2 = arith.constant 0.000000e+00 : f32
    %2 = vector.broadcast %cst_2 : f32 to vector<1x18x4xf32>
    %c17 = arith.constant 17 : index
    %c0_3 = arith.constant 0 : index
    %c0_4 = arith.constant 0 : index
    %3 = vector.load %arg7[%c17, %c0_3, %c0_4] : memref<18x18x4xf32, #tpu.memory_space<vmem>>, vector<1x18x4xf32>
    tpu.vector_store %arg7[%c17, %c0_3, %c0_4], %2 {strides = array<i32>} : memref<18x18x4xf32, #tpu.memory_space<vmem>>, vector<1x18x4xf32>,
    %cst_5 = arith.constant 0.000000e+00 : f32
    %4 = vector.broadcast %cst_5 : f32 to vector<18x1x4xf32>
    %c0_6 = arith.constant 0 : index
    %c0_7 = arith.constant 0 : index
    %c0_8 = arith.constant 0 : index
    %5 = vector.load %arg7[%c0_6, %c0_7, %c0_8] : memref<18x18x4xf32, #tpu.memory_space<vmem>>, vector<18x1x4xf32>
    tpu.vector_store %arg7[%c0_6, %c0_7, %c0_8], %4 {strides = array<i32>} : memref<18x18x4xf32, #tpu.memory_space<vmem>>, vector<18x1x4xf32>,
    %cst_9 = arith.constant 0.000000e+00 : f32
    %6 = vector.broadcast %cst_9 : f32 to vector<18x1x4xf32>
    %c0_10 = arith.constant 0 : index
    %c17_11 = arith.constant 17 : index
    %c0_12 = arith.constant 0 : index
    %7 = vector.load %arg7[%c0_10, %c17_11, %c0_12] : memref<18x18x4xf32, #tpu.memory_space<vmem>>, vector<18x1x4xf32>
    tpu.vector_store %arg7[%c0_10, %c17_11, %c0_12], %6 {strides = array<i32>} : memref<18x18x4xf32, #tpu.memory_space<vmem>>, vector<18x1x4xf32>,
    %cst_13 = arith.constant 0.000000e+00 : f32
    %8 = vector.broadcast %cst_13 : f32 to vector<1x18x8xf32>
    %c0_14 = arith.constant 0 : index
    %c0_15 = arith.constant 0 : index
    %c0_16 = arith.constant 0 : index
    %9 = vector.load %arg8[%c0_14, %c0_15, %c0_16] : memref<18x18x8xf32, #tpu.memory_space<vmem>>, vector<1x18x8xf32>
    tpu.vector_store %arg8[%c0_14, %c0_15, %c0_16], %8 {strides = array<i32>} : memref<18x18x8xf32, #tpu.memory_space<vmem>>, vector<1x18x8xf32>,
    %cst_17 = arith.constant 0.000000e+00 : f32
    %10 = vector.broadcast %cst_17 : f32 to vector<1x18x8xf32>
    %c17_18 = arith.constant 17 : index
    %c0_19 = arith.constant 0 : index
    %c0_20 = arith.constant 0 : index
    %11 = vector.load %arg8[%c17_18, %c0_19, %c0_20] : memref<18x18x8xf32, #tpu.memory_space<vmem>>, vector<1x18x8xf32>
    tpu.vector_store %arg8[%c17_18, %c0_19, %c0_20], %10 {strides = array<i32>} : memref<18x18x8xf32, #tpu.memory_space<vmem>>, vector<1x18x8xf32>,
    %cst_21 = arith.constant 0.000000e+00 : f32
    %12 = vector.broadcast %cst_21 : f32 to vector<18x1x8xf32>
    %c0_22 = arith.constant 0 : index
    %c0_23 = arith.constant 0 : index
    %c0_24 = arith.constant 0 : index
    %13 = vector.load %arg8[%c0_22, %c0_23, %c0_24] : memref<18x18x8xf32, #tpu.memory_space<vmem>>, vector<18x1x8xf32>
    tpu.vector_store %arg8[%c0_22, %c0_23, %c0_24], %12 {strides = array<i32>} : memref<18x18x8xf32, #tpu.memory_space<vmem>>, vector<18x1x8xf32>,
    %cst_25 = arith.constant 0.000000e+00 : f32
    %14 = vector.broadcast %cst_25 : f32 to vector<18x1x8xf32>
    %c0_26 = arith.constant 0 : index
    %c17_27 = arith.constant 17 : index
    %c0_28 = arith.constant 0 : index
    %15 = vector.load %arg8[%c0_26, %c17_27, %c0_28] : memref<18x18x8xf32, #tpu.memory_space<vmem>>, vector<18x1x8xf32>
    tpu.vector_store %arg8[%c0_26, %c17_27, %c0_28], %14 {strides = array<i32>} : memref<18x18x8xf32, #tpu.memory_space<vmem>>, vector<18x1x8xf32>,
    %c0_29 = arith.constant 0 : index
    %c0_30 = arith.constant 0 : index
    %c0_31 = arith.constant 0 : index
    %c0_32 = arith.constant 0 : index
    %16 = vector.load %arg1[%c0_29, %c0_30, %c0_31, %c0_32] : memref<1x16x16x4xf32, #tpu.memory_space<vmem>>, vector<1x16x16x4xf32>
    %17 = vector.shape_cast %16 : vector<1x16x16x4xf32> to vector<16x16x4xf32>
    %c1 = arith.constant 1 : index
    %c1_33 = arith.constant 1 : index
    %c0_34 = arith.constant 0 : index
    %18 = vector.load %arg7[%c1, %c1_33, %c0_34] : memref<18x18x4xf32, #tpu.memory_space<vmem>>, vector<16x16x4xf32>
    tpu.vector_store %arg7[%c1, %c1_33, %c0_34], %17 {strides = array<i32>} : memref<18x18x4xf32, #tpu.memory_space<vmem>>, vector<16x16x4xf32>,
    %c0_35 = arith.constant 0 : index
    %c0_36 = arith.constant 0 : index
    %c0_37 = arith.constant 0 : index
    %19 = vector.load %arg2[%c0_35, %c0_36, %c0_37] : memref<3x12x8xf32, #tpu.memory_space<vmem>>, vector<3x12x8xf32>
    %c0_38 = arith.constant 0 : index
    %c0_39 = arith.constant 0 : index
    %c0_40 = arith.constant 0 : index
    %20 = vector.load %arg4[%c0_38, %c0_39, %c0_40] : memref<3x24x8xf32, #tpu.memory_space<vmem>>, vector<3x24x8xf32>
    %c0_41 = arith.constant 0 : index
    %c0_42 = arith.constant 0 : index
    %21 = vector.load %arg3[%c0_41, %c0_42] : memref<1x8xf32, #tpu.memory_space<vmem>>, vector<1x8xf32>
    %c0_43 = arith.constant 0 : index
    %c0_44 = arith.constant 0 : index
    %22 = vector.load %arg5[%c0_43, %c0_44] : memref<1x8xf32, #tpu.memory_space<vmem>>, vector<1x8xf32>
    %cst_45 = arith.constant 0.000000e+00 : f32
    %23 = vector.broadcast %cst_45 : f32 to vector<256x8xf32>
    %c0_46 = arith.constant 0 : index
    %c0_47 = arith.constant 0 : index
    %c0_48 = arith.constant 0 : index
    %24 = vector.load %arg7[%c0_46, %c0_47, %c0_48] : memref<18x18x4xf32, #tpu.memory_space<vmem>>, vector<16x18x4xf32>
    %25 = vector.extract_strided_slice %24 {offsets = [0, 0, 0], sizes = [16, 16, 4], strides = [1, 1, 1]} : vector<16x18x4xf32> to vector<16x16x4xf32>
    %26 = vector.extract_strided_slice %24 {offsets = [0, 1, 0], sizes = [16, 16, 4], strides = [1, 1, 1]} : vector<16x18x4xf32> to vector<16x16x4xf32>
    %27 = vector.extract_strided_slice %24 {offsets = [0, 2, 0], sizes = [16, 16, 4], strides = [1, 1, 1]} : vector<16x18x4xf32> to vector<16x16x4xf32>
    %28 = tpu.concatenate %25, %26, %27 in 2 : vector<16x16x4xf32>, vector<16x16x4xf32>, vector<16x16x4xf32> -> vector<16x16x12xf32>
    %29 = vector.shape_cast %28 : vector<16x16x12xf32> to vector<256x12xf32>
    %30 = vector.extract_strided_slice %19 {offsets = [0, 0, 0], sizes = [1, 12, 8], strides = [1, 1, 1]} : vector<3x12x8xf32> to vector<1x12x8xf32>
    %31 = vector.shape_cast %30 : vector<1x12x8xf32> to vector<12x8xf32>
    %cst_49 = arith.constant dense<0.000000e+00> : vector<256x8xf32>
    %32 = tpu.matmul %29, %31, %cst_49 {dimension_numbers = #tpu.dot_dimension_numbers<[1], [0], [0], [1], [0, 0, 1, 1], [], []>} : vector<256x12xf32>, vector<12x8xf32>, vector<256x8xf32> -> vector<256x8xf32>
    %33 = arith.addf %23, %32 : vector<256x8xf32>
    %c1_50 = arith.constant 1 : index
    %c0_51 = arith.constant 0 : index
    %c0_52 = arith.constant 0 : index
    %34 = vector.load %arg7[%c1_50, %c0_51, %c0_52] : memref<18x18x4xf32, #tpu.memory_space<vmem>>, vector<16x18x4xf32>
    %35 = vector.extract_strided_slice %34 {offsets = [0, 0, 0], sizes = [16, 16, 4], strides = [1, 1, 1]} : vector<16x18x4xf32> to vector<16x16x4xf32>
    %36 = vector.extract_strided_slice %34 {offsets = [0, 1, 0], sizes = [16, 16, 4], strides = [1, 1, 1]} : vector<16x18x4xf32> to vector<16x16x4xf32>
    %37 = vector.extract_strided_slice %34 {offsets = [0, 2, 0], sizes = [16, 16, 4], strides = [1, 1, 1]} : vector<16x18x4xf32> to vector<16x16x4xf32>
    %38 = tpu.concatenate %35, %36, %37 in 2 : vector<16x16x4xf32>, vector<16x16x4xf32>, vector<16x16x4xf32> -> vector<16x16x12xf32>
    %39 = vector.shape_cast %38 : vector<16x16x12xf32> to vector<256x12xf32>
    %40 = vector.extract_strided_slice %19 {offsets = [1, 0, 0], sizes = [1, 12, 8], strides = [1, 1, 1]} : vector<3x12x8xf32> to vector<1x12x8xf32>
    %41 = vector.shape_cast %40 : vector<1x12x8xf32> to vector<12x8xf32>
    %cst_53 = arith.constant dense<0.000000e+00> : vector<256x8xf32>
    %42 = tpu.matmul %39, %41, %cst_53 {dimension_numbers = #tpu.dot_dimension_numbers<[1], [0], [0], [1], [0, 0, 1, 1], [], []>} : vector<256x12xf32>, vector<12x8xf32>, vector<256x8xf32> -> vector<256x8xf32>
    %43 = arith.addf %33, %42 : vector<256x8xf32>
    %c2 = arith.constant 2 : index
    %c0_54 = arith.constant 0 : index
    %c0_55 = arith.constant 0 : index
    %44 = vector.load %arg7[%c2, %c0_54, %c0_55] : memref<18x18x4xf32, #tpu.memory_space<vmem>>, vector<16x18x4xf32>
    %45 = vector.extract_strided_slice %44 {offsets = [0, 0, 0], sizes = [16, 16, 4], strides = [1, 1, 1]} : vector<16x18x4xf32> to vector<16x16x4xf32>
    %46 = vector.extract_strided_slice %44 {offsets = [0, 1, 0], sizes = [16, 16, 4], strides = [1, 1, 1]} : vector<16x18x4xf32> to vector<16x16x4xf32>
    %47 = vector.extract_strided_slice %44 {offsets = [0, 2, 0], sizes = [16, 16, 4], strides = [1, 1, 1]} : vector<16x18x4xf32> to vector<16x16x4xf32>
    %48 = tpu.concatenate %45, %46, %47 in 2 : vector<16x16x4xf32>, vector<16x16x4xf32>, vector<16x16x4xf32> -> vector<16x16x12xf32>
    %49 = vector.shape_cast %48 : vector<16x16x12xf32> to vector<256x12xf32>
    %50 = vector.extract_strided_slice %19 {offsets = [2, 0, 0], sizes = [1, 12, 8], strides = [1, 1, 1]} : vector<3x12x8xf32> to vector<1x12x8xf32>
    %51 = vector.shape_cast %50 : vector<1x12x8xf32> to vector<12x8xf32>
    %cst_56 = arith.constant dense<0.000000e+00> : vector<256x8xf32>
    %52 = tpu.matmul %49, %51, %cst_56 {dimension_numbers = #tpu.dot_dimension_numbers<[1], [0], [0], [1], [0, 0, 1, 1], [], []>} : vector<256x12xf32>, vector<12x8xf32>, vector<256x8xf32> -> vector<256x8xf32>
    %53 = arith.addf %43, %52 : vector<256x8xf32>
    %54 = vector.broadcast %21 : vector<1x8xf32> to vector<256x8xf32>
    %55 = arith.addf %53, %54 : vector<256x8xf32>
    %cst_57 = arith.constant 0.000000e+00 : f32
    %56 = vector.broadcast %cst_57 : f32 to vector<256x8xf32>
    %57 = arith.maximumf %55, %56 : vector<256x8xf32>
    %58 = vector.shape_cast %57 : vector<256x8xf32> to vector<16x16x8xf32>
    %c1_58 = arith.constant 1 : index
    %c1_59 = arith.constant 1 : index
    %c0_60 = arith.constant 0 : index
    %59 = vector.load %arg8[%c1_58, %c1_59, %c0_60] : memref<18x18x8xf32, #tpu.memory_space<vmem>>, vector<16x16x8xf32>
    tpu.vector_store %arg8[%c1_58, %c1_59, %c0_60], %58 {strides = array<i32>} : memref<18x18x8xf32, #tpu.memory_space<vmem>>, vector<16x16x8xf32>,
    %cst_61 = arith.constant 0.000000e+00 : f32
    %60 = vector.broadcast %cst_61 : f32 to vector<256x8xf32>
    %c0_62 = arith.constant 0 : index
    %c0_63 = arith.constant 0 : index
    %c0_64 = arith.constant 0 : index
    %61 = vector.load %arg8[%c0_62, %c0_63, %c0_64] : memref<18x18x8xf32, #tpu.memory_space<vmem>>, vector<16x18x8xf32>
    %62 = vector.extract_strided_slice %61 {offsets = [0, 0, 0], sizes = [16, 16, 8], strides = [1, 1, 1]} : vector<16x18x8xf32> to vector<16x16x8xf32>
    %63 = vector.extract_strided_slice %61 {offsets = [0, 1, 0], sizes = [16, 16, 8], strides = [1, 1, 1]} : vector<16x18x8xf32> to vector<16x16x8xf32>
    %64 = vector.extract_strided_slice %61 {offsets = [0, 2, 0], sizes = [16, 16, 8], strides = [1, 1, 1]} : vector<16x18x8xf32> to vector<16x16x8xf32>
    %65 = tpu.concatenate %62, %63, %64 in 2 : vector<16x16x8xf32>, vector<16x16x8xf32>, vector<16x16x8xf32> -> vector<16x16x24xf32>
    %66 = vector.shape_cast %65 : vector<16x16x24xf32> to vector<256x24xf32>
    %67 = vector.extract_strided_slice %20 {offsets = [0, 0, 0], sizes = [1, 24, 8], strides = [1, 1, 1]} : vector<3x24x8xf32> to vector<1x24x8xf32>
    %68 = vector.shape_cast %67 : vector<1x24x8xf32> to vector<24x8xf32>
    %cst_65 = arith.constant dense<0.000000e+00> : vector<256x8xf32>
    %69 = tpu.matmul %66, %68, %cst_65 {dimension_numbers = #tpu.dot_dimension_numbers<[1], [0], [0], [1], [0, 0, 1, 1], [], []>} : vector<256x24xf32>, vector<24x8xf32>, vector<256x8xf32> -> vector<256x8xf32>
    %70 = arith.addf %60, %69 : vector<256x8xf32>
    %c1_66 = arith.constant 1 : index
    %c0_67 = arith.constant 0 : index
    %c0_68 = arith.constant 0 : index
    %71 = vector.load %arg8[%c1_66, %c0_67, %c0_68] : memref<18x18x8xf32, #tpu.memory_space<vmem>>, vector<16x18x8xf32>
    %72 = vector.extract_strided_slice %71 {offsets = [0, 0, 0], sizes = [16, 16, 8], strides = [1, 1, 1]} : vector<16x18x8xf32> to vector<16x16x8xf32>
    %73 = vector.extract_strided_slice %71 {offsets = [0, 1, 0], sizes = [16, 16, 8], strides = [1, 1, 1]} : vector<16x18x8xf32> to vector<16x16x8xf32>
    %74 = vector.extract_strided_slice %71 {offsets = [0, 2, 0], sizes = [16, 16, 8], strides = [1, 1, 1]} : vector<16x18x8xf32> to vector<16x16x8xf32>
    %75 = tpu.concatenate %72, %73, %74 in 2 : vector<16x16x8xf32>, vector<16x16x8xf32>, vector<16x16x8xf32> -> vector<16x16x24xf32>
    %76 = vector.shape_cast %75 : vector<16x16x24xf32> to vector<256x24xf32>
    %77 = vector.extract_strided_slice %20 {offsets = [1, 0, 0], sizes = [1, 24, 8], strides = [1, 1, 1]} : vector<3x24x8xf32> to vector<1x24x8xf32>
    %78 = vector.shape_cast %77 : vector<1x24x8xf32> to vector<24x8xf32>
    %cst_69 = arith.constant dense<0.000000e+00> : vector<256x8xf32>
    %79 = tpu.matmul %76, %78, %cst_69 {dimension_numbers = #tpu.dot_dimension_numbers<[1], [0], [0], [1], [0, 0, 1, 1], [], []>} : vector<256x24xf32>, vector<24x8xf32>, vector<256x8xf32> -> vector<256x8xf32>
    %80 = arith.addf %70, %79 : vector<256x8xf32>
    %c2_70 = arith.constant 2 : index
    %c0_71 = arith.constant 0 : index
    %c0_72 = arith.constant 0 : index
    %81 = vector.load %arg8[%c2_70, %c0_71, %c0_72] : memref<18x18x8xf32, #tpu.memory_space<vmem>>, vector<16x18x8xf32>
    %82 = vector.extract_strided_slice %81 {offsets = [0, 0, 0], sizes = [16, 16, 8], strides = [1, 1, 1]} : vector<16x18x8xf32> to vector<16x16x8xf32>
    %83 = vector.extract_strided_slice %81 {offsets = [0, 1, 0], sizes = [16, 16, 8], strides = [1, 1, 1]} : vector<16x18x8xf32> to vector<16x16x8xf32>
    %84 = vector.extract_strided_slice %81 {offsets = [0, 2, 0], sizes = [16, 16, 8], strides = [1, 1, 1]} : vector<16x18x8xf32> to vector<16x16x8xf32>
    %85 = tpu.concatenate %82, %83, %84 in 2 : vector<16x16x8xf32>, vector<16x16x8xf32>, vector<16x16x8xf32> -> vector<16x16x24xf32>
    %86 = vector.shape_cast %85 : vector<16x16x24xf32> to vector<256x24xf32>
    %87 = vector.extract_strided_slice %20 {offsets = [2, 0, 0], sizes = [1, 24, 8], strides = [1, 1, 1]} : vector<3x24x8xf32> to vector<1x24x8xf32>
    %88 = vector.shape_cast %87 : vector<1x24x8xf32> to vector<24x8xf32>
    %cst_73 = arith.constant dense<0.000000e+00> : vector<256x8xf32>
    %89 = tpu.matmul %86, %88, %cst_73 {dimension_numbers = #tpu.dot_dimension_numbers<[1], [0], [0], [1], [0, 0, 1, 1], [], []>} : vector<256x24xf32>, vector<24x8xf32>, vector<256x8xf32> -> vector<256x8xf32>
    %90 = arith.addf %80, %89 : vector<256x8xf32>
    %91 = vector.broadcast %22 : vector<1x8xf32> to vector<256x8xf32>
    %92 = arith.addf %90, %91 : vector<256x8xf32>
    %cst_74 = arith.constant 0.000000e+00 : f32
    %93 = vector.broadcast %cst_74 : f32 to vector<256x8xf32>
    %94 = arith.maximumf %92, %93 : vector<256x8xf32>
    %95 = vector.shape_cast %94 : vector<256x8xf32> to vector<8x2x16x8xf32>
    %96 = vector.extract_strided_slice %95 {offsets = [0, 0, 0, 0], sizes = [8, 1, 16, 8], strides = [1, 1, 1, 1]} : vector<8x2x16x8xf32> to vector<8x1x16x8xf32>
    %97 = vector.shape_cast %96 : vector<8x1x16x8xf32> to vector<8x16x8xf32>
    %98 = vector.extract_strided_slice %95 {offsets = [0, 1, 0, 0], sizes = [8, 1, 16, 8], strides = [1, 1, 1, 1]} : vector<8x2x16x8xf32> to vector<8x1x16x8xf32>
    %99 = vector.shape_cast %98 : vector<8x1x16x8xf32> to vector<8x16x8xf32>
    %100 = arith.maximumf %97, %99 : vector<8x16x8xf32>
    %101 = vector.shape_cast %100 : vector<8x16x8xf32> to vector<8x8x2x8xf32>
    %102 = vector.extract_strided_slice %101 {offsets = [0, 0, 0, 0], sizes = [8, 8, 1, 8], strides = [1, 1, 1, 1]} : vector<8x8x2x8xf32> to vector<8x8x1x8xf32>
    %103 = vector.shape_cast %102 : vector<8x8x1x8xf32> to vector<8x8x8xf32>
    %104 = vector.extract_strided_slice %101 {offsets = [0, 0, 1, 0], sizes = [8, 8, 1, 8], strides = [1, 1, 1, 1]} : vector<8x8x2x8xf32> to vector<8x8x1x8xf32>
    %105 = vector.shape_cast %104 : vector<8x8x1x8xf32> to vector<8x8x8xf32>
    %106 = arith.maximumf %103, %105 : vector<8x8x8xf32>
    %107 = vector.shape_cast %106 : vector<8x8x8xf32> to vector<8x64xf32>
    %c0_75 = arith.constant 0 : index
    %c0_76 = arith.constant 0 : index
    %c0_77 = arith.constant 0 : index
    %108 = vector.load %arg6[%c0_75, %c0_76, %c0_77] : memref<1x8x64xf32, #tpu.memory_space<vmem>>, vector<1x8x64xf32>
    %109 = vector.shape_cast %108 : vector<1x8x64xf32> to vector<8x64xf32>
    %110 = vector.shape_cast %107 : vector<8x64xf32> to vector<1x8x64xf32>
    tpu.vector_store %arg6[%c0_75, %c0_76, %c0_77], %110 {strides = array<i32>} : memref<1x8x64xf32, #tpu.memory_space<vmem>>, vector<1x8x64xf32>,
    return
  }
  func.func @transform_0(%arg0: i32) -> (i32, i32, i32, i32) {
    %c0_i32 = arith.constant 0 : i32
    %c0_i32_0 = arith.constant 0 : i32
    %c0_i32_1 = arith.constant 0 : i32
    %c0_i32_2 = arith.constant 0 : i32
    return %arg0, %c0_i32, %c0_i32_0, %c0_i32_1 : i32, i32, i32, i32
  }
  func.func @transform_1(%arg0: i32) -> (i32, i32, i32) {
    %c0_i32 = arith.constant 0 : i32
    %c0_i32_0 = arith.constant 0 : i32
    %c0_i32_1 = arith.constant 0 : i32
    %c0_i32_2 = arith.constant 0 : i32
    return %c0_i32, %c0_i32_0, %c0_i32_1 : i32, i32, i32
  }
  func.func @transform_2(%arg0: i32) -> (i32, i32) {
    %c0_i32 = arith.constant 0 : i32
    %c0_i32_0 = arith.constant 0 : i32
    %c0_i32_1 = arith.constant 0 : i32
    return %c0_i32, %c0_i32_0 : i32, i32
  }
  func.func @transform_3(%arg0: i32) -> (i32, i32, i32) {
    %c0_i32 = arith.constant 0 : i32
    %c0_i32_0 = arith.constant 0 : i32
    %c0_i32_1 = arith.constant 0 : i32
    %c0_i32_2 = arith.constant 0 : i32
    return %c0_i32, %c0_i32_0, %c0_i32_1 : i32, i32, i32
  }
  func.func @transform_4(%arg0: i32) -> (i32, i32) {
    %c0_i32 = arith.constant 0 : i32
    %c0_i32_0 = arith.constant 0 : i32
    %c0_i32_1 = arith.constant 0 : i32
    return %c0_i32, %c0_i32_0 : i32, i32
  }
  func.func @transform_5(%arg0: i32) -> (i32, i32, i32) {
    %c0_i32 = arith.constant 0 : i32
    %c0_i32_0 = arith.constant 0 : i32
    %c0_i32_1 = arith.constant 0 : i32
    return %arg0, %c0_i32, %c0_i32_0 : i32, i32, i32
  }
}

</mosaic_0001>

<bundles_post_ra>
// kernel: vgg_block.1
= control target key start
LH: loop header
LB: loop body
LE: loop exit
PB: predicated region body
PF: predicated region fallthrough
CT: control target
= control target key end

     0   :  { %s7885_s18 = smov 0   ;;  %s11506_s0 = inlined_call_operand.vmem [shape: f32[2,16,16,4], index: 0, kind: input, shape index: {}]   ;;  %s11507_s1 = inlined_call_operand.vmem [shape: f32[3,12,8], index: 1, kind: input, shape index: {}]   ;;  %s11508_s2 = inlined_call_operand.vmem [shape: f32[1,8], index: 2, kind: input, shape index: {}]   ;;  %s11509_s3 = inlined_call_operand.vmem [shape: f32[3,24,8], index: 3, kind: input, shape index: {}]   ;;  %s11510_s4 = inlined_call_operand.vmem [shape: f32[1,8], index: 4, kind: input, shape index: {}]   ;;  %s11511_s5 = inlined_call_operand.vmem [shape: f32[2,8,64], index: 5, kind: output, shape index: {}]  }
   0x1 LB: > { %s6999_s19 = sadd.s32 4294967295, %s7842_s18   ;;  %p7003_p0 = scmp.ge.s32.totalorder %s7842_s18, 1  ;;  %s7842_s18 = sphi %s7885_s18, %s15_s18  }
   0x2   : > { %p187_p1 = scmp.lt.s32.totalorder %s7842_s18, 3 }
   0x4   : > { %p188_p2 = pnand %p7003_p0, %p187_p1 }
   0x6   : > { %191 = sbr.rel (%p188_p2) target bundleno = 1486 (0x5ce), region = 40 }
   0xb   : > { %p7895_p3 = scmp.lt.s32.totalorder %s6999_s19, 1  ;;  %vm223_vm0 = vcmask 31744   ;;  %vm232_vm1 = vcmask 24576   ;;  %v11512_v0 = vmov 0.0   ;;  %vm269_vm2 = vcmask 64512   ;;  %s7845_s25 = smov 8  }
   0xc   : > { %234 = vst.msk [vmem:[#allocation2 + $0x18] sm:$0x1] %vm232_vm1, %v11512_v0  ;;  %235 = vst.msk [vmem:[#allocation2 + $0x30] sm:$0x1] %vm232_vm1, %v11512_v0  ;;  %vm226_vm3 = vcmask 25600   ;;  %vm670_vm4 = vcmask 1045504  }
   0xd   : > { %224 = vst.msk [vmem:[#allocation2] sm:$0xff] %vm223_vm0, %v11512_v0  ;;  %225 = vst.msk [vmem:[#allocation2 + $0x8] sm:$0xff] %vm223_vm0, %v11512_v0  ;;  %s11574_s19 = smov (!%p7895_p3, %s6999_s19), 1  ;;  %vm493_vm5 = vcmask 1046528   ;;  %s7846_s26 = smov 4   ;;  %vm1520_vm6 = vcmask 1043456  }
   0xe   : > { %229 = vst.msk [vmem:[#allocation2 + $0x198] sm:$0xff] %vm223_vm0, %v11512_v0  ;;  %230 = vst.msk [vmem:[#allocation2 + $0x1a0] sm:$0xff] %vm223_vm0, %v11512_v0  ;;  %s7278_s21 = sshll.u32 %s11574_s19, 8  ;;  %vm1423_vm7 = vcmask 97280   ;;  %vm278_vm8 = vcmask 57344   ;;  %vm272_vm9 = vcmask 58368  }
   0xf   : > { %236 = vst.msk [vmem:[#allocation2 + $0x48] sm:$0x1] %vm232_vm1, %v11512_v0  ;;  %237 = vst.msk [vmem:[#allocation2 + $0x60] sm:$0x1] %vm232_vm1, %v11512_v0  ;;  %s7985_s24 = scalar_lea.vmem %s11506_s0, %s7278_s21  ;;  %vm3525_vm10 = vcmask 130048   ;;  %vm4070_vm11 = vcmask 195584  }
  0x10   : > { %238 = vst.msk [vmem:[#allocation2 + $0x78] sm:$0x1] %vm232_vm1, %v11512_v0  ;;  %239 = vst.msk [vmem:[#allocation2 + $0x90] sm:$0x1] %vm232_vm1, %v11512_v0  ;;  %v315_v1 = vld [vmem:[%s7985_s24] sm:$0xff]  ;;  %v316_v2 = vld [vmem:[%s7985_s24 + $0x8] sm:$0xff] }
  0x11   : > { %240 = vst.msk [vmem:[#allocation2 + $0xa8] sm:$0x1] %vm232_vm1, %v11512_v0  ;;  %241 = vst.msk [vmem:[#allocation2 + $0xc0] sm:$0x1] %vm232_vm1, %v11512_v0  ;;  %v317_v3 = vld [vmem:[%s7985_s24 + $0x10] sm:$0xff]  ;;  %v318_v4 = vld [vmem:[%s7985_s24 + $0x18] sm:$0xff] }
  0x12   : > { %242 = vst.msk [vmem:[#allocation2 + $0xd8] sm:$0x1] %vm232_vm1, %v11512_v0  ;;  %243 = vst.msk [vmem:[#allocation2 + $0xf0] sm:$0x1] %vm232_vm1, %v11512_v0  ;;  %v319_v5 = vld [vmem:[%s7985_s24 + $0x20] sm:$0xff]  ;;  %v320_v6 = vld [vmem:[%s7985_s24 + $0x28] sm:$0xff] }
  0x13   : > { %244 = vst.msk [vmem:[#allocation2 + $0x108] sm:$0x1] %vm232_vm1, %v11512_v0  ;;  %245 = vst.msk [vmem:[#allocation2 + $0x120] sm:$0x1] %vm232_vm1, %v11512_v0  ;;  %v321_v7 = vld [vmem:[%s7985_s24 + $0x30] sm:$0xff]  ;;  %v322_v8 = vld [vmem:[%s7985_s24 + $0x38] sm:$0xff] }
  0x14   : > { %246 = vst.msk [vmem:[#allocation2 + $0x138] sm:$0x1] %vm232_vm1, %v11512_v0  ;;  %247 = vst.msk [vmem:[#allocation2 + $0x150] sm:$0x1] %vm232_vm1, %v11512_v0  ;;  %v323_v9 = vld [vmem:[%s7985_s24 + $0x40] sm:$0xff]  ;;  %v324_v10 = vld [vmem:[%s7985_s24 + $0x48] sm:$0xff] }
  0x15   : > { %248 = vst.msk [vmem:[#allocation2 + $0x168] sm:$0x1] %vm232_vm1, %v11512_v0  ;;  %249 = vst.msk [vmem:[#allocation2 + $0x180] sm:$0x1] %vm232_vm1, %v11512_v0  ;;  %v325_v11 = vld [vmem:[%s7985_s24 + $0x50] sm:$0xff]  ;;  %v326_v12 = vld [vmem:[%s7985_s24 + $0x58] sm:$0xff] }
  0x16   : > { %252 = vst.msk [vmem:[#allocation2 + $0x29] sm:$0x1] %vm232_vm1, %v11512_v0  ;;  %253 = vst.msk [vmem:[#allocation2 + $0x41] sm:$0x1] %vm232_vm1, %v11512_v0  ;;  %v327_v13 = vld [vmem:[%s7985_s24 + $0x60] sm:$0xff]  ;;  %v328_v14 = vld [vmem:[%s7985_s24 + $0x68] sm:$0xff] }
  0x17   : > { %254 = vst.msk [vmem:[#allocation2 + $0x59] sm:$0x1] %vm232_vm1, %v11512_v0  ;;  %255 = vst.msk [vmem:[#allocation2 + $0x71] sm:$0x1] %vm232_vm1, %v11512_v0  ;;  %v329_v15 = vld [vmem:[%s7985_s24 + $0x70] sm:$0xff]  ;;  %v330_v16 = vld [vmem:[%s7985_s24 + $0x78] sm:$0xff] }
  0x18   : > { %256 = vst.msk [vmem:[#allocation2 + $0x89] sm:$0x1] %vm232_vm1, %v11512_v0  ;;  %257 = vst.msk [vmem:[#allocation2 + $0xa1] sm:$0x1] %vm232_vm1, %v11512_v0  ;;  %v331_v17 = vld [vmem:[%s7985_s24 + $0x80] sm:$0xff]  ;;  %v332_v18 = vld [vmem:[%s7985_s24 + $0x88] sm:$0xff] }
  0x19   : > { %258 = vst.msk [vmem:[#allocation2 + $0xb9] sm:$0x1] %vm232_vm1, %v11512_v0  ;;  %259 = vst.msk [vmem:[#allocation2 + $0xd1] sm:$0x1] %vm232_vm1, %v11512_v0  ;;  %v333_v19 = vld [vmem:[%s7985_s24 + $0x90] sm:$0xff]  ;;  %v334_v20 = vld [vmem:[%s7985_s24 + $0x98] sm:$0xff] }
  0x1a   : > { %260 = vst.msk [vmem:[#allocation2 + $0xe9] sm:$0x1] %vm232_vm1, %v11512_v0  ;;  %261 = vst.msk [vmem:[#allocation2 + $0x101] sm:$0x1] %vm232_vm1, %v11512_v0  ;;  %v335_v21 = vld [vmem:[%s7985_s24 + $0xa0] sm:$0xff]  ;;  %v336_v22 = vld [vmem:[%s7985_s24 + $0xa8] sm:$0xff] }
  0x1b   : > { %262 = vst.msk [vmem:[#allocation2 + $0x119] sm:$0x1] %vm232_vm1, %v11512_v0  ;;  %263 = vst.msk [vmem:[#allocation2 + $0x131] sm:$0x1] %vm232_vm1, %v11512_v0  ;;  %v337_v23 = vld [vmem:[%s7985_s24 + $0xb0] sm:$0xff]  ;;  %v338_v24 = vld [vmem:[%s7985_s24 + $0xb8] sm:$0xff] }
  0x1c   : > { %264 = vst.msk [vmem:[#allocation2 + $0x149] sm:$0x1] %vm232_vm1, %v11512_v0  ;;  %265 = vst.msk [vmem:[#allocation2 + $0x161] sm:$0x1] %vm232_vm1, %v11512_v0  ;;  %v339_v57 = vld [vmem:[%s7985_s24 + $0xc0] sm:$0xff]  ;;  %v340_v58 = vld [vmem:[%s7985_s24 + $0xc8] sm:$0xff] }
  0x1d   : > { %266 = vst.msk [vmem:[#allocation2 + $0x179] sm:$0x1] %vm232_vm1, %v11512_v0  ;;  %267 = vst.msk [vmem:[#allocation2 + $0x191] sm:$0x1] %vm232_vm1, %v11512_v0  ;;  %v341_v59 = vld [vmem:[%s7985_s24 + $0xd0] sm:$0xff]  ;;  %v342_v60 = vld [vmem:[%s7985_s24 + $0xd8] sm:$0xff] }
  0x1e   : > { %233 = vst.msk [vmem:[#allocation2] sm:$0x1] %vm232_vm1, %v11512_v0  ;;  %250 = vst.msk [vmem:[#allocation2 + $0x198] sm:$0x1] %vm232_vm1, %v11512_v0  ;;  %v343_v61 = vld [vmem:[%s7985_s24 + $0xe0] sm:$0xff]  ;;  %vm6342_vm12 = vcmask 1041409  }
  0x1f   : > { %270 = vst.msk [vmem:[#allocation3] sm:$0xff] %vm269_vm2, %v11512_v0  ;;  %271 = vst.msk [vmem:[#allocation3 + $0x8] sm:$0xff] %vm269_vm2, %v11512_v0  ;;  %vm6344_vm13 = vcmask 1043459   ;;  %vm6346_vm14 = vcmask 1045509   ;;  %vm6348_vm15 = vcmask 1047559   ;;  %s7850_s17 = smov 40  }
  0x20   : > { %275 = vst.msk [vmem:[#allocation3 + $0x198] sm:$0xff] %vm269_vm2, %v11512_v0  ;;  %276 = vst.msk [vmem:[#allocation3 + $0x1a0] sm:$0xff] %vm269_vm2, %v11512_v0  ;;  %s7851_s20 = smov 32   ;;  %s7852_s21 = smov 24  }
  0x21   : > { %227 = vst.msk [vmem:[#allocation2 + $0x10] sm:$0x3] %vm226_vm3, %v11512_v0  ;;  %231 = vst.msk [vmem:[#allocation2 + $0x1a8] sm:$0x3] %vm226_vm3, %v11512_v0  ;;  %s7853_s22 = smov 48   ;;  %s7006_s23 = sshll.u32 %s11574_s19, 3 }
  0x22   : > { %348 = vst.msk [vmem:[#allocation2 + $0x19] sm:$0xff] %vm223_vm0, %v315_v1  ;;  %349 = vst.msk [vmem:[#allocation2 + $0x21] sm:$0xff] %vm223_vm0, %v316_v2  ;;  %v344_v1 = vld [vmem:[%s7985_s24 + $0xe8] sm:$0xff]  ;;  %v383_v2 = vld [vmem:[%s11507_s1 + $0x18] sm:$0xf]  ;;  %vm6940_vm3 = vcmask 392192   ;;  %s222_s27 = scalar_lea.vmem %s11511_s5, %s7006_s23 }
  0x23   : > { %350 = vst.msk [vmem:[#allocation2 + $0x31] sm:$0xff] %vm223_vm0, %v317_v3  ;;  %351 = vst.msk [vmem:[#allocation2 + $0x39] sm:$0xff] %vm223_vm0, %v318_v4  ;;  %7486 = vmatprep.subr.msk.mxu0 %vm1520_vm6, %v383_v2 }
  0x24   : > { %251 = vst.msk [vmem:[#allocation2 + $0x11] sm:$0x1] %vm232_vm1, %v11512_v0  ;;  %268 = vst.msk [vmem:[#allocation2 + $0x1a9] sm:$0x1] %vm232_vm1, %v11512_v0  ;;  %7487 = vmatpush3.msk.msra.mxu0 %vm1520_vm6, %v383_v2  ;;  %vm6938_vm1 = vcmask 326656  }
  0x25   : > { %352 = vst.msk [vmem:[#allocation2 + $0x49] sm:$0xff] %vm223_vm0, %v319_v5  ;;  %353 = vst.msk [vmem:[#allocation2 + $0x51] sm:$0xff] %vm223_vm0, %v320_v6 }
  0x26   : > { %354 = vst.msk [vmem:[#allocation2 + $0x61] sm:$0xff] %vm223_vm0, %v321_v7  ;;  %355 = vst.msk [vmem:[#allocation2 + $0x69] sm:$0xff] %vm223_vm0, %v322_v8  ;;  %v382_v7 = vld [vmem:[%s11507_s1 + $0x10] sm:$0xff] }
  0x27   : > { %356 = vst.msk [vmem:[#allocation2 + $0x79] sm:$0xff] %vm223_vm0, %v323_v9  ;;  %357 = vst.msk [vmem:[#allocation2 + $0x81] sm:$0xff] %vm223_vm0, %v324_v10  ;;  %v345_v8 = vld [vmem:[%s7985_s24 + $0xf0] sm:$0xff]  ;;  %v346_v9 = vld [vmem:[%s7985_s24 + $0xf8] sm:$0xff]  ;;  %7488 = vmatprep.subr.mxu0 %v382_v7  ;;  %s7847_s24 = smov 16  }
  0x28   : > { %358 = vst.msk [vmem:[#allocation2 + $0x91] sm:$0xff] %vm223_vm0, %v325_v11  ;;  %359 = vst.msk [vmem:[#allocation2 + $0x99] sm:$0xff] %vm223_vm0, %v326_v12  ;;  %7489 = vmatpush3.msra.mxu0 %v382_v7 }
  0x29   : > { %360 = vst.msk [vmem:[#allocation2 + $0xa9] sm:$0xff] %vm223_vm0, %v327_v13  ;;  %361 = vst.msk [vmem:[#allocation2 + $0xb1] sm:$0xff] %vm223_vm0, %v328_v14  ;;  %v8046_v25 = vld [vmem:[#allocation2 + $0x18] sm:$0xff]  ;;  %v8048_v26 = vld [vmem:[#allocation2 + $0x20] sm:$0xff] }
  0x2a   : > { %362 = vst.msk [vmem:[#allocation2 + $0xc1] sm:$0xff] %vm223_vm0, %v329_v15  ;;  %363 = vst.msk [vmem:[#allocation2 + $0xc9] sm:$0xff] %vm223_vm0, %v330_v16  ;;  %v913_v27 = vld [vmem:[#allocation2 + $0x28] sm:$0x3]  ;;  %v1183_v28 = vrot.slane %v8046_v25, 2  ;;  %v8055_v29 = vrot.slane %v8048_v26, 2 }
  0x2b   : > { %364 = vst.msk [vmem:[#allocation2 + $0xd9] sm:$0xff] %vm223_vm0, %v331_v17  ;;  %365 = vst.msk [vmem:[#allocation2 + $0xe1] sm:$0xff] %vm223_vm0, %v332_v18  ;;  %v1007_v30 = vrot.slane %v8046_v25, 1  ;;  %v8059_v31 = vrot.slane %v8048_v26, 1  ;;  %v8061_v32 = vld [vmem:[#allocation2 + $0x38] sm:$0xff]  ;;  %v1186_v33 = vrot.slane %v913_v27, 2 }
  0x2c   : > { %366 = vst.msk [vmem:[#allocation2 + $0xf1] sm:$0xff] %vm223_vm0, %v333_v19  ;;  %367 = vst.msk [vmem:[#allocation2 + $0xf9] sm:$0xff] %vm223_vm0, %v334_v20  ;;  %v1010_v34 = vrot.slane %v913_v27, 1  ;;  %v916_v35 = vld [vmem:[#allocation2 + $0x40] sm:$0x3]  ;;  %v8063_v36 = vld [vmem:[#allocation2 + $0x30] sm:$0xff]  ;;  %v8067_v37 = vsel %vm670_vm4, %v1183_v28, %v8055_v29 }
  0x2d   : > { %368 = vst.msk [vmem:[#allocation2 + $0x109] sm:$0xff] %vm223_vm0, %v335_v21  ;;  %369 = vst.msk [vmem:[#allocation2 + $0x111] sm:$0xff] %vm223_vm0, %v336_v22  ;;  %v8071_v38 = vsel %vm493_vm5, %v1007_v30, %v8059_v31  ;;  %1263 = vrot.lane.b32.xlu1 %v8067_v37, %s7845_s25  ;;  %v8078_v39 = vrot.slane %v8061_v32, 1  ;;  %v1187_v40 = vsel %vm670_vm4, %v8055_v29, %v1186_v33  ;;  %v1015_v42 = vrot.slane %v916_v35, 1  ;;  %v8097_v49 = vld [vmem:[#allocation2 + $0x50] sm:$0xff]  ;;  %v8099_v51 = vld [vmem:[#allocation2 + $0x48] sm:$0xff] }
  0x2e   : > { %370 = vst.msk [vmem:[#allocation2 + $0x121] sm:$0xff] %vm223_vm0, %v337_v23  ;;  %371 = vst.msk [vmem:[#allocation2 + $0x129] sm:$0xff] %vm223_vm0, %v338_v24  ;;  %1087 = vrot.lane.b32.xlu0 %v8071_v38, %s7846_s26  ;;  %v1011_v41 = vsel %vm493_vm5, %v8059_v31, %v1010_v34  ;;  %v1012_v43 = vrot.slane %v8063_v36, 1  ;;  %v8088_v44 = vrot.slane %v8061_v32, 2  ;;  %v1191_v47 = vrot.slane %v916_v35, 2  ;;  %v8127_v63 = vld [vmem:[#allocation2 + $0x68] sm:$0xff] }
  0x2f   : > { %v1016_v45 = vsel %vm493_vm5, %v8078_v39, %v1015_v42  ;;  %v1188_v48 = vrot.slane %v8063_v36, 2  ;;  %v919_v50 = vld [vmem:[#allocation2 + $0x58] sm:$0x3]  ;;  %v8105_v52 = vrot.slane %v8097_v49, 1  ;;  %v1017_v56 = vrot.slane %v8099_v51, 1  ;;  %372 = vst.msk [vmem:[#allocation2 + $0x139] sm:$0xff] %vm223_vm0, %v339_v57 }
  0x30   : > { %v8094_v46 = vsel %vm493_vm5, %v1012_v43, %v8078_v39  ;;  %v1192_v53 = vsel %vm670_vm4, %v8088_v44, %v1191_v47  ;;  %v1020_v55 = vrot.slane %v919_v50, 1  ;;  %373 = vst.msk [vmem:[#allocation2 + $0x141] sm:$0xff] %vm223_vm0, %v340_v58  ;;  %v8125_v62 = vrot.slane %v8097_v49, 2  ;;  %374 = vst.msk [vmem:[#allocation2 + $0x151] sm:$0xff] %vm223_vm0, %v341_v59  ;;  %v922_v10 = vld [vmem:[#allocation2 + $0x70] sm:$0x3] }
  0x31   : > { %1265 = vrot.lane.b32.xlu1 %v1187_v40, %s7845_s25  ;;  %v8111_v54 = vsel %vm670_vm4, %v1188_v48, %v8088_v44  ;;  %375 = vst.msk [vmem:[#allocation2 + $0x159] sm:$0xff] %vm223_vm0, %v342_v60  ;;  %376 = vst.msk [vmem:[#allocation2 + $0x169] sm:$0xff] %vm223_vm0, %v343_v61  ;;  %v8140_v4 = vsel %vm493_vm5, %v1017_v56, %v8105_v52  ;;  %v1196_v5 = vrot.slane %v919_v50, 2  ;;  %v1193_v6 = vrot.slane %v8099_v51, 2  ;;  %v8150_v11 = vld [vmem:[#allocation2 + $0x60] sm:$0xff]  ;;  %v8185_v24 = vld [vmem:[#allocation2 + $0x78] sm:$0xff] }
  0x32   : > { %1089 = vrot.lane.b32.xlu0 %v1011_v41, %s7846_s26  ;;  %v1021_v3 = vsel %vm493_vm5, %v8105_v52, %v1020_v55  ;;  %377 = vst.msk [vmem:[#allocation2 + $0x171] sm:$0xff] %vm223_vm0, %v344_v1  ;;  %378 = vst.msk [vmem:[#allocation2 + $0x181] sm:$0xff] %vm223_vm0, %v345_v8  ;;  %v8159_v12 = vrot.slane %v8127_v63, 1  ;;  %v1025_v15 = vrot.slane %v922_v10, 1  ;;  %v11515_v16 = vrot.slane %v8150_v11, 1  ;;  %v8183_v22 = vld [vmem:[#allocation2 + $0x80] sm:$0xff] }
  0x33   : > { %379 = vst.msk [vmem:[#allocation2 + $0x189] sm:$0xff] %vm223_vm0, %v346_v9  ;;  %v1197_v13 = vsel %vm670_vm4, %v8125_v62, %v1196_v5  ;;  %v8165_v14 = vsel %vm670_vm4, %v1193_v6, %v8125_v62  ;;  %v8172_v17 = vrot.slane %v8127_v63, 2  ;;  %v1201_v20 = vrot.slane %v922_v10, 2  ;;  %v925_v23 = vld [vmem:[#allocation2 + $0x88] sm:$0x3]  ;;  %v8217_v48 = vld [vmem:[#allocation2 + $0x90] sm:$0xff] }
  0x34   : > { %v1026_v18 = vsel %vm493_vm5, %v8159_v12, %v1025_v15  ;;  %v8180_v19 = vsel %vm493_vm5, %v11515_v16, %v8159_v12  ;;  %v11514_v21 = vrot.slane %v8150_v11, 2  ;;  %v8191_v27 = vrot.slane %v8183_v22, 1  ;;  %v928_v47 = vld [vmem:[#allocation2 + $0xa0] sm:$0x3]  ;;  %v8245_v2 = vld [vmem:[#allocation2 + $0xb0] sm:$0xff]  ;;  %v8247_v5 = vld [vmem:[#allocation2 + $0xa8] sm:$0xff] }
  0x35   : > { %1093 = vrot.lane.b32.xlu1 %v1016_v45, %s7846_s26  ;;  %v1202_v28 = vsel %vm670_vm4, %v8172_v17, %v1201_v20  ;;  %v1030_v33 = vrot.slane %v925_v23, 1  ;;  %v1027_v34 = vrot.slane %v8185_v24, 1  ;;  %v8206_v35 = vrot.slane %v8183_v22, 2  ;;  %v8215_v45 = vld [vmem:[#allocation2 + $0x98] sm:$0xff] }
  0x36   : > { %1091 = vrot.lane.b32.xlu0 %v8094_v46, %s7846_s26  ;;  %v8199_v30 = vsel %vm670_vm4, %v11514_v21, %v8172_v17  ;;  %v1206_v42 = vrot.slane %v925_v23, 2  ;;  %v1203_v43 = vrot.slane %v8185_v24, 2  ;;  %v8223_v50 = vrot.slane %v8215_v45, 1 }
  0x37   : > { %v1031_v40 = vsel %vm493_vm5, %v8191_v27, %v1030_v33  ;;  %v8212_v41 = vsel %vm493_vm5, %v1027_v34, %v8191_v27  ;;  %v1035_v56 = vrot.slane %v928_v47, 1  ;;  %v1032_v57 = vrot.slane %v8217_v48, 1  ;;  %v934_v33 = vld [vmem:[#allocation2 + $0xd0] sm:$0x3]  ;;  %v8269_v34 = vld [vmem:[#allocation2 + $0xc0] sm:$0xff] }
  0x38   : > { %v8229_v55 = vsel %vm670_vm4, %v1203_v43, %v8206_v35  ;;  %v8236_v58 = vrot.slane %v8215_v45, 2  ;;  %v1211_v61 = vrot.slane %v928_v47, 2  ;;  %v1208_v1 = vrot.slane %v8217_v48, 2  ;;  %v8347_v21 = vld [vmem:[#allocation2 + $0x140] sm:$0xff] }
  0x39   : > { %1269 = vrot.lane.b32.xlu1 %v1192_v53, %s7845_s25  ;;  %v1207_v53 = vsel %vm670_vm4, %v8206_v35, %v1206_v42  ;;  %v1036_v59 = vsel %vm493_vm5, %v8223_v50, %v1035_v56  ;;  %v8242_v60 = vsel %vm493_vm5, %v1032_v57, %v8223_v50  ;;  %v1038_v6 = vrot.slane %v8245_v2, 1  ;;  %11531 = vst [vmem:[#allocation7_spill] sm:$0xff] %v8347_v21 }
  0x3a   : > { %1267 = vrot.lane.b32.xlu0 %v8111_v54, %s7845_s25  ;;  %11528 = vst [vmem:[#allocation4_spill] sm:$0xff] %v8236_v58  ;;  %v1212_v7 = vsel %vm670_vm4, %v8236_v58, %v1211_v61  ;;  %v8257_v8 = vsel %vm670_vm4, %v1208_v1, %v8236_v58  ;;  %v1037_v10 = vrot.slane %v8247_v5, 1  ;;  %v1213_v23 = vrot.slane %v8247_v5, 2 }
  0x3b   : > { %v1045_v47 = vrot.slane %v934_v33, 1  ;;  %v1221_v61 = vrot.slane %v934_v33, 2  ;;  %v1218_v1 = vrot.slane %v8269_v34, 2 }
  0x3d   : > { %1097 = vrot.lane.b32.xlu1 %v1021_v3, %s7846_s26  ;;  %v931_v3 = vld [vmem:[#allocation2 + $0xb8] sm:$0x3] }
  0x3e   : > { %1095 = vrot.lane.b32.xlu0 %v8140_v4, %s7846_s26  ;;  %v1040_v9 = vrot.slane %v931_v3, 1  ;;  %v1216_v20 = vrot.slane %v931_v3, 2  ;;  %v8283_v3 = vld [vmem:[#allocation2 + $0xe0] sm:$0xff] }
  0x40   : > { %v1041_v15 = vsel %vm493_vm5, %v1038_v6, %v1040_v9  ;;  %v1048_v9 = vrot.slane %v8283_v3, 1 }
  0x41   : > { %1273 = vrot.lane.b32.xlu1 %v1197_v13, %s7845_s25  ;;  %v1214_v13 = vrot.slane %v8245_v2, 2 }
  0x42   : > { %1271 = vrot.lane.b32.xlu0 %v8165_v14, %s7845_s25 }
  0x43   : > { %v1217_v42 = vsel %vm670_vm4, %v1214_v13, %v1216_v20  ;;  %v1215_v43 = vsel %vm670_vm4, %v1213_v23, %v1214_v13  ;;  %v1224_v20 = vrot.slane %v8283_v3, 2 }
  0x45   : > { %1101 = vrot.lane.b32.xlu1 %v1026_v18, %s7846_s26  ;;  %v1039_v18 = vsel %vm493_vm5, %v1037_v10, %v1038_v6  ;;  %v937_v6 = vld [vmem:[#allocation2 + $0xe8] sm:$0x3] }
  0x46   : > { %1099 = vrot.lane.b32.xlu0 %v8180_v19, %s7846_s26 }
  0x49   : > { %1277 = vrot.lane.b32.xlu1 %v1202_v28, %s7845_s25  ;;  %v8267_v28 = vld [vmem:[#allocation2 + $0xc8] sm:$0xff] }
  0x4a   : > { %1275 = vrot.lane.b32.xlu0 %v8199_v30, %s7845_s25  ;;  %v1219_v56 = vrot.slane %v8267_v28, 2 }
  0x4c   : > { %v1222_v10 = vsel %vm670_vm4, %v1219_v56, %v1221_v61  ;;  %v1220_v13 = vsel %vm670_vm4, %v1218_v1, %v1219_v56 }
  0x4d   : > { %1105 = vrot.lane.b32.xlu1 %v1031_v40, %s7846_s26  ;;  %v1043_v40 = vrot.slane %v8267_v28, 1 }
  0x4e   : > { %1103 = vrot.lane.b32.xlu0 %v8212_v41, %s7846_s26 }
  0x4f   : > { %v1046_v57 = vsel %vm493_vm5, %v1043_v40, %v1045_v47  ;;  %v940_v47 = vld [vmem:[#allocation2 + $0x100] sm:$0x3] }
  0x50   : > { %v1055_v61 = vrot.slane %v940_v47, 1 }
  0x51   : > { %1281 = vrot.lane.b32.xlu1 %v1207_v53, %s7845_s25  ;;  %v1042_v53 = vrot.slane %v8269_v34, 1 }
  0x52   : > { %1279 = vrot.lane.b32.xlu0 %v8229_v55, %s7845_s25 }
  0x55   : > { %1109 = vrot.lane.b32.xlu1 %v1036_v59, %s7846_s26  ;;  %v1044_v59 = vsel %vm493_vm5, %v1042_v53, %v1043_v40  ;;  %v1226_v40 = vrot.slane %v937_v6, 2  ;;  %v8301_v53 = vld [vmem:[#allocation2 + $0xf0] sm:$0xff] }
  0x56   : > { %1107 = vrot.lane.b32.xlu0 %v8242_v60, %s7846_s26  ;;  %v1052_v1 = vrot.slane %v8301_v53, 1 }
  0x59   : > { %1285 = vrot.lane.b32.xlu1 %v1212_v7, %s7845_s25  ;;  %v8285_v7 = vld [vmem:[#allocation2 + $0xd8] sm:$0xff] }
  0x5a   : > { %1283 = vrot.lane.b32.xlu0 %v8257_v8, %s7845_s25 }
  0x5d   : > { %1113 = vrot.lane.b32.xlu1 %v1041_v15, %s7846_s26  ;;  %v1050_v15 = vrot.slane %v937_v6, 1 }
  0x5e   : > { %1111 = vrot.lane.b32.xlu0 %v1039_v18, %s7846_s26  ;;  %v1047_v18 = vrot.slane %v8285_v7, 1 }
  0x5f   : > { %v1051_v23 = vsel %vm493_vm5, %v1048_v9, %v1050_v15  ;;  %v1228_v15 = vrot.slane %v8301_v53, 2 }
  0x60   : > { %v1049_v33 = vsel %vm493_vm5, %v1047_v18, %v1048_v9  ;;  %v8315_v18 = vld [vmem:[#allocation2 + $0x110] sm:$0xff] }
  0x61   : > { %1289 = vrot.lane.b32.xlu1 %v1217_v42, %s7845_s25  ;;  %v1223_v42 = vrot.slane %v8285_v7, 2 }
  0x62   : > { %1287 = vrot.lane.b32.xlu0 %v1215_v43, %s7845_s25  ;;  %v8299_v43 = vld [vmem:[#allocation2 + $0xf8] sm:$0xff] }
  0x63   : > { %v1053_v56 = vrot.slane %v8299_v43, 1  ;;  %v1229_v6 = vrot.slane %v8299_v43, 2 }
  0x65   : > { %1117 = vrot.lane.b32.xlu1 %v1046_v57, %s7846_s26  ;;  %v1227_v57 = vsel %vm670_vm4, %v1224_v20, %v1226_v40  ;;  %v1056_v9 = vsel %vm493_vm5, %v1053_v56, %v1055_v61 }
  0x66   : > { %1115 = vrot.lane.b32.xlu0 %v1044_v59, %s7846_s26  ;;  %v1225_v59 = vsel %vm670_vm4, %v1223_v42, %v1224_v20  ;;  %v8317_v20 = vld [vmem:[#allocation2 + $0x108] sm:$0xff]  ;;  %v1230_v42 = vsel %vm670_vm4, %v1228_v15, %v1229_v6 }
  0x69   : > { %1293 = vrot.lane.b32.xlu1 %v1222_v10, %s7845_s25  ;;  %v1054_v10 = vsel %vm493_vm5, %v1052_v1, %v1053_v56  ;;  %v1234_v56 = vrot.slane %v8315_v18, 2 }
  0x6a   : > { %1291 = vrot.lane.b32.xlu0 %v1220_v13, %s7845_s25  ;;  %v1231_v13 = vrot.slane %v940_v47, 2  ;;  %v1057_v47 = vrot.slane %v8317_v20, 1 }
  0x6c   : > { %v1232_v40 = vsel %vm670_vm4, %v1229_v6, %v1231_v13  ;;  %v946_v13 = vld [vmem:[#allocation2 + $0x130] sm:$0x3]  ;;  %v8333_v6 = vld [vmem:[#allocation2 + $0x120] sm:$0xff] }
  0x6d   : > { %1121 = vrot.lane.b32.xlu1 %v1051_v23, %s7846_s26  ;;  %v943_v23 = vld [vmem:[#allocation2 + $0x118] sm:$0x3]  ;;  %11530 = vst [vmem:[#allocation6_spill] sm:$0xff] %v8333_v6  ;;  %v1238_v0 = vrot.slane %v8333_v6, 2 }
  0x6e   : > { %1119 = vrot.lane.b32.xlu0 %v1049_v33, %s7846_s26  ;;  %v1058_v33 = vrot.slane %v8315_v18, 1  ;;  %v1236_v1 = vrot.slane %v943_v23, 2 }
  0x70   : > { %v1059_v61 = vsel %vm493_vm5, %v1057_v47, %v1058_v33 }
  0x71   : > { %1297 = vrot.lane.b32.xlu1 %v1227_v57, %s7845_s25  ;;  %v1060_v57 = vrot.slane %v943_v23, 1  ;;  %v1062_v23 = vrot.slane %v8333_v6, 1  ;;  %v8363_v6 = vld [vmem:[#allocation2 + $0x158] sm:$0xff] }
  0x72   : > { %1295 = vrot.lane.b32.xlu0 %v1225_v59, %s7845_s25  ;;  %11533 = vst [vmem:[#allocation9_spill] sm:$0xff] %v8363_v6 }
  0x73   : > { %v1061_v59 = vsel %vm493_vm5, %v1058_v33, %v1060_v57  ;;  %v1065_v57 = vrot.slane %v946_v13, 1 }
  0x75   : > { %1125 = vrot.lane.b32.xlu1 %v1056_v9, %s7846_s26  ;;  %v1233_v9 = vrot.slane %v8317_v20, 2 }
  0x76   : > { %1123 = vrot.lane.b32.xlu0 %v1054_v10, %s7846_s26  ;;  %v8331_v10 = vld [vmem:[#allocation2 + $0x128] sm:$0xff] }
  0x77   : > { %11529 = vst [vmem:[#allocation5_spill] sm:$0xff] %v8331_v10  ;;  %v1063_v15 = vrot.slane %v8331_v10, 1  ;;  %v1239_v33 = vrot.slane %v8331_v10, 2 }
  0x79   : > { %1301 = vrot.lane.b32.xlu1 %v1232_v40, %s7845_s25  ;;  %v1237_v40 = vsel %vm670_vm4, %v1234_v56, %v1236_v1  ;;  %v1066_v47 = vsel %vm493_vm5, %v1063_v15, %v1065_v57  ;;  %v949_v1 = vld [vmem:[#allocation2 + $0x148] sm:$0x3] }
  0x7a   : > { %1299 = vrot.lane.b32.xlu0 %v1230_v42, %s7845_s25  ;;  %v1235_v42 = vsel %vm670_vm4, %v1233_v9, %v1234_v56  ;;  %v8349_v56 = vld [vmem:[#allocation2 + $0x138] sm:$0xff]  ;;  %v1068_v9 = vrot.slane %v8347_v21, 1  ;;  %v1070_v57 = vrot.slane %v949_v1, 1 }
  0x7b   : > { %11532 = vst [vmem:[#allocation8_spill] sm:$0xff] %v8349_v56  ;;  %v1243_v16 = vrot.slane %v8349_v56, 2 }
  0x7d   : > { %1129 = vrot.lane.b32.xlu1 %v1061_v59, %s7846_s26  ;;  %v1064_v59 = vsel %vm493_vm5, %v1062_v23, %v1063_v15  ;;  %v1244_v15 = vrot.slane %v8347_v21, 2  ;;  %v1071_v23 = vsel %vm493_vm5, %v1068_v9, %v1070_v57  ;;  %v8379_v21 = vld [vmem:[#allocation2 + $0x170] sm:$0xff] }
  0x7e   : > { %1127 = vrot.lane.b32.xlu0 %v1059_v61, %s7846_s26  ;;  %v1241_v61 = vrot.slane %v946_v13, 2  ;;  %v1067_v13 = vrot.slane %v8349_v56, 1  ;;  %11535 = vst [vmem:[#allocation11_spill] sm:$0xff] %v8379_v21 }
  0x81   : > { %1305 = vrot.lane.b32.xlu1 %v1237_v40, %s7845_s25  ;;  %v1242_v40 = vsel %vm670_vm4, %v1239_v33, %v1241_v61  ;;  %v952_v61 = vld [vmem:[#allocation2 + $0x160] sm:$0x3] }
  0x82   : > { %1303 = vrot.lane.b32.xlu0 %v1235_v42, %s7845_s25  ;;  %v1240_v42 = vsel %vm670_vm4, %v1238_v0, %v1239_v33  ;;  %v8365_v0 = vld [vmem:[#allocation2 + $0x150] sm:$0xff]  ;;  %v1073_v33 = vrot.slane %v8363_v6, 1  ;;  %v1075_v57 = vrot.slane %v952_v61, 1 }
  0x83   : > { %11534 = vst [vmem:[#allocation10_spill] sm:$0xff] %v8365_v0  ;;  %v1248_v56 = vrot.slane %v8365_v0, 2 }
  0x85   : > { %1133 = vrot.lane.b32.xlu1 %v1066_v47, %s7846_s26  ;;  %v1069_v47 = vsel %vm493_vm5, %v1067_v13, %v1068_v9  ;;  %v1249_v9 = vrot.slane %v8363_v6, 2  ;;  %v1076_v13 = vsel %vm493_vm5, %v1073_v33, %v1075_v57  ;;  %v8395_v6 = vld [vmem:[#allocation2 + $0x188] sm:$0xff] }
  0x86   : > { %1131 = vrot.lane.b32.xlu0 %v1064_v59, %s7846_s26  ;;  %v1246_v59 = vrot.slane %v949_v1, 2  ;;  %v1072_v1 = vrot.slane %v8365_v0, 1  ;;  %11537 = vst [vmem:[#allocation13_spill] sm:$0xff] %v8395_v6 }
  0x89   : > { %1309 = vrot.lane.b32.xlu1 %v1242_v40, %s7845_s25  ;;  %v1247_v40 = vsel %vm670_vm4, %v1244_v15, %v1246_v59  ;;  %v955_v59 = vld [vmem:[#allocation2 + $0x178] sm:$0x3] }
  0x8a   : > { %1307 = vrot.lane.b32.xlu0 %v1240_v42, %s7845_s25  ;;  %v1245_v42 = vsel %vm670_vm4, %v1243_v16, %v1244_v15  ;;  %v8381_v16 = vld [vmem:[#allocation2 + $0x168] sm:$0xff]  ;;  %v1078_v15 = vrot.slane %v8379_v21, 1  ;;  %v1080_v57 = vrot.slane %v955_v59, 1 }
  0x8b   : > { %11536 = vst [vmem:[#allocation12_spill] sm:$0xff] %v8381_v16  ;;  %v1253_v0 = vrot.slane %v8381_v16, 2 }
  0x8d   : > { %1137 = vrot.lane.b32.xlu1 %v1071_v23, %s7846_s26  ;;  %v1074_v23 = vsel %vm493_vm5, %v1072_v1, %v1073_v33  ;;  %v1254_v33 = vrot.slane %v8379_v21, 2  ;;  %v1081_v1 = vsel %vm493_vm5, %v1078_v15, %v1080_v57 }
  0x8e   : > { %1135 = vrot.lane.b32.xlu0 %v1069_v47, %s7846_s26  ;;  %v1251_v47 = vrot.slane %v952_v61, 2  ;;  %v1077_v61 = vrot.slane %v8381_v16, 1 }
  0x91   : > { %1313 = vrot.lane.b32.xlu1 %v1247_v40, %s7845_s25  ;;  %v1252_v40 = vsel %vm670_vm4, %v1249_v9, %v1251_v47  ;;  %v958_v47 = vld [vmem:[#allocation2 + $0x190] sm:$0x3] }
  0x92   : > { %1311 = vrot.lane.b32.xlu0 %v1245_v42, %s7845_s25  ;;  %v1250_v42 = vsel %vm670_vm4, %v1248_v56, %v1249_v9  ;;  %v8397_v56 = vld [vmem:[#allocation2 + $0x180] sm:$0xff]  ;;  %v1083_v9 = vrot.slane %v8395_v6, 1  ;;  %v1085_v57 = vrot.slane %v958_v47, 1 }
  0x93   : > { %v1258_v58 = vrot.slane %v8397_v56, 2 }
  0x95   : > { %1141 = vrot.lane.b32.xlu1 %v1076_v13, %s7846_s26  ;;  %v1079_v13 = vsel %vm493_vm5, %v1077_v61, %v1078_v15  ;;  %v8405_v15 = vld [vmem:[#allocation2] sm:$0xff]  ;;  %v8407_v61 = vld [vmem:[#allocation2 + $0x8] sm:$0xff] }
  0x96   : > { %1139 = vrot.lane.b32.xlu0 %v1074_v23, %s7846_s26  ;;  %v1256_v23 = vrot.slane %v955_v59, 2  ;;  %v1082_v59 = vrot.slane %v8397_v56, 1  ;;  %11538 = vst [vmem:[#allocation14_spill] sm:$0xff] %v8407_v61 }
  0x98   : > { %v1084_v10 = vsel %vm493_vm5, %v1082_v59, %v1083_v9 }
  0x99   : > { %1317 = vrot.lane.b32.xlu1 %v1252_v40, %s7845_s25  ;;  %v1257_v40 = vsel %vm670_vm4, %v1254_v33, %v1256_v23  ;;  %v1086_v23 = vsel %vm493_vm5, %v1083_v9, %v1085_v57  ;;  %v380_v9 = vld [vmem:[%s11507_s1] sm:$0xff] }
  0x9a   : > { %1315 = vrot.lane.b32.xlu0 %v1250_v42, %s7845_s25  ;;  %v1255_v42 = vsel %vm670_vm4, %v1253_v0, %v1254_v33  ;;  %v494_v0 = vrot.slane %v8405_v15, 1  ;;  %v495_v33 = vrot.slane %v8407_v61, 1 }
  0x9c   : > { %v496_v59 = vsel %vm493_vm5, %v494_v0, %v495_v33  ;;  %v671_v0 = vrot.slane %v8405_v15, 2 }
  0x9d   : > { %1145 = vrot.lane.b32.xlu1 %v1081_v1, %s7846_s26 }
  0x9e   : > { %1143 = vrot.lane.b32.xlu0 %v1079_v13, %s7846_s26 }
  0x9f   : > { %v1264_v16 = vpop.permute.xlu1 %1263 }
  0xa0   : > { %v1088_v21 = vpop.permute.xlu0 %1087 }
  0xa1   : > { %v1359_v1 = vsel %vm223_vm0, %v8046_v25, %v1088_v21  ;;  %1321 = vrot.lane.b32.xlu1 %v1257_v40, %s7845_s25  ;;  %v1259_v25 = vrot.slane %v8395_v6, 2  ;;  %v381_v21 = vld [vmem:[%s11507_s1 + $0x8] sm:$0xf] }
  0xa2   : > { %1319 = vrot.lane.b32.xlu0 %v1255_v42, %s7845_s25  ;;  %v1391_v13 = vsel %vm269_vm2, %v1359_v1, %v1264_v16  ;;  %v399_v42 = vld [vmem:[#allocation2 + $0x10] sm:$0x3]  ;;  %7538 = vmatprep.subr.msk.mxu1 %vm1520_vm6, %v381_v21 }
  0xa3   : > { %7490 = vmatprep.mubr.msk.f32.mxu0 %vm1423_vm7, %v1391_v13  ;;  %v1266_v40 = vpop.permute.xlu1 %1265  ;;  %7539 = vmatpush3.msk.msra.mxu1 %vm1520_vm6, %v381_v21  ;;  %v1260_v13 = vsel %vm670_vm4, %v1258_v58, %v1259_v25  ;;  %v497_v6 = vrot.slane %v399_v42, 1 }
  0xa4   : > { %v1090_v16 = vpop.permute.xlu0 %1089  ;;  %7540 = vmatprep.subr.mxu1 %v380_v9 }
  0xa5   : > { %v1360_v1 = vsel %vm223_vm0, %v8048_v26, %v1090_v16  ;;  %1149 = vrot.lane.b32.xlu1 %v1086_v23, %s7846_s26  ;;  %v1261_v26 = vrot.slane %v958_v47, 2  ;;  %7541 = vmatpush3.msra.mxu1 %v380_v9  ;;  %v498_v23 = vsel %vm493_vm5, %v495_v33, %v497_v6  ;;  %v385_v6 = vld [vmem:[%s11507_s1 + $0x28] sm:$0xf] }
  0xa6   : > { %1147 = vrot.lane.b32.xlu0 %v1084_v10, %s7846_s26  ;;  %v1392_v57 = vsel %vm269_vm2, %v1360_v1, %v1266_v40  ;;  %v672_v10 = vrot.slane %v8407_v61, 2  ;;  %v674_v1 = vrot.slane %v399_v42, 2  ;;  %7590 = vmatprep.subr.msk.mxu0 %vm1520_vm6, %v385_v6 }
  0xa7   : > { %7491 = vmatmul.mubr.msk.f32.vlgmr.msra.gmra.mxu0 %vm1423_vm7, %v1392_v57  ;;  %v1094_v21 = vpop.permute.xlu1 %1093  ;;  %v1262_v40 = vsel %vm670_vm4, %v1259_v25, %v1261_v26  ;;  %v384_v26 = vld [vmem:[%s11507_s1 + $0x20] sm:$0xff] }
  0xa8   : > { %v1092_v16 = vpop.permute.xlu0 %1091  ;;  %v1362_v58 = vsel %vm223_vm0, %v8061_v32, %v1094_v21  ;;  %v675_v32 = vsel %vm670_vm4, %v672_v10, %v674_v1  ;;  %7591 = vmatpush3.msk.msra.mxu0 %vm1520_vm6, %v385_v6 }
  0xa9   : > { %574 = vrot.lane.b32.xlu1 %v496_v59, %s7846_s26  ;;  %v1361_v47 = vsel %vm223_vm0, %v8063_v36, %v1092_v16  ;;  %v2076_v59 = vld [vmem:[#allocation2 + $0x40] sm:$0x3]  ;;  %v673_v36 = vsel %vm670_vm4, %v671_v0, %v672_v10  ;;  %7592 = vmatprep.subr.mxu0 %v384_v26  ;;  %v402_v0 = vld [vmem:[#allocation2 + $0x28] sm:$0x3] }
  0xaa   : > { %1323 = vrot.lane.b32.xlu0 %v1260_v13, %s7845_s25  ;;  %v2173_v33 = vrot.slane %v2076_v59, 1  ;;  %7593 = vmatpush3.msra.mxu0 %v384_v26 }
  0xab   : > { %v1270_v9 = vpop.permute.xlu1 %1269 }
  0xac   : > { %v1268_v57 = vpop.permute.xlu0 %1267  ;;  %v1394_v13 = vsel %vm269_vm2, %v1362_v58, %v1270_v9  ;;  %v2349_v58 = vrot.slane %v2076_v59, 2 }
  0xad   : > { %v1393_v61 = vsel %vm269_vm2, %v1361_v47, %v1268_v57  ;;  %576 = vrot.lane.b32.xlu1 %v498_v23, %s7846_s26  ;;  %v502_v47 = vrot.slane %v402_v0, 1 }
  0xae   : > { %1325 = vrot.lane.b32.xlu0 %v1262_v40, %s7845_s25  ;;  %7493 = vmatprep.mubr.msk.f32.mxu0 %vm1423_vm7, %v1393_v61  ;;  %v2174_v61 = vsel %vm493_vm5, %v8078_v39, %v2173_v33  ;;  %v2350_v9 = vsel %vm670_vm4, %v8088_v44, %v2349_v58 }
  0xaf   : > { %7494 = vmatmul.mubr.msk.f32.gmra.mxu0 %vm1423_vm7, %v1394_v13  ;;  %v1098_v25 = vpop.permute.xlu1 %1097 }
  0xb0   : > { %v1096_v42 = vpop.permute.xlu0 %1095  ;;  %v1364_v21 = vsel %vm223_vm0, %v8097_v49, %v1098_v25 }
  0xb1   : > { %753 = vrot.lane.b32.xlu1 %v675_v32, %s7845_s25  ;;  %v1363_v16 = vsel %vm223_vm0, %v8099_v51, %v1096_v42  ;;  %v503_v32 = vsel %vm493_vm5, %v8059_v31, %v502_v47 }
  0xb2   : > { %751 = vrot.lane.b32.xlu0 %v673_v36, %s7845_s25  ;;  %v679_v36 = vrot.slane %v402_v0, 2 }
  0xb3   : > { %v1274_v10 = vpop.permute.xlu1 %1273 }
  0xb4   : > { %v1272_v23 = vpop.permute.xlu0 %1271  ;;  %v1396_v40 = vsel %vm269_vm2, %v1364_v21, %v1274_v10  ;;  %v680_v26 = vsel %vm670_vm4, %v8055_v29, %v679_v36 }
  0xb5   : > { %v1395_v1 = vsel %vm269_vm2, %v1363_v16, %v1272_v23  ;;  %2252 = vrot.lane.b32.xlu1 %v2174_v61, %s7846_s26 }
  0xb6   : > { %2250 = vrot.lane.b32.xlu0 %v8094_v46, %s7846_s26  ;;  %7496 = vmatprep.mubr.msk.f32.mxu0 %vm1423_vm7, %v1395_v1  ;;  %v405_v1 = vld [vmem:[#allocation2 + $0x40] sm:$0x3] }
  0xb7   : > { %7497 = vmatmul.mubr.msk.f32.gmra.mxu0 %vm1423_vm7, %v1396_v40  ;;  %v1102_v49 = vpop.permute.xlu1 %1101  ;;  %v507_v0 = vrot.slane %v405_v1, 1 }
  0xb8   : > { %v1100_v51 = vpop.permute.xlu0 %1099  ;;  %v1366_v57 = vsel %vm223_vm0, %v8127_v63, %v1102_v49 }
  0xb9   : > { %578 = vrot.lane.b32.xlu1 %v8071_v38, %s7846_s26  ;;  %v1365_v59 = vsel %vm223_vm0, %v8150_v11, %v1100_v51  ;;  %v2079_v38 = vld [vmem:[#allocation2 + $0x58] sm:$0x3] }
  0xba   : > { %2426 = vrot.lane.b32.xlu0 %v8111_v54, %s7845_s25  ;;  %v2178_v31 = vrot.slane %v2079_v38, 1 }
  0xbb   : > { %v1278_v13 = vpop.permute.xlu1 %1277 }
  0xbc   : > { %v1276_v6 = vpop.permute.xlu0 %1275  ;;  %v1398_v33 = vsel %vm269_vm2, %v1366_v57, %v1278_v13  ;;  %v2179_v23 = vsel %vm493_vm5, %v8105_v52, %v2178_v31  ;;  %v508_v57 = vsel %vm493_vm5, %v8078_v39, %v507_v0 }
  0xbd   : > { %v1397_v25 = vsel %vm269_vm2, %v1365_v59, %v1276_v6  ;;  %580 = vrot.lane.b32.xlu1 %v503_v32, %s7846_s26  ;;  %v684_v59 = vrot.slane %v405_v1, 2 }
  0xbe   : > { %2428 = vrot.lane.b32.xlu0 %v2350_v9, %s7845_s25  ;;  %7499 = vmatprep.mubr.msk.f32.mxu0 %vm1423_vm7, %v1397_v25 }
  0xbf   : > { %7500 = vmatmul.mubr.msk.f32.gmra.mxu0 %vm1423_vm7, %v1398_v33  ;;  %v1106_v63 = vpop.permute.xlu1 %1105  ;;  %v685_v32 = vsel %vm670_vm4, %v8088_v44, %v684_v59 }
  0xc0   : > { %v1104_v42 = vpop.permute.xlu0 %1103  ;;  %v1368_v61 = vsel %vm223_vm0, %v8183_v22, %v1106_v63 }
  0xc1   : > { %757 = vrot.lane.b32.xlu1 %v680_v26, %s7845_s25  ;;  %v1367_v21 = vsel %vm223_vm0, %v8185_v24, %v1104_v42  ;;  %v408_v26 = vld [vmem:[#allocation2 + $0x58] sm:$0x3] }
  0xc2   : > { %755 = vrot.lane.b32.xlu0 %v8067_v37, %s7845_s25  ;;  %v2354_v37 = vrot.slane %v2079_v38, 2  ;;  %v512_v31 = vrot.slane %v408_v26, 1 }
  0xc3   : > { %v1282_v16 = vpop.permute.xlu1 %1281 }
  0xc4   : > { %v1280_v10 = vpop.permute.xlu0 %1279  ;;  %v1400_v40 = vsel %vm269_vm2, %v1368_v61, %v1282_v16  ;;  %v2355_v58 = vsel %vm670_vm4, %v8125_v62, %v2354_v37 }
  0xc5   : > { %v1399_v29 = vsel %vm269_vm2, %v1367_v21, %v1280_v10  ;;  %2256 = vrot.lane.b32.xlu1 %v2179_v23, %s7846_s26  ;;  %v513_v10 = vsel %vm493_vm5, %v8105_v52, %v512_v31  ;;  %v689_v23 = vrot.slane %v408_v26, 2 }
  0xc6   : > { %7502 = vmatprep.mubr.msk.f32.mxu0 %vm1423_vm7, %v1399_v29  ;;  %2254 = vrot.lane.b32.xlu0 %v8140_v4, %s7846_s26  ;;  %v8570_v29 = vld [vmem:[#allocation2 + $0x68] sm:$0xff] }
  0xc7   : > { %7503 = vmatmul.mubr.msk.f32.gmra.mxu0 %vm1423_vm7, %v1400_v40  ;;  %v1110_v22 = vpop.permute.xlu1 %1109 }
  0xc8   : > { %v1108_v24 = vpop.permute.xlu0 %1107  ;;  %v1370_v49 = vsel %vm223_vm0, %v8215_v45, %v1110_v22 }
  0xc9   : > { %582 = vrot.lane.b32.xlu1 %v8094_v46, %s7846_s26  ;;  %v1369_v51 = vsel %vm223_vm0, %v8217_v48, %v1108_v24  ;;  %v2082_v46 = vld [vmem:[#allocation2 + $0x70] sm:$0x3] }
  0xca   : > { %2430 = vrot.lane.b32.xlu0 %v8165_v14, %s7845_s25  ;;  %v2183_v39 = vrot.slane %v2082_v46, 1 }
  0xcb   : > { %v1286_v47 = vpop.permute.xlu1 %1285 }
  0xcc   : > { %v1284_v9 = vpop.permute.xlu0 %1283  ;;  %v1402_v13 = vsel %vm269_vm2, %v1370_v49, %v1286_v47  ;;  %v2184_v63 = vsel %vm493_vm5, %v8159_v12, %v2183_v39 }
  0xcd   : > { %v1401_v6 = vsel %vm269_vm2, %v1369_v51, %v1284_v9  ;;  %584 = vrot.lane.b32.xlu1 %v508_v57, %s7846_s26  ;;  %v692_v57 = vrot.slane %v8570_v29, 2 }
  0xce   : > { %7505 = vmatprep.mubr.msk.f32.mxu0 %vm1423_vm7, %v1401_v6  ;;  %2432 = vrot.lane.b32.xlu0 %v2355_v58, %s7845_s25 }
  0xcf   : > { %7506 = vmatmul.mubr.msk.f32.gmra.mxu0 %vm1423_vm7, %v1402_v13  ;;  %v1114_v45 = vpop.permute.xlu1 %1113 }
  0xd0   : > { %v1112_v48 = vpop.permute.xlu0 %1111  ;;  %v1372_v36 = vsel %vm223_vm0, %v8245_v2, %v1114_v45 }
  0xd1   : > { %761 = vrot.lane.b32.xlu1 %v685_v32, %s7845_s25  ;;  %v1371_v33 = vsel %vm223_vm0, %v8247_v5, %v1112_v48  ;;  %v2088_v32 = vld [vmem:[#allocation2 + $0xa0] sm:$0x3] }
  0xd2   : > { %759 = vrot.lane.b32.xlu0 %v8111_v54, %s7845_s25  ;;  %v2359_v54 = vrot.slane %v2082_v46, 2 }
  0xd3   : > { %v1290_v25 = vpop.permute.xlu1 %1289 }
  0xd4   : > { %v1288_v38 = vpop.permute.xlu0 %1287  ;;  %v1404_v42 = vsel %vm269_vm2, %v1372_v36, %v1290_v25  ;;  %v2360_v12 = vsel %vm670_vm4, %v8172_v17, %v2359_v54 }
  0xd5   : > { %v1403_v44 = vsel %vm269_vm2, %v1371_v33, %v1288_v38  ;;  %2260 = vrot.lane.b32.xlu1 %v2184_v63, %s7846_s26  ;;  %v8613_v38 = vld [vmem:[#allocation2 + $0x78] sm:$0xff]  ;;  %v8615_v63 = vld [vmem:[#allocation2 + $0x80] sm:$0xff] }
  0xd6   : > { %7508 = vmatprep.mubr.msk.f32.mxu0 %vm1423_vm7, %v1403_v44  ;;  %2258 = vrot.lane.b32.xlu0 %v8180_v19, %s7846_s26 }
  0xd7   : > { %7509 = vmatmul.mubr.msk.f32.gmra.mxu0 %vm1423_vm7, %v1404_v42  ;;  %v1118_v2 = vpop.permute.xlu1 %1117 }
  0xd8   : > { %v1116_v5 = vpop.permute.xlu0 %1115  ;;  %v1374_v19 = vsel %vm223_vm0, %v8267_v28, %v1118_v2  ;;  %v519_v2 = vrot.slane %v8613_v38, 1 }
  0xd9   : > { %586 = vrot.lane.b32.xlu1 %v8140_v4, %s7846_s26  ;;  %v1373_v61 = vsel %vm223_vm0, %v8269_v34, %v1116_v5  ;;  %v2085_v4 = vld [vmem:[#allocation2 + $0x88] sm:$0x3]  ;;  %v690_v34 = vsel %vm670_vm4, %v8125_v62, %v689_v23  ;;  %v515_v62 = vrot.slane %v8570_v29, 1  ;;  %v520_v5 = vrot.slane %v8615_v63, 1 }
  0xda   : > { %2434 = vrot.lane.b32.xlu0 %v8199_v30, %s7845_s25  ;;  %v2188_v52 = vrot.slane %v2085_v4, 1  ;;  %v697_v23 = vrot.slane %v8615_v63, 2 }
  0xdb   : > { %v1294_v21 = vpop.permute.xlu1 %1293 }
  0xdc   : > { %v1292_v16 = vpop.permute.xlu0 %1291  ;;  %v1406_v30 = vsel %vm269_vm2, %v1374_v19, %v1294_v21  ;;  %v2189_v0 = vsel %vm493_vm5, %v8191_v27, %v2188_v52  ;;  %v11539_v27 = vrot.slane %v8150_v11, 1  ;;  %v414_v19 = vld [vmem:[#allocation2 + $0x88] sm:$0x3] }
  0xdd   : > { %v1405_v40 = vsel %vm269_vm2, %v1373_v61, %v1292_v16  ;;  %588 = vrot.lane.b32.xlu1 %v513_v10, %s7846_s26  ;;  %v521_v61 = vsel %vm493_vm5, %v519_v2, %v520_v5  ;;  %v522_v21 = vrot.slane %v414_v19, 1  ;;  %v11541_v16 = vld [vmem:[#allocation4_spill] sm:$0xff] }
  0xde   : > { %7511 = vmatprep.mubr.msk.f32.mxu0 %vm1423_vm7, %v1405_v40  ;;  %2436 = vrot.lane.b32.xlu0 %v2360_v12, %s7845_s25  ;;  %v516_v47 = vsel %vm493_vm5, %v11539_v27, %v515_v62  ;;  %v8663_v27 = vld [vmem:[#allocation2 + $0x90] sm:$0xff] }
  0xdf   : > { %7512 = vmatmul.mubr.msk.f32.gmra.mxu0 %vm1423_vm7, %v1406_v30  ;;  %v1122_v17 = vpop.permute.xlu1 %1121  ;;  %v11542_v30 = vld [vmem:[#allocation5_spill] sm:$0xff]  ;;  %v523_v52 = vsel %vm493_vm5, %v520_v5, %v522_v21  ;;  %v8709_v21 = vld [vmem:[#allocation2 + $0xc0] sm:$0xff] }
  0xe0   : > { %v1120_v28 = vpop.permute.xlu0 %1119  ;;  %v1376_v1 = vsel %vm223_vm0, %v8283_v3, %v1122_v17  ;;  %v2364_v3 = vrot.slane %v2085_v4, 2  ;;  %v11543_v4 = vld [vmem:[#allocation6_spill] sm:$0xff]  ;;  %v11546_v5 = vld [vmem:[#allocation9_spill] sm:$0xff] }
  0xe1   : > { %765 = vrot.lane.b32.xlu1 %v690_v34, %s7845_s25  ;;  %v1375_v37 = vsel %vm223_vm0, %v8285_v7, %v1120_v28 }
  0xe2   : > { %763 = vrot.lane.b32.xlu0 %v8165_v14, %s7845_s25  ;;  %v411_v14 = vld [vmem:[#allocation2 + $0x70] sm:$0x3] }
  0xe3   : > { %v1298_v22 = vpop.permute.xlu1 %1297  ;;  %v517_v9 = vrot.slane %v411_v14, 1  ;;  %v694_v48 = vrot.slane %v411_v14, 2 }
  0xe4   : > { %v1296_v24 = vpop.permute.xlu0 %1295  ;;  %v1408_v58 = vsel %vm269_vm2, %v1376_v1, %v1298_v22  ;;  %v8647_v1 = vld [vmem:[#allocation2 + $0xa8] sm:$0xff]  ;;  %v2091_v22 = vld [vmem:[#allocation2 + $0xb8] sm:$0x3] }
  0xe5   : > { %v1407_v49 = vsel %vm269_vm2, %v1375_v37, %v1296_v24  ;;  %2264 = vrot.lane.b32.xlu1 %v2189_v0, %s7846_s26  ;;  %v518_v45 = vsel %vm493_vm5, %v515_v62, %v517_v9  ;;  %v695_v25 = vsel %vm670_vm4, %v692_v57, %v694_v48  ;;  %v8649_v37 = vld [vmem:[#allocation2 + $0xb0] sm:$0xff]  ;;  %v2198_v14 = vrot.slane %v2091_v22, 1 }
  0xe6   : > { %7514 = vmatprep.mubr.msk.f32.mxu0 %vm1423_vm7, %v1407_v49  ;;  %2262 = vrot.lane.b32.xlu0 %v8212_v41, %s7846_s26  ;;  %v2365_v41 = vsel %vm670_vm4, %v8206_v35, %v2364_v3  ;;  %v11540_v35 = vrot.slane %v8150_v11, 2  ;;  %v8660_v49 = vrot.slane %v8649_v37, 1 }
  0xe7   : > { %7515 = vmatmul.mubr.msk.f32.gmra.mxu0 %vm1423_vm7, %v1408_v58  ;;  %v1126_v7 = vpop.permute.xlu1 %1125  ;;  %v2195_v58 = vrot.slane %v8647_v1, 1 }
  0xe8   : > { %v1124_v51 = vpop.permute.xlu0 %1123  ;;  %v1378_v59 = vsel %vm223_vm0, %v8299_v43, %v1126_v7  ;;  %v693_v43 = vsel %vm670_vm4, %v11540_v35, %v692_v57  ;;  %v2371_v57 = vrot.slane %v8647_v1, 2 }
  0xe9   : > { %590 = vrot.lane.b32.xlu1 %v516_v47, %s7846_s26  ;;  %v1377_v13 = vsel %vm223_vm0, %v8301_v53, %v1124_v51  ;;  %v2193_v53 = vrot.slane %v2088_v32, 1  ;;  %v8665_v47 = vld [vmem:[#allocation2 + $0x98] sm:$0xff]  ;;  %v8671_v9 = vsel %vm493_vm5, %v2195_v58, %v8660_v49  ;;  %v11549_v58 = vld [vmem:[#allocation12_spill] sm:$0xff] }
  0xea   : > { %2438 = vrot.lane.b32.xlu0 %v8229_v55, %s7845_s25  ;;  %v702_v2 = vrot.slane %v8665_v47, 2 }
  0xeb   : > { %v1302_v6 = vpop.permute.xlu1 %1301  ;;  %v2194_v42 = vsel %vm493_vm5, %v8223_v50, %v2193_v53  ;;  %v2369_v50 = vrot.slane %v2088_v32, 2  ;;  %v417_v53 = vld [vmem:[#allocation2 + $0xa0] sm:$0x3] }
  0xec   : > { %v1300_v46 = vpop.permute.xlu0 %1299  ;;  %v1410_v55 = vsel %vm269_vm2, %v1378_v59, %v1302_v6  ;;  %v8677_v59 = vrot.slane %v8649_v37, 2 }
  0xed   : > { %v1409_v39 = vsel %vm269_vm2, %v1377_v13, %v1300_v46  ;;  %592 = vrot.lane.b32.xlu1 %v518_v45, %s7846_s26  ;;  %v2370_v10 = vsel %vm670_vm4, %v11541_v16, %v2369_v50  ;;  %v11544_v13 = vld [vmem:[#allocation7_spill] sm:$0xff]  ;;  %v11545_v46 = vld [vmem:[#allocation8_spill] sm:$0xff]  ;;  %v8711_v16 = vld [vmem:[#allocation2 + $0xc8] sm:$0xff] }
  0xee   : > { %7517 = vmatprep.mubr.msk.f32.mxu0 %vm1423_vm7, %v1409_v39  ;;  %2440 = vrot.lane.b32.xlu0 %v2365_v41, %s7845_s25  ;;  %v2199_v41 = vsel %vm493_vm5, %v8660_v49, %v2198_v14  ;;  %v525_v39 = vrot.slane %v8665_v47, 1 }
  0xef   : > { %7518 = vmatmul.mubr.msk.f32.gmra.mxu0 %vm1423_vm7, %v1410_v55  ;;  %v1130_v36 = vpop.permute.xlu1 %1129  ;;  %v524_v55 = vrot.slane %v8663_v27, 1 }
  0xf0   : > { %v1128_v33 = vpop.permute.xlu0 %1127  ;;  %v1380_v11 = vsel %vm223_vm0, %v8315_v18, %v1130_v36  ;;  %v8694_v36 = vsel %vm670_vm4, %v2371_v57, %v8677_v59 }
  0xf1   : > { %769 = vrot.lane.b32.xlu1 %v695_v25, %s7845_s25  ;;  %v1379_v44 = vsel %vm223_vm0, %v8317_v20, %v1128_v33  ;;  %v2374_v33 = vrot.slane %v2091_v22, 2  ;;  %v2376_v22 = vrot.slane %v8709_v21, 2 }
  0xf2   : > { %767 = vrot.lane.b32.xlu0 %v693_v43, %s7845_s25 }
  0xf3   : > { %v1306_v26 = vpop.permute.xlu1 %1305 }
  0xf4   : > { %v1304_v54 = vpop.permute.xlu0 %1303  ;;  %v1412_v31 = vsel %vm269_vm2, %v1380_v11, %v1306_v26  ;;  %v526_v11 = vsel %vm493_vm5, %v524_v55, %v525_v39  ;;  %v2375_v26 = vsel %vm670_vm4, %v8677_v59, %v2374_v33 }
  0xf5   : > { %v1411_v12 = vsel %vm269_vm2, %v1379_v44, %v1304_v54  ;;  %2268 = vrot.lane.b32.xlu1 %v2194_v42, %s7846_s26  ;;  %v527_v44 = vrot.slane %v417_v53, 1  ;;  %v701_v54 = vrot.slane %v8663_v27, 2 }
  0xf6   : > { %7520 = vmatprep.mubr.msk.f32.mxu0 %vm1423_vm7, %v1411_v12  ;;  %2266 = vrot.lane.b32.xlu0 %v8242_v60, %s7846_s26  ;;  %v696_v60 = vrot.slane %v8613_v38, 2  ;;  %v11547_v12 = vld [vmem:[#allocation10_spill] sm:$0xff] }
  0xf7   : > { %7521 = vmatmul.mubr.msk.f32.gmra.mxu0 %vm1423_vm7, %v1412_v31  ;;  %v1134_v18 = vpop.permute.xlu1 %1133 }
  0xf8   : > { %v1132_v20 = vpop.permute.xlu0 %1131  ;;  %v1382_v40 = vsel %vm223_vm0, %v11542_v30, %v1134_v18  ;;  %v698_v62 = vsel %vm670_vm4, %v696_v60, %v697_v23  ;;  %v703_v30 = vsel %vm670_vm4, %v701_v54, %v702_v2 }
  0xf9   : > { %594 = vrot.lane.b32.xlu1 %v521_v61, %s7846_s26  ;;  %v1381_v17 = vsel %vm223_vm0, %v11543_v4, %v1132_v20  ;;  %v528_v20 = vsel %vm493_vm5, %v525_v39, %v527_v44  ;;  %v704_v61 = vrot.slane %v417_v53, 2  ;;  %v8722_v4 = vrot.slane %v8711_v16, 1  ;;  %v2097_v44 = vld [vmem:[#allocation2 + $0xe8] sm:$0x3] }
  0xfa   : > { %2442 = vrot.lane.b32.xlu0 %v8257_v8, %s7845_s25  ;;  %v699_v8 = vrot.slane %v414_v19, 2 }
  0xfb   : > { %v1310_v28 = vpop.permute.xlu1 %1309 }
  0xfc   : > { %v1308_v34 = vpop.permute.xlu0 %1307  ;;  %v1414_v24 = vsel %vm269_vm2, %v1382_v40, %v1310_v28  ;;  %v700_v51 = vsel %vm670_vm4, %v697_v23, %v699_v8  ;;  %v2094_v23 = vld [vmem:[#allocation2 + $0xd0] sm:$0x3]  ;;  %v2200_v40 = vrot.slane %v8709_v21, 1 }
  0xfd   : > { %v1413_v0 = vsel %vm269_vm2, %v1381_v17, %v1308_v34  ;;  %596 = vrot.lane.b32.xlu1 %v523_v52, %s7846_s26  ;;  %v705_v34 = vsel %vm670_vm4, %v702_v2, %v704_v61  ;;  %v2203_v52 = vrot.slane %v2094_v23, 1 }
  0xfe   : > { %7523 = vmatprep.mubr.msk.f32.mxu0 %vm1423_vm7, %v1413_v0  ;;  %2444 = vrot.lane.b32.xlu0 %v2370_v10, %s7845_s25  ;;  %v8729_v8 = vsel %vm493_vm5, %v2200_v40, %v8722_v4  ;;  %v11548_v0 = vld [vmem:[#allocation11_spill] sm:$0xff]  ;;  %v423_v40 = vld [vmem:[#allocation2 + $0xd0] sm:$0x3] }
  0xff   : > { %7524 = vmatmul.mubr.msk.f32.gmra.mxu0 %vm1423_vm7, %v1414_v24  ;;  %v1138_v3 = vpop.permute.xlu1 %1137  ;;  %v8733_v24 = vrot.slane %v8711_v16, 2 }
 0x100   : > { %v1136_v7 = vpop.permute.xlu0 %1135  ;;  %v1384_v6 = vsel %vm223_vm0, %v11544_v13, %v1138_v3  ;;  %v420_v13 = vld [vmem:[#allocation2 + $0xb8] sm:$0x3] }
 0x101   : > { %773 = vrot.lane.b32.xlu1 %v700_v51, %s7845_s25  ;;  %v1383_v45 = vsel %vm223_vm0, %v11545_v46, %v1136_v7  ;;  %v2204_v51 = vsel %vm493_vm5, %v8722_v4, %v2203_v52  ;;  %v2379_v46 = vrot.slane %v2094_v23, 2  ;;  %v709_v33 = vrot.slane %v420_v13, 2 }
 0x102   : > { %771 = vrot.lane.b32.xlu0 %v698_v62, %s7845_s25  ;;  %v537_v52 = vrot.slane %v423_v40, 1 }
 0x103   : > { %v1314_v48 = vpop.permute.xlu1 %1313  ;;  %v2380_v55 = vsel %vm670_vm4, %v8733_v24, %v2379_v46 }
 0x104   : > { %v1312_v32 = vpop.permute.xlu0 %1311  ;;  %v1416_v35 = vsel %vm269_vm2, %v1384_v6, %v1314_v48  ;;  %v8750_v6 = vsel %vm670_vm4, %v2376_v22, %v8733_v24 }
 0x105   : > { %v1415_v43 = vsel %vm269_vm2, %v1383_v45, %v1312_v32  ;;  %2272 = vrot.lane.b32.xlu1 %v2199_v41, %s7846_s26  ;;  %v532_v32 = vrot.slane %v420_v13, 1 }
 0x106   : > { %7526 = vmatprep.mubr.msk.f32.mxu0 %vm1423_vm7, %v1415_v43  ;;  %2270 = vrot.lane.b32.xlu0 %v8671_v9, %s7846_s26 }
 0x107   : > { %7527 = vmatmul.mubr.msk.f32.gmra.mxu0 %vm1423_vm7, %v1416_v35  ;;  %v1142_v25 = vpop.permute.xlu1 %1141  ;;  %v533_v53 = vsel %vm493_vm5, %v8660_v49, %v532_v32  ;;  %v11550_v49 = vld [vmem:[#allocation13_spill] sm:$0xff] }
 0x108   : > { %v1140_v42 = vpop.permute.xlu0 %1139  ;;  %v1386_v31 = vsel %vm223_vm0, %v11546_v5, %v1142_v25  ;;  %v8762_v25 = vld [vmem:[#allocation2 + $0xd8] sm:$0xff]  ;;  %v710_v5 = vsel %vm670_vm4, %v8677_v59, %v709_v33 }
 0x109   : > { %598 = vrot.lane.b32.xlu1 %v526_v11, %s7846_s26  ;;  %v1385_v19 = vsel %vm223_vm0, %v11547_v12, %v1140_v42  ;;  %v8764_v42 = vld [vmem:[#allocation2 + $0xe0] sm:$0xff] }
 0x10a   : > { %2446 = vrot.lane.b32.xlu0 %v8694_v36, %s7845_s25 }
 0x10b   : > { %v1318_v50 = vpop.permute.xlu1 %1317 }
 0x10c   : > { %v1316_v18 = vpop.permute.xlu0 %1315  ;;  %v1418_v10 = vsel %vm269_vm2, %v1386_v31, %v1318_v50  ;;  %v2208_v31 = vrot.slane %v2097_v44, 1  ;;  %v2381_v50 = vrot.slane %v8762_v25, 2 }
 0x10d   : > { %v1417_v60 = vsel %vm269_vm2, %v1385_v19, %v1316_v18  ;;  %600 = vrot.lane.b32.xlu1 %v528_v20, %s7846_s26  ;;  %v8789_v18 = vrot.slane %v8764_v42, 2  ;;  %v11551_v20 = vld [vmem:[#allocation14_spill] sm:$0xff] }
 0x10e   : > { %7529 = vmatprep.mubr.msk.f32.mxu0 %vm1423_vm7, %v1417_v60  ;;  %2448 = vrot.lane.b32.xlu0 %v2375_v26, %s7845_s25 }
 0x10f   : > { %7530 = vmatmul.mubr.msk.f32.gmra.mxu0 %vm1423_vm7, %v1418_v10  ;;  %v1146_v17 = vpop.permute.xlu1 %1145 }
 0x110   : > { %v1144_v28 = vpop.permute.xlu0 %1143  ;;  %v1388_v62 = vsel %vm223_vm0, %v11548_v0, %v1146_v17  ;;  %v2384_v17 = vrot.slane %v2097_v44, 2  ;;  %v8814_v0 = vld [vmem:[#allocation2 + $0x30] sm:$0xff] }
 0x111   : > { %777 = vrot.lane.b32.xlu1 %v705_v34, %s7845_s25  ;;  %v1387_v14 = vsel %vm223_vm0, %v11549_v58, %v1144_v28 }
 0x112   : > { %775 = vrot.lane.b32.xlu0 %v703_v30, %s7845_s25  ;;  %v2385_v22 = vsel %vm670_vm4, %v8789_v18, %v2384_v17  ;;  %v8880_v17 = vld [vmem:[#allocation2 + $0x110] sm:$0xff] }
 0x113   : > { %v1322_v3 = vpop.permute.xlu1 %1321 }
 0x114   : > { %v1320_v7 = vpop.permute.xlu0 %1319  ;;  %v1420_v41 = vsel %vm269_vm2, %v1388_v62, %v1322_v3  ;;  %v538_v3 = vsel %vm493_vm5, %v8722_v4, %v537_v52  ;;  %v8832_v4 = vld [vmem:[#allocation2 + $0x38] sm:$0xff] }
 0x115   : > { %v1419_v57 = vsel %vm269_vm2, %v1387_v14, %v1320_v7  ;;  %2276 = vrot.lane.b32.xlu1 %v2204_v51, %s7846_s26  ;;  %v714_v7 = vrot.slane %v423_v40, 2  ;;  %v8820_v51 = vld [vmem:[#allocation2 + $0xf0] sm:$0xff]  ;;  %v8878_v40 = vld [vmem:[#allocation2 + $0x108] sm:$0xff] }
 0x116   : > { %7532 = vmatprep.mubr.msk.f32.mxu0 %vm1423_vm7, %v1419_v57  ;;  %2274 = vrot.lane.b32.xlu0 %v8729_v8, %s7846_s26  ;;  %v2100_v57 = vld [vmem:[#allocation2 + $0x100] sm:$0x3]  ;;  %v2210_v13 = vrot.slane %v8820_v51, 1  ;;  %v2215_v52 = vrot.slane %v8878_v40, 1 }
 0x117   : > { %7533 = vmatmul.mubr.msk.f32.gmra.mxu0 %vm1423_vm7, %v1420_v41  ;;  %v1150_v45 = vpop.permute.xlu1 %1149  ;;  %v8822_v41 = vld [vmem:[#allocation2 + $0xf8] sm:$0xff]  ;;  %v715_v32 = vsel %vm670_vm4, %v8733_v24, %v714_v7 }
 0x118   : > { %v1148_v48 = vpop.permute.xlu0 %1147  ;;  %v1390_v26 = vsel %vm223_vm0, %v11550_v49, %v1150_v45  ;;  %v8830_v46 = vrot.slane %v8822_v41, 1  ;;  %v8849_v33 = vrot.slane %v8822_v41, 2  ;;  %v7825_v24 = vld [vmem:[#allocation2 + $0x18] sm:$0xff]  ;;  %v7826_v49 = vld [vmem:[#allocation2 + $0x20] sm:$0xff] }
 0x119   : > { %602 = vrot.lane.b32.xlu1 %v8671_v9, %s7846_s26  ;;  %v1389_v39 = vsel %vm223_vm0, %v8397_v56, %v1148_v48  ;;  %v2205_v56 = vrot.slane %v8762_v25, 1  ;;  %v8772_v9 = vrot.slane %v8764_v42, 1 }
 0x11a   : > { %2450 = vrot.lane.b32.xlu0 %v8750_v6, %s7845_s25 }
 0x11b   : > { %v575_v35 = vpop.permute.xlu1 %574  ;;  %v8785_v19 = vsel %vm493_vm5, %v2205_v56, %v8772_v9 }
 0x11c   : > { %v1324_v43 = vpop.permute.xlu0 %1323  ;;  %v847_v59 = vsel %vm223_vm0, %v8405_v15, %v575_v35  ;;  %v8806_v15 = vsel %vm670_vm4, %v2381_v50, %v8789_v18 }
 0x11d   : > { %v1421_v11 = vsel %vm269_vm2, %v1389_v39, %v1324_v43  ;;  %604 = vrot.lane.b32.xlu1 %v533_v53, %s7846_s26  ;;  %v8845_v43 = vsel %vm493_vm5, %v2210_v13, %v8830_v46  ;;  %v2386_v53 = vrot.slane %v8820_v51, 2  ;;  %v2391_v13 = vrot.slane %v8878_v40, 2 }
 0x11e   : > { %7535 = vmatprep.mubr.msk.f32.mxu0 %vm1423_vm7, %v1421_v11  ;;  %2452 = vrot.lane.b32.xlu0 %v2380_v55, %s7845_s25  ;;  %v2213_v55 = vrot.slane %v2100_v57, 1 }
 0x11f   : > { %v577_v54 = vpop.permute.xlu1 %576 }
 0x120   : > { %v1326_v2 = vpop.permute.xlu0 %1325  ;;  %v848_v61 = vsel %vm223_vm0, %v11551_v20, %v577_v54  ;;  %v2214_v56 = vsel %vm493_vm5, %v8830_v46, %v2213_v55 }
 0x121   : > { %v1422_v12 = vsel %vm269_vm2, %v1390_v26, %v1326_v2  ;;  %781 = vrot.lane.b32.xlu1 %v710_v5, %s7845_s25  ;;  %v426_v2 = vld [vmem:[#allocation2 + $0xe8] sm:$0x3] }
 0x122   : > { %7536 = vmatmul.mubr.msk.f32.gmra.mxu0 %vm1423_vm7, %v1422_v12  ;;  %779 = vrot.lane.b32.xlu0 %v8694_v36, %s7845_s25  ;;  %v2209_v36 = vsel %vm493_vm5, %v8772_v9, %v2208_v31  ;;  %v8864_v31 = vsel %vm670_vm4, %v2386_v53, %v8849_v33  ;;  %v2389_v12 = vrot.slane %v2100_v57, 2 }
 0x123   : > { %v754_v10 = vpop.permute.xlu1 %753 }
 0x124   : > { %v752_v60 = vpop.permute.xlu0 %751  ;;  %v880_v23 = vsel %vm269_vm2, %v848_v61, %v754_v10  ;;  %v2390_v61 = vsel %vm670_vm4, %v8849_v33, %v2389_v12  ;;  %v8872_v10 = vld [vmem:[#allocation2 + $0x48] sm:$0xff] }
 0x125   : > { %v879_v30 = vsel %vm269_vm2, %v847_v59, %v752_v60  ;;  %2280 = vrot.lane.b32.xlu1 %v2209_v36, %s7846_s26  ;;  %v542_v59 = vrot.slane %v426_v2, 1  ;;  %v8940_v12 = vld [vmem:[#allocation2 + $0x128] sm:$0xff] }
 0x126   : > { %7542 = vmatprep.mubr.msk.f32.mxu1 %vm1423_vm7, %v879_v30  ;;  %2278 = vrot.lane.b32.xlu0 %v8785_v19, %s7846_s26  ;;  %v719_v30 = vrot.slane %v426_v2, 2 }
 0x127   : > { %7543 = vmatmul.mubr.msk.f32.vlgmr.msra.gmra.mxu1 %vm1423_vm7, %v880_v23  ;;  %v2253_v28 = vpop.permute.xlu1 %2252  ;;  %v543_v23 = vsel %vm493_vm5, %v8772_v9, %v542_v59  ;;  %v8890_v9 = vld [vmem:[#allocation2 + $0x50] sm:$0xff] }
 0x128   : > { %v2251_v34 = vpop.permute.xlu0 %2250  ;;  %v2523_v45 = vsel %vm223_vm0, %v8832_v4, %v2253_v28  ;;  %v2106_v59 = vld [vmem:[#allocation2 + $0x130] sm:$0x3] }
 0x129   : > { %606 = vrot.lane.b32.xlu1 %v8729_v8, %s7846_s26  ;;  %v2522_v62 = vsel %vm223_vm0, %v8814_v0, %v2251_v34  ;;  %v2103_v34 = vld [vmem:[#allocation2 + $0x118] sm:$0x3] }
 0x12a   : > { %2454 = vrot.lane.b32.xlu0 %v8806_v15, %s7845_s25 }
 0x12b   : > { %v579_v14 = vpop.permute.xlu1 %578 }
 0x12c   : > { %v2427_v58 = vpop.permute.xlu0 %2426  ;;  %v849_v11 = vsel %vm223_vm0, %v7825_v24, %v579_v14  ;;  %v720_v14 = vsel %vm670_vm4, %v8789_v18, %v719_v30  ;;  %v2223_v30 = vrot.slane %v2106_v59, 1 }
 0x12d   : > { %v2554_v8 = vsel %vm269_vm2, %v2522_v62, %v2427_v58  ;;  %608 = vrot.lane.b32.xlu1 %v538_v3, %s7846_s26  ;;  %v2218_v3 = vrot.slane %v2103_v34, 1 }
 0x12e   : > { %7594 = vmatprep.mubr.msk.f32.mxu0 %vm1423_vm7, %v2554_v8  ;;  %2456 = vrot.lane.b32.xlu0 %v2385_v22, %s7845_s25  ;;  %v8888_v22 = vrot.slane %v8880_v17, 1 }
 0x12f   : > { %v581_v35 = vpop.permute.xlu1 %580 }
 0x130   : > { %v2429_v48 = vpop.permute.xlu0 %2428  ;;  %v8903_v57 = vsel %vm493_vm5, %v2215_v52, %v8888_v22 }
 0x131   : > { %v2555_v39 = vsel %vm269_vm2, %v2523_v45, %v2429_v48  ;;  %785 = vrot.lane.b32.xlu1 %v715_v32, %s7845_s25  ;;  %v8907_v45 = vrot.slane %v8880_v17, 2 }
 0x132   : > { %7595 = vmatmul.mubr.msk.f32.vlgmr.msra.gmra.mxu0 %vm1423_vm7, %v2555_v39  ;;  %783 = vrot.lane.b32.xlu0 %v8750_v6, %s7845_s25  ;;  %v850_v6 = vsel %vm223_vm0, %v7826_v49, %v581_v35  ;;  %v429_v35 = vld [vmem:[#allocation2 + $0x100] sm:$0x3] }
 0x133   : > { %v758_v54 = vpop.permute.xlu1 %757  ;;  %v8932_v49 = vld [vmem:[#allocation2 + $0x60] sm:$0xff]  ;;  %v724_v2 = vrot.slane %v429_v35, 2 }
 0x134   : > { %v756_v44 = vpop.permute.xlu0 %755  ;;  %v882_v5 = vsel %vm269_vm2, %v850_v6, %v758_v54 }
 0x135   : > { %v881_v26 = vsel %vm269_vm2, %v849_v11, %v756_v44  ;;  %2284 = vrot.lane.b32.xlu1 %v2214_v56, %s7846_s26  ;;  %v547_v11 = vrot.slane %v429_v35, 1 }
 0x136   : > { %2282 = vrot.lane.b32.xlu0 %v8845_v43, %s7846_s26  ;;  %7545 = vmatprep.mubr.msk.f32.mxu1 %vm1423_vm7, %v881_v26 }
 0x137   : > { %7546 = vmatmul.mubr.msk.f32.gmra.mxu1 %vm1423_vm7, %v882_v5  ;;  %v2257_v20 = vpop.permute.xlu1 %2256  ;;  %v548_v54 = vsel %vm493_vm5, %v8830_v46, %v547_v11  ;;  %v8938_v5 = vld [vmem:[#allocation2 + $0x120] sm:$0xff]  ;;  %v7830_v46 = vld [vmem:[#allocation2 + $0x68] sm:$0xff] }
 0x138   : > { %v2255_v50 = vpop.permute.xlu0 %2254  ;;  %v2525_v62 = vsel %vm223_vm0, %v8890_v9, %v2257_v20  ;;  %v2220_v20 = vrot.slane %v8938_v5, 1  ;;  %v2396_v52 = vrot.slane %v8938_v5, 2  ;;  %v8994_v11 = vld [vmem:[#allocation2 + $0x140] sm:$0xff] }
 0x139   : > { %610 = vrot.lane.b32.xlu1 %v8785_v19, %s7846_s26  ;;  %v2524_v60 = vsel %vm223_vm0, %v8872_v10, %v2255_v50 }
 0x13a   : > { %2458 = vrot.lane.b32.xlu0 %v8864_v31, %s7845_s25 }
 0x13b   : > { %v583_v19 = vpop.permute.xlu1 %582 }
 0x13c   : > { %v2431_v36 = vpop.permute.xlu0 %2430  ;;  %v851_v18 = vsel %vm223_vm0, %v8814_v0, %v583_v19  ;;  %v8924_v0 = vsel %vm670_vm4, %v2391_v13, %v8907_v45 }
 0x13d   : > { %v2556_v28 = vsel %vm269_vm2, %v2524_v60, %v2431_v36  ;;  %612 = vrot.lane.b32.xlu1 %v543_v23, %s7846_s26  ;;  %v725_v23 = vsel %vm670_vm4, %v8849_v33, %v724_v2 }
 0x13e   : > { %2460 = vrot.lane.b32.xlu0 %v2390_v61, %s7845_s25  ;;  %7597 = vmatprep.mubr.msk.f32.mxu0 %vm1423_vm7, %v2556_v28  ;;  %v8948_v61 = vrot.slane %v8940_v12, 1 }
 0x13f   : > { %v585_v8 = vpop.permute.xlu1 %584 }
 0x140   : > { %v2433_v58 = vpop.permute.xlu0 %2432  ;;  %v852_v32 = vsel %vm223_vm0, %v8832_v4, %v585_v8  ;;  %v2394_v4 = vrot.slane %v2103_v34, 2  ;;  %v8960_v34 = vsel %vm493_vm5, %v2220_v20, %v8948_v61  ;;  %v432_v8 = vld [vmem:[#allocation2 + $0x118] sm:$0x3] }
 0x141   : > { %v2557_v7 = vsel %vm269_vm2, %v2525_v62, %v2433_v58  ;;  %789 = vrot.lane.b32.xlu1 %v720_v14, %s7845_s25  ;;  %v8964_v62 = vrot.slane %v8940_v12, 2 }
 0x142   : > { %787 = vrot.lane.b32.xlu0 %v8806_v15, %s7845_s25  ;;  %7598 = vmatmul.mubr.msk.f32.gmra.mxu0 %vm1423_vm7, %v2557_v7  ;;  %v2219_v15 = vsel %vm493_vm5, %v8888_v22, %v2218_v3  ;;  %v2395_v56 = vsel %vm670_vm4, %v8907_v45, %v2394_v4  ;;  %v729_v4 = vrot.slane %v432_v8, 2 }
 0x143   : > { %v762_v39 = vpop.permute.xlu1 %761 }
 0x144   : > { %v760_v48 = vpop.permute.xlu0 %759  ;;  %v884_v53 = vsel %vm269_vm2, %v852_v32, %v762_v39 }
 0x145   : > { %v883_v55 = vsel %vm269_vm2, %v851_v18, %v760_v48  ;;  %2288 = vrot.lane.b32.xlu1 %v2219_v15, %s7846_s26  ;;  %v552_v48 = vrot.slane %v432_v8, 1 }
 0x146   : > { %2286 = vrot.lane.b32.xlu0 %v8903_v57, %s7846_s26  ;;  %7548 = vmatprep.mubr.msk.f32.mxu1 %vm1423_vm7, %v883_v55  ;;  %v7831_v55 = vld [vmem:[#allocation2 + $0x78] sm:$0xff] }
 0x147   : > { %7549 = vmatmul.mubr.msk.f32.gmra.mxu1 %vm1423_vm7, %v884_v53  ;;  %v2261_v44 = vpop.permute.xlu1 %2260  ;;  %v553_v53 = vsel %vm493_vm5, %v8888_v22, %v552_v48  ;;  %v7832_v22 = vld [vmem:[#allocation2 + $0x80] sm:$0xff]  ;;  %v9046_v48 = vld [vmem:[#allocation2 + $0x150] sm:$0xff] }
 0x148   : > { %v2259_v24 = vpop.permute.xlu0 %2258  ;;  %v2527_v60 = vsel %vm223_vm0, %v7830_v46, %v2261_v44 }
 0x149   : > { %614 = vrot.lane.b32.xlu1 %v8845_v43, %s7846_s26  ;;  %v2526_v6 = vsel %vm223_vm0, %v8932_v49, %v2259_v24  ;;  %v8992_v24 = vld [vmem:[#allocation2 + $0x138] sm:$0xff] }
 0x14a   : > { %2462 = vrot.lane.b32.xlu0 %v8924_v0, %s7845_s25 }
 0x14b   : > { %v587_v43 = vpop.permute.xlu1 %586 }
 0x14c   : > { %v2435_v26 = vpop.permute.xlu0 %2434  ;;  %v853_v33 = vsel %vm223_vm0, %v8872_v10, %v587_v43  ;;  %v8981_v10 = vsel %vm670_vm4, %v2396_v52, %v8964_v62  ;;  %v435_v52 = vld [vmem:[#allocation2 + $0x130] sm:$0x3] }
 0x14d   : > { %v2558_v50 = vsel %vm269_vm2, %v2526_v6, %v2435_v26  ;;  %616 = vrot.lane.b32.xlu1 %v548_v54, %s7846_s26  ;;  %v2109_v6 = vld [vmem:[#allocation2 + $0x148] sm:$0x3]  ;;  %v9002_v26 = vrot.slane %v8994_v11, 1 }
 0x14e   : > { %2464 = vrot.lane.b32.xlu0 %v2395_v56, %s7845_s25  ;;  %7600 = vmatprep.mubr.msk.f32.mxu0 %vm1423_vm7, %v2558_v50  ;;  %v730_v50 = vsel %vm670_vm4, %v8907_v45, %v729_v4  ;;  %v2228_v43 = vrot.slane %v2109_v6, 1 }
 0x14f   : > { %v589_v19 = vpop.permute.xlu1 %588 }
 0x150   : > { %v2437_v36 = vpop.permute.xlu0 %2436  ;;  %v854_v14 = vsel %vm223_vm0, %v8890_v9, %v589_v19  ;;  %v2399_v9 = vrot.slane %v2106_v59, 2 }
 0x151   : > { %v2559_v28 = vsel %vm269_vm2, %v2527_v60, %v2437_v36  ;;  %793 = vrot.lane.b32.xlu1 %v725_v23, %s7845_s25  ;;  %v2401_v60 = vrot.slane %v8992_v24, 2  ;;  %v9018_v36 = vrot.slane %v8994_v11, 2 }
 0x152   : > { %791 = vrot.lane.b32.xlu0 %v8864_v31, %s7845_s25  ;;  %7601 = vmatmul.mubr.msk.f32.gmra.mxu0 %vm1423_vm7, %v2559_v28  ;;  %v2224_v31 = vsel %vm493_vm5, %v8948_v61, %v2223_v30  ;;  %v2400_v32 = vsel %vm670_vm4, %v8964_v62, %v2399_v9 }
 0x153   : > { %v766_v7 = vpop.permute.xlu1 %765 }
 0x154   : > { %v764_v58 = vpop.permute.xlu0 %763  ;;  %v886_v13 = vsel %vm269_vm2, %v854_v14, %v766_v7  ;;  %v7833_v7 = vld [vmem:[#allocation2 + $0x90] sm:$0xff] }
 0x155   : > { %v885_v3 = vsel %vm269_vm2, %v853_v33, %v764_v58  ;;  %2292 = vrot.lane.b32.xlu1 %v2224_v31, %s7846_s26  ;;  %v557_v31 = vrot.slane %v435_v52, 1 }
 0x156   : > { %2290 = vrot.lane.b32.xlu0 %v8960_v34, %s7846_s26  ;;  %7551 = vmatprep.mubr.msk.f32.mxu1 %vm1423_vm7, %v885_v3 }
 0x157   : > { %7552 = vmatmul.mubr.msk.f32.gmra.mxu1 %vm1423_vm7, %v886_v13  ;;  %v2265_v15 = vpop.permute.xlu1 %2264  ;;  %v558_v9 = vsel %vm493_vm5, %v8948_v61, %v557_v31  ;;  %v9177_v31 = vld [vmem:[#allocation2 + $0x168] sm:$0xff] }
 0x158   : > { %v2263_v18 = vpop.permute.xlu0 %2262  ;;  %v2529_v54 = vsel %vm223_vm0, %v7832_v22, %v2265_v15  ;;  %v9048_v15 = vld [vmem:[#allocation2 + $0x158] sm:$0xff] }
 0x159   : > { %618 = vrot.lane.b32.xlu1 %v8903_v57, %s7846_s26  ;;  %v2528_v39 = vsel %vm223_vm0, %v7831_v55, %v2263_v18  ;;  %v2225_v57 = vrot.slane %v8992_v24, 1  ;;  %v734_v18 = vrot.slane %v435_v52, 2  ;;  %v9058_v61 = vrot.slane %v9048_v15, 1 }
 0x15a   : > { %2466 = vrot.lane.b32.xlu0 %v8981_v10, %s7845_s25 }
 0x15b   : > { %v591_v56 = vpop.permute.xlu1 %590  ;;  %v9014_v46 = vsel %vm493_vm5, %v2225_v57, %v9002_v26 }
 0x15c   : > { %v2439_v35 = vpop.permute.xlu0 %2438  ;;  %v855_v45 = vsel %vm223_vm0, %v8932_v49, %v591_v56  ;;  %v9035_v49 = vsel %vm670_vm4, %v2401_v60, %v9018_v36  ;;  %v9084_v60 = vld [vmem:[#allocation2 + $0x148] sm:$0x3] }
 0x15d   : > { %v2560_v44 = vsel %vm269_vm2, %v2528_v39, %v2439_v35  ;;  %620 = vrot.lane.b32.xlu1 %v553_v53, %s7846_s26  ;;  %v9051_v39 = vld [vmem:[#allocation2 + $0x160] sm:$0x3]  ;;  %v7834_v35 = vld [vmem:[#allocation2 + $0x98] sm:$0xff] }
 0x15e   : > { %2468 = vrot.lane.b32.xlu0 %v2400_v32, %s7845_s25  ;;  %7603 = vmatprep.mubr.msk.f32.mxu0 %vm1423_vm7, %v2560_v44  ;;  %v735_v44 = vsel %vm670_vm4, %v8964_v62, %v734_v18  ;;  %v2233_v56 = vrot.slane %v9051_v39, 1  ;;  %v9075_v62 = vrot.slane %v9048_v15, 2 }
 0x15f   : > { %v593_v20 = vpop.permute.xlu1 %592 }
 0x160   : > { %v2441_v2 = vpop.permute.xlu0 %2440  ;;  %v856_v30 = vsel %vm223_vm0, %v8570_v29, %v593_v20  ;;  %v2404_v29 = vrot.slane %v2109_v6, 2 }
 0x161   : > { %v2561_v59 = vsel %vm269_vm2, %v2529_v54, %v2441_v2  ;;  %797 = vrot.lane.b32.xlu1 %v730_v50, %s7845_s25  ;;  %v2406_v54 = vrot.slane %v9046_v48, 2 }
 0x162   : > { %795 = vrot.lane.b32.xlu0 %v8924_v0, %s7845_s25  ;;  %7604 = vmatmul.mubr.msk.f32.gmra.mxu0 %vm1423_vm7, %v2561_v59  ;;  %v2229_v0 = vsel %vm493_vm5, %v9002_v26, %v2228_v43  ;;  %v2405_v3 = vsel %vm670_vm4, %v9018_v36, %v2404_v29 }
 0x163   : > { %v770_v19 = vpop.permute.xlu1 %769 }
 0x164   : > { %v768_v23 = vpop.permute.xlu0 %767  ;;  %v888_v33 = vsel %vm269_vm2, %v856_v30, %v770_v19 }
 0x165   : > { %v887_v28 = vsel %vm269_vm2, %v855_v45, %v768_v23  ;;  %2296 = vrot.lane.b32.xlu1 %v2229_v0, %s7846_s26  ;;  %v562_v0 = vrot.slane %v9084_v60, 1 }
 0x166   : > { %2294 = vrot.lane.b32.xlu0 %v9014_v46, %s7846_s26  ;;  %7554 = vmatprep.mubr.msk.f32.mxu1 %vm1423_vm7, %v887_v28  ;;  %v11552_v28 = vmov 0.0  }
 0x167   : > { %7555 = vmatmul.mubr.msk.f32.gmra.mxu1 %vm1423_vm7, %v888_v33  ;;  %v2269_v14 = vpop.permute.xlu1 %2268  ;;  %280 = vst.msk [vmem:[#allocation3 + $0x18] sm:$0x1] %vm278_vm8, %v11552_v28  ;;  %279 = vst.msk [vmem:[#allocation3] sm:$0x1] %vm278_vm8, %v11552_v28  ;;  %v563_v29 = vsel %vm493_vm5, %v9002_v26, %v562_v0 }
 0x168   : > { %v2267_v58 = vpop.permute.xlu0 %2266  ;;  %v2531_v53 = vsel %vm223_vm0, %v7834_v35, %v2269_v14  ;;  %281 = vst.msk [vmem:[#allocation3 + $0x30] sm:$0x1] %vm278_vm8, %v11552_v28  ;;  %282 = vst.msk [vmem:[#allocation3 + $0x48] sm:$0x1] %vm278_vm8, %v11552_v28  ;;  %v9179_v14 = vld [vmem:[#allocation2 + $0x170] sm:$0xff]  ;;  %v2411_v35 = vrot.slane %v9177_v31, 2 }
 0x169   : > { %622 = vrot.lane.b32.xlu1 %v8960_v34, %s7846_s26  ;;  %v2530_v8 = vsel %vm223_vm0, %v7833_v7, %v2267_v58  ;;  %v2230_v34 = vrot.slane %v9046_v48, 1  ;;  %283 = vst.msk [vmem:[#allocation3 + $0x60] sm:$0x1] %vm278_vm8, %v11552_v28  ;;  %284 = vst.msk [vmem:[#allocation3 + $0x78] sm:$0x1] %vm278_vm8, %v11552_v28  ;;  %v739_v58 = vrot.slane %v9084_v60, 2 }
 0x16a   : > { %2470 = vrot.lane.b32.xlu0 %v9035_v49, %s7845_s25  ;;  %285 = vst.msk [vmem:[#allocation3 + $0x90] sm:$0x1] %vm278_vm8, %v11552_v28  ;;  %286 = vst.msk [vmem:[#allocation3 + $0xa8] sm:$0x1] %vm278_vm8, %v11552_v28  ;;  %v9187_v26 = vrot.slane %v9179_v14, 1 }
 0x16b   : > { %v595_v55 = vpop.permute.xlu1 %594  ;;  %v9071_v22 = vsel %vm493_vm5, %v2230_v34, %v9058_v61  ;;  %287 = vst.msk [vmem:[#allocation3 + $0xc0] sm:$0x1] %vm278_vm8, %v11552_v28  ;;  %288 = vst.msk [vmem:[#allocation3 + $0xd8] sm:$0x1] %vm278_vm8, %v11552_v28  ;;  %v740_v18 = vsel %vm670_vm4, %v9018_v36, %v739_v58 }
 0x16c   : > { %v2443_v13 = vpop.permute.xlu0 %2442  ;;  %v857_v2 = vsel %vm223_vm0, %v8613_v38, %v595_v55  ;;  %v9094_v38 = vsel %vm670_vm4, %v2406_v54, %v9075_v62  ;;  %289 = vst.msk [vmem:[#allocation3 + $0xf0] sm:$0x1] %vm278_vm8, %v11552_v28  ;;  %290 = vst.msk [vmem:[#allocation3 + $0x108] sm:$0x1] %vm278_vm8, %v11552_v28 }
 0x16d   : > { %v2562_v32 = vsel %vm269_vm2, %v2530_v8, %v2443_v13  ;;  %624 = vrot.lane.b32.xlu1 %v558_v9, %s7846_s26  ;;  %291 = vst.msk [vmem:[#allocation3 + $0x120] sm:$0x1] %vm278_vm8, %v11552_v28  ;;  %292 = vst.msk [vmem:[#allocation3 + $0x138] sm:$0x1] %vm278_vm8, %v11552_v28  ;;  %v2235_v8 = vrot.slane %v9177_v31, 1 }
 0x16e   : > { %2472 = vrot.lane.b32.xlu0 %v2405_v3, %s7845_s25  ;;  %7606 = vmatprep.mubr.msk.f32.mxu0 %vm1423_vm7, %v2562_v32  ;;  %293 = vst.msk [vmem:[#allocation3 + $0x150] sm:$0x1] %vm278_vm8, %v11552_v28  ;;  %294 = vst.msk [vmem:[#allocation3 + $0x168] sm:$0x1] %vm278_vm8, %v11552_v28 }
 0x16f   : > { %v597_v57 = vpop.permute.xlu1 %596  ;;  %295 = vst.msk [vmem:[#allocation3 + $0x180] sm:$0x1] %vm278_vm8, %v11552_v28  ;;  %296 = vst.msk [vmem:[#allocation3 + $0x198] sm:$0x1] %vm278_vm8, %v11552_v28  ;;  %v9200_v34 = vsel %vm493_vm5, %v2235_v8, %v9187_v26 }
 0x170   : > { %v2445_v4 = vpop.permute.xlu0 %2444  ;;  %v858_v43 = vsel %vm223_vm0, %v8615_v63, %v597_v57  ;;  %v2409_v63 = vrot.slane %v9051_v39, 2  ;;  %298 = vst.msk [vmem:[#allocation3 + $0x29] sm:$0x1] %vm278_vm8, %v11552_v28  ;;  %299 = vst.msk [vmem:[#allocation3 + $0x41] sm:$0x1] %vm278_vm8, %v11552_v28 }
 0x171   : > { %v2563_v6 = vsel %vm269_vm2, %v2531_v53, %v2445_v4  ;;  %801 = vrot.lane.b32.xlu1 %v735_v44, %s7845_s25  ;;  %300 = vst.msk [vmem:[#allocation3 + $0x59] sm:$0x1] %vm278_vm8, %v11552_v28  ;;  %301 = vst.msk [vmem:[#allocation3 + $0x71] sm:$0x1] %vm278_vm8, %v11552_v28  ;;  %v9204_v53 = vrot.slane %v9179_v14, 2 }
 0x172   : > { %799 = vrot.lane.b32.xlu0 %v8981_v10, %s7845_s25  ;;  %7607 = vmatmul.mubr.msk.f32.gmra.mxu0 %vm1423_vm7, %v2563_v6  ;;  %v2234_v10 = vsel %vm493_vm5, %v9058_v61, %v2233_v56  ;;  %302 = vst.msk [vmem:[#allocation3 + $0x89] sm:$0x1] %vm278_vm8, %v11552_v28  ;;  %303 = vst.msk [vmem:[#allocation3 + $0xa1] sm:$0x1] %vm278_vm8, %v11552_v28  ;;  %v2410_v19 = vsel %vm670_vm4, %v9075_v62, %v2409_v63  ;;  %v441_v57 = vld [vmem:[#allocation2 + $0x160] sm:$0x3] }
 0x173   : > { %v774_v20 = vpop.permute.xlu1 %773  ;;  %304 = vst.msk [vmem:[#allocation3 + $0xb9] sm:$0x1] %vm278_vm8, %v11552_v28  ;;  %305 = vst.msk [vmem:[#allocation3 + $0xd1] sm:$0x1] %vm278_vm8, %v11552_v28  ;;  %v9233_v63 = vld [vmem:[#allocation2 + $0x180] sm:$0xff] }
 0x174   : > { %v772_v50 = vpop.permute.xlu0 %771  ;;  %v890_v45 = vsel %vm269_vm2, %v858_v43, %v774_v20  ;;  %306 = vst.msk [vmem:[#allocation3 + $0xe9] sm:$0x1] %vm278_vm8, %v11552_v28  ;;  %307 = vst.msk [vmem:[#allocation3 + $0x101] sm:$0x1] %vm278_vm8, %v11552_v28 }
 0x175   : > { %v889_v59 = vsel %vm269_vm2, %v857_v2, %v772_v50  ;;  %2300 = vrot.lane.b32.xlu1 %v2234_v10, %s7846_s26  ;;  %308 = vst.msk [vmem:[#allocation3 + $0x119] sm:$0x1] %vm278_vm8, %v11552_v28  ;;  %309 = vst.msk [vmem:[#allocation3 + $0x131] sm:$0x1] %vm278_vm8, %v11552_v28  ;;  %v567_v50 = vrot.slane %v441_v57, 1 }
 0x176   : > { %2298 = vrot.lane.b32.xlu0 %v9071_v22, %s7846_s26  ;;  %7557 = vmatprep.mubr.msk.f32.mxu1 %vm1423_vm7, %v889_v59  ;;  %310 = vst.msk [vmem:[#allocation3 + $0x149] sm:$0x1] %vm278_vm8, %v11552_v28  ;;  %311 = vst.msk [vmem:[#allocation3 + $0x161] sm:$0x1] %vm278_vm8, %v11552_v28 }
 0x177   : > { %7558 = vmatmul.mubr.msk.f32.gmra.mxu1 %vm1423_vm7, %v890_v45  ;;  %v2273_v30 = vpop.permute.xlu1 %2272  ;;  %312 = vst.msk [vmem:[#allocation3 + $0x179] sm:$0x1] %vm278_vm8, %v11552_v28  ;;  %313 = vst.msk [vmem:[#allocation3 + $0x191] sm:$0x1] %vm278_vm8, %v11552_v28  ;;  %v568_v60 = vsel %vm493_vm5, %v9058_v61, %v567_v50  ;;  %v744_v45 = vrot.slane %v441_v57, 2 }
 0x178   : > { %v2271_v23 = vpop.permute.xlu0 %2270  ;;  %v2533_v13 = vsel %vm223_vm0, %v8649_v37, %v2273_v30  ;;  %273 = vst.msk [vmem:[#allocation3 + $0x10] sm:$0x3] %vm272_vm9, %v11552_v28  ;;  %277 = vst.msk [vmem:[#allocation3 + $0x1a8] sm:$0x3] %vm272_vm9, %v11552_v28 }
 0x179   : > { %626 = vrot.lane.b32.xlu1 %v9014_v46, %s7846_s26  ;;  %v2532_v52 = vsel %vm223_vm0, %v8647_v1, %v2271_v23  ;;  %v2115_v46 = vld [vmem:[#allocation2 + $0x178] sm:$0x3]  ;;  %v9235_v23 = vld [vmem:[#allocation2 + $0x188] sm:$0xff]  ;;  %297 = vst.msk [vmem:[#allocation3 + $0x11] sm:$0x1] %vm278_vm8, %v11552_v28 }
 0x17a   : > { %2474 = vrot.lane.b32.xlu0 %v9094_v38, %s7845_s25  ;;  %v2238_v32 = vrot.slane %v2115_v46, 1  ;;  %314 = vst.msk [vmem:[#allocation3 + $0x1a9] sm:$0x1] %vm278_vm8, %v11552_v28 }
 0x17b   : > { %v599_v7 = vpop.permute.xlu1 %598 }
 0x17c   : > { %v2447_v33 = vpop.permute.xlu0 %2446  ;;  %v859_v36 = vsel %vm223_vm0, %v8663_v27, %v599_v7  ;;  %v9221_v27 = vsel %vm670_vm4, %v2411_v35, %v9204_v53 }
 0x17d   : > { %v2564_v3 = vsel %vm269_vm2, %v2532_v52, %v2447_v33  ;;  %628 = vrot.lane.b32.xlu1 %v563_v29, %s7846_s26  ;;  %v2241_v52 = vrot.slane %v9235_v23, 1  ;;  %v745_v29 = vsel %vm670_vm4, %v9075_v62, %v744_v45 }
 0x17e   : > { %2476 = vrot.lane.b32.xlu0 %v2410_v19, %s7845_s25  ;;  %7609 = vmatprep.mubr.msk.f32.mxu0 %vm1423_vm7, %v2564_v3  ;;  %v2118_v19 = vld [vmem:[#allocation2 + $0x190] sm:$0x3]  ;;  %v9247_v3 = vpop.f32.mrf.mxu0 }
 0x17f   : > { %v601_v39 = vpop.permute.xlu1 %600  ;;  %v2243_v58 = vrot.slane %v2118_v19, 1 }
 0x180   : > { %v2449_v9 = vpop.permute.xlu0 %2448  ;;  %v860_v44 = vsel %vm223_vm0, %v8665_v47, %v601_v39  ;;  %v2414_v47 = vrot.slane %v2115_v46, 2 }
 0x181   : > { %v2565_v55 = vsel %vm269_vm2, %v2533_v13, %v2449_v9  ;;  %805 = vrot.lane.b32.xlu1 %v740_v18, %s7845_s25  ;;  %v2416_v13 = vrot.slane %v9233_v63, 2  ;;  %v2417_v9 = vrot.slane %v9235_v23, 2 }
 0x182   : > { %803 = vrot.lane.b32.xlu0 %v9035_v49, %s7845_s25  ;;  %7610 = vmatmul.mubr.msk.f32.gmra.mxu0 %vm1423_vm7, %v2565_v55  ;;  %v2239_v49 = vsel %vm493_vm5, %v9187_v26, %v2238_v32  ;;  %v2415_v43 = vsel %vm670_vm4, %v9204_v53, %v2414_v47  ;;  %v2244_v32 = vsel %vm493_vm5, %v2241_v52, %v2243_v58  ;;  %v9260_v55 = vpop.f32.mrf.mxu0 }
 0x183   : > { %v778_v6 = vpop.permute.xlu1 %777 }
 0x184   : > { %v776_v4 = vpop.permute.xlu0 %775  ;;  %v892_v54 = vsel %vm269_vm2, %v860_v44, %v778_v6  ;;  %v2419_v44 = vrot.slane %v2118_v19, 2 }
 0x185   : > { %v891_v56 = vsel %vm269_vm2, %v859_v36, %v776_v4  ;;  %2304 = vrot.lane.b32.xlu1 %v2239_v49, %s7846_s26  ;;  %v444_v36 = vld [vmem:[#allocation2 + $0x178] sm:$0x3]  ;;  %v9268_v49 = vpop.f32.mrf.mxu0 }
 0x186   : > { %2302 = vrot.lane.b32.xlu0 %v9200_v34, %s7846_s26  ;;  %7560 = vmatprep.mubr.msk.f32.mxu1 %vm1423_vm7, %v891_v56  ;;  %v572_v56 = vrot.slane %v444_v36, 1 }
 0x187   : > { %7561 = vmatmul.mubr.msk.f32.gmra.mxu1 %vm1423_vm7, %v892_v54  ;;  %v2277_v10 = vpop.permute.xlu1 %2276  ;;  %v9274_v57 = vpop.f32.mrf.mxu0  ;;  %v2420_v54 = vsel %vm670_vm4, %v2417_v9, %v2419_v44 }
 0x188   : > { %v2275_v2 = vpop.permute.xlu0 %2274  ;;  %v2535_v61 = vsel %vm223_vm0, %v8711_v16, %v2277_v10  ;;  %v573_v50 = vsel %vm493_vm5, %v9187_v26, %v572_v56  ;;  %v749_v10 = vrot.slane %v444_v36, 2 }
 0x189   : > { %630 = vrot.lane.b32.xlu1 %v9071_v22, %s7846_s26  ;;  %v2534_v59 = vsel %vm223_vm0, %v8709_v21, %v2275_v2  ;;  %v2240_v22 = vrot.slane %v9233_v63, 1 }
 0x18a   : > { %2478 = vrot.lane.b32.xlu0 %v9221_v27, %s7845_s25 }
 0x18b   : > { %v603_v30 = vpop.permute.xlu1 %602  ;;  %v2242_v8 = vsel %vm493_vm5, %v2240_v22, %v2241_v52  ;;  %v750_v22 = vsel %vm670_vm4, %v9204_v53, %v749_v10 }
 0x18c   : > { %v2451_v20 = vpop.permute.xlu0 %2450  ;;  %v861_v62 = vsel %vm223_vm0, %v8647_v1, %v603_v30  ;;  %v2418_v1 = vsel %vm670_vm4, %v2416_v13, %v2417_v9 }
 0x18d   : > { %v2566_v0 = vsel %vm269_vm2, %v2534_v59, %v2451_v20  ;;  %632 = vrot.lane.b32.xlu1 %v568_v60, %s7846_s26  ;;  %v9285_v59 = vld [vmem:[#allocation2 + $0x1a0] sm:$0xff]  ;;  %v9287_v20 = vpop.f32.mrf.mxu0 }
 0x18e   : > { %2480 = vrot.lane.b32.xlu0 %v2415_v43, %s7845_s25  ;;  %7612 = vmatprep.mubr.msk.f32.mxu0 %vm1423_vm7, %v2566_v0  ;;  %v9283_v43 = vld [vmem:[#allocation2 + $0x198] sm:$0xff]  ;;  %v2246_v26 = vrot.slane %v9285_v59, 1  ;;  %v2422_v53 = vrot.slane %v9285_v59, 2 }
 0x18f   : > { %v605_v46 = vpop.permute.xlu1 %604  ;;  %v2245_v0 = vrot.slane %v9283_v43, 1 }
 0x190   : > { %v2453_v33 = vpop.permute.xlu0 %2452 }
 0x191   : > { %v2567_v7 = vsel %vm269_vm2, %v2535_v61, %v2453_v33  ;;  %809 = vrot.lane.b32.xlu1 %v745_v29, %s7845_s25  ;;  %v9299_v61 = vpop.f32.mrf.mxu0 }
 0x192   : > { %807 = vrot.lane.b32.xlu0 %v9094_v38, %s7845_s25  ;;  %7613 = vmatmul.mubr.msk.f32.gmra.mxu0 %vm1423_vm7, %v2567_v7  ;;  %v862_v38 = vsel %vm223_vm0, %v8649_v37, %v605_v46  ;;  %v2247_v7 = vsel %vm493_vm5, %v2245_v0, %v2246_v26  ;;  %v2421_v46 = vrot.slane %v9283_v43, 2 }
 0x193   : > { %v782_v35 = vpop.permute.xlu1 %781  ;;  %v9305_v58 = vpop.f32.mrf.mxu0 }
 0x194   : > { %v780_v18 = vpop.permute.xlu0 %779  ;;  %v894_v4 = vsel %vm269_vm2, %v862_v38, %v782_v35 }
 0x195   : > { %v893_v39 = vsel %vm269_vm2, %v861_v62, %v780_v18  ;;  %2308 = vrot.lane.b32.xlu1 %v2244_v32, %s7846_s26 }
 0x196   : > { %2306 = vrot.lane.b32.xlu0 %v2242_v8, %s7846_s26  ;;  %7563 = vmatprep.mubr.msk.f32.mxu1 %vm1423_vm7, %v893_v39  ;;  %v9320_v39 = vpop.f32.mrf.mxu0 }
 0x197   : > { %7564 = vmatmul.mubr.msk.f32.gmra.mxu1 %vm1423_vm7, %v894_v4  ;;  %v2281_v6 = vpop.permute.xlu1 %2280 }
 0x198   : > { %v2279_v37 = vpop.permute.xlu0 %2278  ;;  %v2537_v30 = vsel %vm223_vm0, %v8764_v42, %v2281_v6  ;;  %v9326_v36 = vpop.f32.mrf.mxu0 }
 0x199   : > { %634 = vrot.lane.b32.xlu1 %v9200_v34, %s7846_s26  ;;  %v2536_v47 = vsel %vm223_vm0, %v8762_v25, %v2279_v37  ;;  %v2121_v34 = vld [vmem:[#allocation2 + $0x1a8] sm:$0x3] }
 0x19a   : > { %2482 = vrot.lane.b32.xlu0 %v2418_v1, %s7845_s25  ;;  %v2248_v52 = vrot.slane %v2121_v34, 1  ;;  %v2424_v62 = vrot.slane %v2121_v34, 2  ;;  %v9332_v37 = vpop.f32.mrf.mxu0 }
 0x19b   : > { %v607_v45 = vpop.permute.xlu1 %606 }
 0x19c   : > { %v2455_v2 = vpop.permute.xlu0 %2454  ;;  %v863_v8 = vsel %vm223_vm0, %v8709_v21, %v607_v45  ;;  %v2249_v9 = vsel %vm493_vm5, %v2246_v26, %v2248_v52  ;;  %v2423_v21 = vsel %vm670_vm4, %v2421_v46, %v2422_v53 }
 0x19d   : > { %v2568_v60 = vsel %vm269_vm2, %v2536_v47, %v2455_v2  ;;  %636 = vrot.lane.b32.xlu1 %v573_v50, %s7846_s26 }
 0x19e   : > { %2484 = vrot.lane.b32.xlu0 %v2420_v54, %s7845_s25  ;;  %7615 = vmatprep.mubr.msk.f32.mxu0 %vm1423_vm7, %v2568_v60  ;;  %v9336_v54 = vpop.f32.mrf.mxu0 }
 0x19f   : > { %v609_v29 = vpop.permute.xlu1 %608 }
 0x1a0   : > { %v2457_v19 = vpop.permute.xlu0 %2456  ;;  %v9342_v60 = vpop.f32.mrf.mxu0 }
 0x1a1   : > { %v2569_v33 = vsel %vm269_vm2, %v2537_v30, %v2457_v19  ;;  %813 = vrot.lane.b32.xlu1 %v750_v22, %s7845_s25 }
 0x1a2   : > { %811 = vrot.lane.b32.xlu0 %v9221_v27, %s7845_s25  ;;  %7616 = vmatmul.mubr.msk.f32.gmra.mxu0 %vm1423_vm7, %v2569_v33  ;;  %v864_v27 = vsel %vm223_vm0, %v8711_v16, %v609_v29  ;;  %v2425_v16 = vsel %vm670_vm4, %v2422_v53, %v2424_v62  ;;  %v9346_v0 = vpop.f32.mrf.mxu0 }
 0x1a3   : > { %v786_v32 = vpop.permute.xlu1 %785 }
 0x1a4   : > { %v784_v13 = vpop.permute.xlu0 %783  ;;  %v896_v38 = vsel %vm269_vm2, %v864_v27, %v786_v32  ;;  %v9354_v33 = vpop.f32.mrf.mxu0 }
 0x1a5   : > { %v895_v18 = vsel %vm269_vm2, %v863_v8, %v784_v13  ;;  %2312 = vrot.lane.b32.xlu1 %v2249_v9, %s7846_s26 }
 0x1a6   : > { %2310 = vrot.lane.b32.xlu0 %v2247_v7, %s7846_s26  ;;  %7566 = vmatprep.mubr.msk.f32.mxu1 %vm1423_vm7, %v895_v18 }
 0x1a7   : > { %7567 = vmatmul.mubr.msk.f32.gmra.mxu1 %vm1423_vm7, %v896_v38  ;;  %v2285_v4 = vpop.permute.xlu1 %2284 }
 0x1a8   : > { %v2283_v35 = vpop.permute.xlu0 %2282  ;;  %v2539_v47 = vsel %vm223_vm0, %v8822_v41, %v2285_v4 }
 0x1a9   : > { %2488 = vrot.lane.b32.xlu1 %v2425_v16, %s7845_s25  ;;  %v2538_v1 = vsel %vm223_vm0, %v8820_v51, %v2283_v35 }
 0x1aa   : > { %2486 = vrot.lane.b32.xlu0 %v2423_v21, %s7845_s25 }
 0x1ab   : > { %v611_v6 = vpop.permute.xlu1 %610 }
 0x1ac   : > { %v2459_v44 = vpop.permute.xlu0 %2458  ;;  %v865_v45 = vsel %vm223_vm0, %v8762_v25, %v611_v6  ;;  %v9356_v25 = vpop.f32.mrf.mxu0 }
 0x1ad   : > { %v2570_v56 = vsel %vm269_vm2, %v2538_v1, %v2459_v44 }
 0x1ae   : > { %7618 = vmatprep.mubr.msk.f32.mxu0 %vm1423_vm7, %v2570_v56  ;;  %v9362_v8 = vpop.f32.mrf.mxu0 }
 0x1af   : > { %v613_v10 = vpop.permute.xlu1 %612 }
 0x1b0   : > { %v2461_v2 = vpop.permute.xlu0 %2460  ;;  %v866_v26 = vsel %vm223_vm0, %v8764_v42, %v613_v10  ;;  %v9366_v62 = vpop.f32.mrf.mxu0 }
 0x1b1   : > { %v2571_v50 = vsel %vm269_vm2, %v2539_v47, %v2461_v2 }
 0x1b2   : > { %7619 = vmatmul.mubr.msk.f32.gmra.mxu0 %vm1423_vm7, %v2571_v50  ;;  %v9372_v21 = vpop.f32.mrf.mxu0 }
 0x1b3   : > { %v790_v19 = vpop.permute.xlu1 %789 }
 0x1b4   : > { %v788_v34 = vpop.permute.xlu0 %787  ;;  %v898_v22 = vsel %vm269_vm2, %v866_v26, %v790_v19  ;;  %v9379_v44 = vpop.f32.mrf.mxu0 }
 0x1b5   : > { %v897_v30 = vsel %vm269_vm2, %v865_v45, %v788_v34 }
 0x1b6   : > { %7569 = vmatprep.mubr.msk.f32.mxu1 %vm1423_vm7, %v897_v30 }
 0x1b7   : > { %7570 = vmatmul.mubr.msk.f32.gmra.mxu1 %vm1423_vm7, %v898_v22  ;;  %v2289_v29 = vpop.permute.xlu1 %2288 }
 0x1b8   : > { %v2287_v52 = vpop.permute.xlu0 %2286  ;;  %v2541_v13 = vsel %vm223_vm0, %v8880_v17, %v2289_v29 }
 0x1b9   : > { %v2540_v7 = vsel %vm223_vm0, %v8878_v40, %v2287_v52 }
 0x1bb   : > { %v615_v53 = vpop.permute.xlu1 %614 }
 0x1bc   : > { %v2463_v46 = vpop.permute.xlu0 %2462  ;;  %v867_v32 = vsel %vm223_vm0, %v8820_v51, %v615_v53  ;;  %v9382_v51 = vpop.f32.mrf.mxu0 }
 0x1bd   : > { %v2572_v42 = vsel %vm269_vm2, %v2540_v7, %v2463_v46 }
 0x1be   : > { %7621 = vmatprep.mubr.msk.f32.mxu0 %vm1423_vm7, %v2572_v42 }
 0x1bf   : > { %v617_v18 = vpop.permute.xlu1 %616 }
 0x1c0   : > { %v2465_v9 = vpop.permute.xlu0 %2464  ;;  %v868_v35 = vsel %vm223_vm0, %v8822_v41, %v617_v18  ;;  %v9386_v41 = vpop.f32.mrf.mxu0 }
 0x1c1   : > { %v2573_v27 = vsel %vm269_vm2, %v2541_v13, %v2465_v9 }
 0x1c2   : > { %7622 = vmatmul.mubr.msk.f32.gmra.mxu0 %vm1423_vm7, %v2573_v27  ;;  %v9392_v26 = vpop.f32.mrf.mxu0 }
 0x1c3   : > { %v794_v4 = vpop.permute.xlu1 %793 }
 0x1c4   : > { %v792_v38 = vpop.permute.xlu0 %791  ;;  %v900_v1 = vsel %vm269_vm2, %v868_v35, %v794_v4  ;;  %v9396_v22 = vpop.f32.mrf.mxu0 }
 0x1c5   : > { %v899_v16 = vsel %vm269_vm2, %v867_v32, %v792_v38 }
 0x1c6   : > { %7572 = vmatprep.mubr.msk.f32.mxu1 %vm1423_vm7, %v899_v16  ;;  %v9405_v13 = vpop.f32.mrf.mxu0 }
 0x1c7   : > { %7573 = vmatmul.mubr.msk.f32.gmra.mxu1 %vm1423_vm7, %v900_v1  ;;  %v2293_v6 = vpop.permute.xlu1 %2292 }
 0x1c8   : > { %v2291_v56 = vpop.permute.xlu0 %2290  ;;  %v2543_v45 = vsel %vm223_vm0, %v8940_v12, %v2293_v6  ;;  %v9408_v27 = vpop.f32.mrf.mxu0 }
 0x1c9   : > { %v2542_v47 = vsel %vm223_vm0, %v8938_v5, %v2291_v56 }
 0x1cb   : > { %v619_v10 = vpop.permute.xlu1 %618 }
 0x1cc   : > { %v2467_v2 = vpop.permute.xlu0 %2466  ;;  %v869_v52 = vsel %vm223_vm0, %v8878_v40, %v619_v10 }
 0x1cd   : > { %v2574_v50 = vsel %vm269_vm2, %v2542_v47, %v2467_v2 }
 0x1ce   : > { %7624 = vmatprep.mubr.msk.f32.mxu0 %vm1423_vm7, %v2574_v50 }
 0x1cf   : > { %v621_v19 = vpop.permute.xlu1 %620 }
 0x1d0   : > { %v2469_v34 = vpop.permute.xlu0 %2468  ;;  %v870_v7 = vsel %vm223_vm0, %v8880_v17, %v621_v19  ;;  %v9412_v17 = vpop.f32.mrf.mxu0 }
 0x1d1   : > { %v2575_v30 = vsel %vm269_vm2, %v2543_v45, %v2469_v34 }
 0x1d2   : > { %7625 = vmatmul.mubr.msk.f32.gmra.mxu0 %vm1423_vm7, %v2575_v30  ;;  %v9416_v16 = vpop.f32.mrf.mxu0 }
 0x1d3   : > { %v798_v42 = vpop.permute.xlu1 %797 }
 0x1d4   : > { %v796_v29 = vpop.permute.xlu0 %795  ;;  %v902_v53 = vsel %vm269_vm2, %v870_v7, %v798_v42  ;;  %v9422_v47 = vpop.f32.mrf.mxu0 }
 0x1d5   : > { %v901_v46 = vsel %vm269_vm2, %v869_v52, %v796_v29 }
 0x1d6   : > { %7575 = vmatprep.mubr.msk.f32.mxu1 %vm1423_vm7, %v901_v46 }
 0x1d7   : > { %7576 = vmatmul.mubr.msk.f32.gmra.mxu1 %vm1423_vm7, %v902_v53  ;;  %v2297_v18 = vpop.permute.xlu1 %2296  ;;  %v9426_v10 = vpop.f32.mrf.mxu0 }
 0x1d8   : > { %v2295_v9 = vpop.permute.xlu0 %2294  ;;  %v2545_v4 = vsel %vm223_vm0, %v8994_v11, %v2297_v18 }
 0x1d9   : > { %v2544_v40 = vsel %vm223_vm0, %v8992_v24, %v2295_v9  ;;  %v9434_v29 = vpop.f32.mrf.mxu0 }
 0x1db   : > { %v623_v35 = vpop.permute.xlu1 %622 }
 0x1dc   : > { %v2471_v32 = vpop.permute.xlu0 %2470  ;;  %v871_v2 = vsel %vm223_vm0, %v8938_v5, %v623_v35 }
 0x1dd   : > { %v2576_v38 = vsel %vm269_vm2, %v2544_v40, %v2471_v32 }
 0x1de   : > { %7627 = vmatprep.mubr.msk.f32.mxu0 %vm1423_vm7, %v2576_v38 }
 0x1df   : > { %v625_v6 = vpop.permute.xlu1 %624 }
 0x1e0   : > { %v2473_v1 = vpop.permute.xlu0 %2472  ;;  %v872_v45 = vsel %vm223_vm0, %v8940_v12, %v625_v6 }
 0x1e1   : > { %v2577_v56 = vsel %vm269_vm2, %v2545_v4, %v2473_v1 }
 0x1e2   : > { %7628 = vmatmul.mubr.msk.f32.gmra.mxu0 %vm1423_vm7, %v2577_v56  ;;  %v9436_v5 = vpop.f32.mrf.mxu0  ;;  %v9451_v56 = vld [vmem:[%s11508_s2] ss:$0 sm:$0xff] }
 0x1e3   : > { %v802_v30 = vpop.permute.xlu1 %801 }
 0x1e4   : > { %v800_v50 = vpop.permute.xlu0 %799  ;;  %v904_v19 = vsel %vm269_vm2, %v872_v45, %v802_v30  ;;  %v9442_v18 = vpop.f32.mrf.mxu0 }
 0x1e5   : > { %v903_v34 = vsel %vm269_vm2, %v871_v2, %v800_v50 }
 0x1e6   : > { %7578 = vmatprep.mubr.msk.f32.mxu1 %vm1423_vm7, %v903_v34 }
 0x1e7   : > { %7579 = vmatmul.mubr.msk.f32.gmra.mxu1 %vm1423_vm7, %v904_v19  ;;  %v2301_v7 = vpop.permute.xlu1 %2300  ;;  %v7544_v46 = vpop.f32.mrf.mxu1 }
 0x1e8   : > { %v2299_v52 = vpop.permute.xlu0 %2298  ;;  %v2547_v40 = vsel %vm223_vm0, %v9048_v15, %v2301_v7  ;;  %v1920_v35 = vadd.f32 %v7544_v46, %v9247_v3 }
 0x1e9   : > { %v2546_v42 = vsel %vm223_vm0, %v9046_v48, %v2299_v52  ;;  %v1914_v32 = vpop.f32.mrf.mxu1 }
 0x1ea   : > { %v1915_v2 = vadd.f32 %v1914_v32, %v9260_v55  ;;  %v390_v32 = vld [vmem:[%s11509_s3 + $0x20] sm:$0xff] }
 0x1eb   : > { %v627_v9 = vpop.permute.xlu1 %626 }
 0x1ec   : > { %v2475_v12 = vpop.permute.xlu0 %2474  ;;  %v873_v45 = vsel %vm223_vm0, %v8992_v24, %v627_v9  ;;  %v391_v9 = vld [vmem:[%s11509_s3 + $0x28] sm:$0xff] }
 0x1ed   : > { %v2578_v53 = vsel %vm269_vm2, %v2546_v42, %v2475_v12  ;;  %7642 = vmatprep.subr.mxu1 %v391_v9 }
 0x1ee   : > { %7630 = vmatprep.mubr.msk.f32.mxu0 %vm1423_vm7, %v2578_v53  ;;  %7643 = vmatpush3.msra.mxu1 %v391_v9 }
 0x1ef   : > { %v629_v1 = vpop.permute.xlu1 %628  ;;  %7644 = vmatprep.subr.mxu1 %v390_v32 }
 0x1f0   : > { %v2477_v38 = vpop.permute.xlu0 %2476  ;;  %v874_v3 = vsel %vm223_vm0, %v8994_v11, %v629_v1  ;;  %7645 = vmatpush3.msra.mxu1 %v390_v32 }
 0x1f1   : > { %v2579_v4 = vsel %vm269_vm2, %v2547_v40, %v2477_v38 }
 0x1f2   : > { %v7596_v6 = vpop.f32.mrf.mxu0  ;;  %7631 = vmatmul.mubr.msk.f32.gmra.mxu0 %vm1423_vm7, %v2579_v4 }
 0x1f3   : > { %v2911_v50 = vadd.f32 %v7596_v6, %v1920_v35  ;;  %v806_v46 = vpop.permute.xlu1 %805  ;;  %v389_v6 = vld [vmem:[%s11509_s3 + $0x18] sm:$0xff] }
 0x1f4   : > { %v2751_v34 = vpop.f32.mrf.mxu0  ;;  %v804_v30 = vpop.permute.xlu0 %803  ;;  %v906_v42 = vsel %vm269_vm2, %v874_v3, %v806_v46  ;;  %7646 = vmatprep.subr.mxu1 %v389_v6 }
 0x1f5   : > { %v2949_v19 = vadd.f32 %v9451_v56, %v2911_v50  ;;  %v2910_v52 = vadd.f32 %v2751_v34, %v1915_v2  ;;  %v905_v7 = vsel %vm269_vm2, %v873_v45, %v804_v30  ;;  %7647 = vmatpush3.msra.mxu1 %v389_v6 }
 0x1f6   : > { %7581 = vmatprep.mubr.msk.f32.mxu1 %vm1423_vm7, %v905_v7 }
 0x1f7   : > { %v2981_v55 = vmax.f32 %v2949_v19, 0.0  ;;  %v2948_v12 = vadd.f32 %v9451_v56, %v2910_v52  ;;  %7582 = vmatmul.mubr.msk.f32.gmra.mxu1 %vm1423_vm7, %v906_v42  ;;  %v2305_v11 = vpop.permute.xlu1 %2304  ;;  %v7547_v40 = vpop.f32.mrf.mxu1 }
 0x1f8   : > { %v2303_v24 = vpop.permute.xlu0 %2302  ;;  %v2549_v50 = vsel %vm223_vm0, %v9179_v14, %v2305_v11  ;;  %v1930_v34 = vadd.f32 %v7547_v40, %v9268_v49 }
 0x1f9   : > { %3014 = vst.msk [vmem:[#allocation3 + $0x21] sm:$0xff] %vm269_vm2, %v2981_v55  ;;  %v2980_v53 = vmax.f32 %v2948_v12, 0.0  ;;  %v2548_v38 = vsel %vm223_vm0, %v9177_v31, %v2303_v24  ;;  %v1924_v2 = vpop.f32.mrf.mxu1 }
 0x1fa   : > { %v1925_v52 = vadd.f32 %v1924_v2, %v9274_v57 }
 0x1fb   : > { %3013 = vst.msk [vmem:[#allocation3 + $0x19] sm:$0xff] %vm269_vm2, %v2980_v53  ;;  %v631_v1 = vpop.permute.xlu1 %630 }
 0x1fc   : > { %v2479_v35 = vpop.permute.xlu0 %2478  ;;  %v875_v55 = vsel %vm223_vm0, %v9046_v48, %v631_v1 }
 0x1fd   : > { %v2580_v4 = vsel %vm269_vm2, %v2548_v38, %v2479_v35 }
 0x1fe   : > { %7633 = vmatprep.mubr.msk.f32.mxu0 %vm1423_vm7, %v2580_v4 }
 0x1ff   : > { %v633_v3 = vpop.permute.xlu1 %632 }
 0x200   : > { %v2481_v45 = vpop.permute.xlu0 %2480  ;;  %v3560_v19 = vld [vmem:[#allocation3 + $0x28] sm:$0x3]  ;;  %v876_v53 = vsel %vm223_vm0, %v9048_v15, %v633_v3 }
 0x201   : > { %v2581_v30 = vsel %vm269_vm2, %v2549_v50, %v2481_v45  ;;  %v3657_v9 = vrot.slane %v3560_v19, 1 }
 0x202   : > { %v7599_v7 = vpop.f32.mrf.mxu0  ;;  %7634 = vmatmul.mubr.msk.f32.gmra.mxu0 %vm1423_vm7, %v2581_v30  ;;  %v9486_v46 = vld [vmem:[#allocation3 + $0x18] sm:$0xff]  ;;  %v9488_v42 = vld [vmem:[#allocation3 + $0x20] sm:$0xff] }
 0x203   : > { %v2913_v12 = vadd.f32 %v7599_v7, %v1930_v34  ;;  %v3654_v24 = vrot.slane %v9486_v46, 1  ;;  %v3655_v49 = vrot.slane %v9488_v42, 1  ;;  %v3830_v40 = vrot.slane %v9486_v46, 2  ;;  %v810_v4 = vpop.permute.xlu1 %809 }
 0x204   : > { %v808_v11 = vpop.permute.xlu0 %807  ;;  %v2761_v57 = vpop.f32.mrf.mxu0  ;;  %v3831_v32 = vrot.slane %v9488_v42, 2  ;;  %v908_v6 = vsel %vm269_vm2, %v876_v53, %v810_v4  ;;  %v3833_v34 = vrot.slane %v3560_v19, 2 }
 0x205   : > { %v2951_v38 = vadd.f32 %v9451_v56, %v2913_v12  ;;  %v907_v35 = vsel %vm269_vm2, %v875_v55, %v808_v11  ;;  %v2912_v48 = vadd.f32 %v2761_v57, %v1925_v52  ;;  %v3656_v1 = vsel %vm493_vm5, %v3654_v24, %v3655_v49 }
 0x206   : > { %3734 = vrot.lane.b32.xlu0 %v3656_v1, %s7845_s25  ;;  %v3658_v15 = vsel %vm493_vm5, %v3655_v49, %v3657_v9  ;;  %7584 = vmatprep.mubr.msk.f32.mxu1 %vm1423_vm7, %v907_v35  ;;  %v3832_v52 = vsel %vm670_vm4, %v3830_v40, %v3831_v32  ;;  %v3834_v7 = vsel %vm670_vm4, %v3831_v32, %v3833_v34 }
 0x207   : > { %v2983_v2 = vmax.f32 %v2951_v38, 0.0  ;;  %v2950_v50 = vadd.f32 %v9451_v56, %v2912_v48  ;;  %3736 = vrot.lane.b32.xlu1 %v3658_v15, %s7845_s25  ;;  %7585 = vmatmul.mubr.msk.f32.gmra.mxu1 %vm1423_vm7, %v908_v6  ;;  %v2309_v3 = vpop.permute.xlu1 %2308  ;;  %v7550_v55 = vpop.f32.mrf.mxu1 }
 0x208   : > { %v2307_v45 = vpop.permute.xlu0 %2306  ;;  %v2551_v11 = vsel %vm223_vm0, %v9235_v23, %v2309_v3  ;;  %v1940_v9 = vadd.f32 %v7550_v55, %v9287_v20 }
 0x209   : > { %3016 = vst.msk [vmem:[#allocation3 + $0x39] sm:$0xff] %vm269_vm2, %v2983_v2  ;;  %v2982_v30 = vmax.f32 %v2950_v50, 0.0  ;;  %v2550_v12 = vsel %vm223_vm0, %v9233_v63, %v2307_v45  ;;  %v1934_v53 = vpop.f32.mrf.mxu1 }
 0x20a   : > { %3910 = vrot.lane.b32.xlu0 %v3832_v52, %s7847_s24  ;;  %v1935_v35 = vadd.f32 %v1934_v53, %v9299_v61 }
 0x20b   : > { %3015 = vst.msk [vmem:[#allocation3 + $0x31] sm:$0xff] %vm269_vm2, %v2982_v30  ;;  %3912 = vrot.lane.b32.xlu1 %v3834_v7, %s7847_s24  ;;  %v635_v49 = vpop.permute.xlu1 %634 }
 0x20c   : > { %v2483_v19 = vpop.permute.xlu0 %2482  ;;  %v877_v1 = vsel %vm223_vm0, %v9177_v31, %v635_v49 }
 0x20d   : > { %v2582_v24 = vsel %vm269_vm2, %v2550_v12, %v2483_v19 }
 0x20e   : > { %7636 = vmatprep.mubr.msk.f32.mxu0 %vm1423_vm7, %v2582_v24 }
 0x20f   : > { %v637_v32 = vpop.permute.xlu1 %636 }
 0x210   : > { %v2485_v57 = vpop.permute.xlu0 %2484  ;;  %v3563_v38 = vld [vmem:[#allocation3 + $0x40] sm:$0x3]  ;;  %v878_v15 = vsel %vm223_vm0, %v9179_v14, %v637_v32 }
 0x211   : > { %v2583_v40 = vsel %vm269_vm2, %v2551_v11, %v2485_v57  ;;  %v3662_v50 = vrot.slane %v3563_v38, 1  ;;  %v3838_v49 = vrot.slane %v3563_v38, 2 }
 0x212   : > { %v7602_v63 = vpop.f32.mrf.mxu0  ;;  %7637 = vmatmul.mubr.msk.f32.gmra.mxu0 %vm1423_vm7, %v2583_v40  ;;  %v9524_v48 = vld [vmem:[#allocation3 + $0x30] sm:$0xff]  ;;  %v9526_v4 = vld [vmem:[#allocation3 + $0x38] sm:$0xff] }
 0x213   : > { %v2915_v23 = vadd.f32 %v7602_v63, %v1940_v9  ;;  %v3659_v6 = vrot.slane %v9524_v48, 1  ;;  %v3660_v20 = vrot.slane %v9526_v4, 1  ;;  %v3835_v45 = vrot.slane %v9524_v48, 2  ;;  %v814_v52 = vpop.permute.xlu1 %813 }
 0x214   : > { %v812_v2 = vpop.permute.xlu0 %811  ;;  %v2771_v61 = vpop.f32.mrf.mxu0  ;;  %v3836_v34 = vrot.slane %v9526_v4, 2  ;;  %v910_v55 = vsel %vm269_vm2, %v878_v15, %v814_v52 }
 0x215   : > { %v2953_v30 = vadd.f32 %v9451_v56, %v2915_v23  ;;  %v909_v3 = vsel %vm269_vm2, %v877_v1, %v812_v2  ;;  %v2914_v31 = vadd.f32 %v2771_v61, %v1935_v35  ;;  %v3661_v7 = vsel %vm493_vm5, %v3659_v6, %v3660_v20 }
 0x216   : > { %3738 = vrot.lane.b32.xlu0 %v3661_v7, %s7845_s25  ;;  %v3663_v14 = vsel %vm493_vm5, %v3660_v20, %v3662_v50  ;;  %7587 = vmatprep.mubr.msk.f32.mxu1 %vm1423_vm7, %v909_v3  ;;  %v3837_v57 = vsel %vm670_vm4, %v3835_v45, %v3836_v34  ;;  %v3839_v9 = vsel %vm670_vm4, %v3836_v34, %v3838_v49 }
 0x217   : > { %v2985_v12 = vmax.f32 %v2953_v30, 0.0  ;;  %v2952_v19 = vadd.f32 %v9451_v56, %v2914_v31  ;;  %3740 = vrot.lane.b32.xlu1 %v3663_v14, %s7845_s25  ;;  %7588 = vmatmul.mubr.msk.f32.gmra.mxu1 %vm1423_vm7, %v910_v55  ;;  %v2313_v11 = vpop.permute.xlu1 %2312  ;;  %v7553_v40 = vpop.f32.mrf.mxu1 }
 0x218   : > { %v2311_v24 = vpop.permute.xlu0 %2310  ;;  %v2553_v38 = vsel %vm223_vm0, %v9285_v59, %v2313_v11  ;;  %v1950_v15 = vadd.f32 %v7553_v40, %v9305_v58 }
 0x219   : > { %3018 = vst.msk [vmem:[#allocation3 + $0x51] sm:$0xff] %vm269_vm2, %v2985_v12  ;;  %v2984_v53 = vmax.f32 %v2952_v19, 0.0  ;;  %v2552_v32 = vsel %vm223_vm0, %v9283_v43, %v2311_v24  ;;  %v1944_v6 = vpop.f32.mrf.mxu1  ;;  %vm6936_vm0 = vcmask 261120  }
 0x21a   : > { %3914 = vrot.lane.b32.xlu0 %v3837_v57, %s7847_s24  ;;  %v1945_v2 = vadd.f32 %v1944_v6, %v9320_v39 }
 0x21b   : > { %3017 = vst.msk [vmem:[#allocation3 + $0x49] sm:$0xff] %vm269_vm2, %v2984_v53  ;;  %3916 = vrot.lane.b32.xlu1 %v3839_v9, %s7847_s24  ;;  %v2489_v1 = vpop.permute.xlu1 %2488 }
 0x21c   : > { %v2487_v35 = vpop.permute.xlu0 %2486  ;;  %v2585_v23 = vsel %vm269_vm2, %v2553_v38, %v2489_v1 }
 0x21d   : > { %v2584_v63 = vsel %vm269_vm2, %v2552_v32, %v2487_v35 }
 0x21e   : > { %7639 = vmatprep.mubr.msk.f32.mxu0 %vm1423_vm7, %v2584_v63 }
 0x21f   : > { %7640 = vmatmul.mubr.msk.f32.gmra.mxu0 %vm1423_vm7, %v2585_v23 }
 0x220   : > { %v3566_v20 = vld [vmem:[#allocation3 + $0x58] sm:$0x3] }
 0x221   : > { %v3667_v30 = vrot.slane %v3566_v20, 1  ;;  %v3843_v19 = vrot.slane %v3566_v20, 2 }
 0x222   : > { %v7605_v43 = vpop.f32.mrf.mxu0  ;;  %v9562_v61 = vld [vmem:[#allocation3 + $0x48] sm:$0xff]  ;;  %v9564_v50 = vld [vmem:[#allocation3 + $0x50] sm:$0xff] }
 0x223   : > { %v2917_v59 = vadd.f32 %v7605_v43, %v1950_v15  ;;  %v3664_v45 = vrot.slane %v9562_v61, 1  ;;  %v3665_v34 = vrot.slane %v9564_v50, 1  ;;  %v3840_v31 = vrot.slane %v9562_v61, 2 }
 0x224   : > { %v2781_v3 = vpop.f32.mrf.mxu0  ;;  %v3841_v52 = vrot.slane %v9564_v50, 2 }
 0x225   : > { %v2955_v58 = vadd.f32 %v9451_v56, %v2917_v59  ;;  %v2916_v7 = vadd.f32 %v2781_v3, %v1945_v2  ;;  %v3666_v39 = vsel %vm493_vm5, %v3664_v45, %v3665_v34  ;;  %v3668_v55 = vsel %vm493_vm5, %v3665_v34, %v3667_v30 }
 0x226   : > { %3742 = vrot.lane.b32.xlu0 %v3666_v39, %s7845_s25  ;;  %3744 = vrot.lane.b32.xlu1 %v3668_v55, %s7845_s25  ;;  %v3842_v49 = vsel %vm670_vm4, %v3840_v31, %v3841_v52  ;;  %v3844_v53 = vsel %vm670_vm4, %v3841_v52, %v3843_v19 }
 0x227   : > { %v2987_v14 = vmax.f32 %v2955_v58, 0.0  ;;  %v2954_v12 = vadd.f32 %v9451_v56, %v2916_v7  ;;  %v7556_v11 = vpop.f32.mrf.mxu1 }
 0x228   : > { %v1960_v40 = vadd.f32 %v7556_v11, %v9326_v36 }
 0x229   : > { %3020 = vst.msk [vmem:[#allocation3 + $0x69] sm:$0xff] %vm269_vm2, %v2987_v14  ;;  %v2986_v24 = vmax.f32 %v2954_v12, 0.0  ;;  %v1954_v57 = vpop.f32.mrf.mxu1 }
 0x22a   : > { %3918 = vrot.lane.b32.xlu0 %v3842_v49, %s7847_s24  ;;  %3920 = vrot.lane.b32.xlu1 %v3844_v53, %s7847_s24  ;;  %v1955_v32 = vadd.f32 %v1954_v57, %v9332_v37 }
 0x22b   : > { %3019 = vst.msk [vmem:[#allocation3 + $0x61] sm:$0xff] %vm269_vm2, %v2986_v24 }
 0x230   : > { %v3569_v9 = vld [vmem:[#allocation3 + $0x70] sm:$0x3] }
 0x231   : > { %v3672_v20 = vrot.slane %v3569_v9, 1  ;;  %v3848_v3 = vrot.slane %v3569_v9, 2 }
 0x232   : > { %v7608_v35 = vpop.f32.mrf.mxu0  ;;  %v9584_v38 = vld [vmem:[#allocation3 + $0x60] sm:$0xff]  ;;  %v9586_v63 = vld [vmem:[#allocation3 + $0x68] sm:$0xff] }
 0x233   : > { %v2919_v1 = vadd.f32 %v7608_v35, %v1960_v40  ;;  %v3669_v23 = vrot.slane %v9584_v38, 1  ;;  %v3670_v6 = vrot.slane %v9586_v63, 1  ;;  %v3845_v2 = vrot.slane %v9584_v38, 2 }
 0x234   : > { %v2791_v15 = vpop.f32.mrf.mxu0  ;;  %v3846_v43 = vrot.slane %v9586_v63, 2 }
 0x235   : > { %v2957_v36 = vadd.f32 %v9451_v56, %v2919_v1  ;;  %v2918_v59 = vadd.f32 %v2791_v15, %v1955_v32  ;;  %v3671_v37 = vsel %vm493_vm5, %v3669_v23, %v3670_v6  ;;  %v3673_v45 = vsel %vm493_vm5, %v3670_v6, %v3672_v20 }
 0x236   : > { %3746 = vrot.lane.b32.xlu0 %v3671_v37, %s7845_s25  ;;  %3748 = vrot.lane.b32.xlu1 %v3673_v45, %s7845_s25  ;;  %v3847_v52 = vsel %vm670_vm4, %v3845_v2, %v3846_v43  ;;  %v3849_v58 = vsel %vm670_vm4, %v3846_v43, %v3848_v3 }
 0x237   : > { %v2989_v34 = vmax.f32 %v2957_v36, 0.0  ;;  %v2956_v30 = vadd.f32 %v9451_v56, %v2918_v59  ;;  %v7559_v7 = vpop.f32.mrf.mxu1 }
 0x238   : > { %v1970_v14 = vadd.f32 %v7559_v7, %v9336_v54 }
 0x239   : > { %3022 = vst.msk [vmem:[#allocation3 + $0x81] sm:$0xff] %vm269_vm2, %v2989_v34  ;;  %v2988_v31 = vmax.f32 %v2956_v30, 0.0  ;;  %v1964_v39 = vpop.f32.mrf.mxu1 }
 0x23a   : > { %3922 = vrot.lane.b32.xlu0 %v3847_v52, %s7847_s24  ;;  %3924 = vrot.lane.b32.xlu1 %v3849_v58, %s7847_s24  ;;  %v1965_v12 = vadd.f32 %v1964_v39, %v9342_v60 }
 0x23b   : > { %3021 = vst.msk [vmem:[#allocation3 + $0x79] sm:$0xff] %vm269_vm2, %v2988_v31 }
 0x240   : > { %v3572_v55 = vld [vmem:[#allocation3 + $0x88] sm:$0x3] }
 0x241   : > { %v3677_v9 = vrot.slane %v3572_v55, 1  ;;  %v3853_v15 = vrot.slane %v3572_v55, 2 }
 0x242   : > { %v7611_v19 = vpop.f32.mrf.mxu0  ;;  %v9606_v24 = vld [vmem:[#allocation3 + $0x78] sm:$0xff]  ;;  %v9608_v49 = vld [vmem:[#allocation3 + $0x80] sm:$0xff] }
 0x243   : > { %v2921_v53 = vadd.f32 %v7611_v19, %v1970_v14  ;;  %v3674_v11 = vrot.slane %v9606_v24, 1  ;;  %v3675_v57 = vrot.slane %v9608_v49, 1  ;;  %v3850_v32 = vrot.slane %v9606_v24, 2 }
 0x244   : > { %v2801_v40 = vpop.f32.mrf.mxu0  ;;  %v3851_v35 = vrot.slane %v9608_v49, 2 }
 0x245   : > { %v2959_v54 = vadd.f32 %v9451_v56, %v2921_v53  ;;  %v2920_v1 = vadd.f32 %v2801_v40, %v1965_v12  ;;  %v3676_v60 = vsel %vm493_vm5, %v3674_v11, %v3675_v57  ;;  %v3678_v23 = vsel %vm493_vm5, %v3675_v57, %v3677_v9 }
 0x246   : > { %3750 = vrot.lane.b32.xlu0 %v3676_v60, %s7845_s25  ;;  %3752 = vrot.lane.b32.xlu1 %v3678_v23, %s7845_s25  ;;  %v3852_v43 = vsel %vm670_vm4, %v3850_v32, %v3851_v35  ;;  %v3854_v36 = vsel %vm670_vm4, %v3851_v35, %v3853_v15 }
 0x247   : > { %v2991_v6 = vmax.f32 %v2959_v54, 0.0  ;;  %v2958_v20 = vadd.f32 %v9451_v56, %v2920_v1  ;;  %v7562_v59 = vpop.f32.mrf.mxu1 }
 0x248   : > { %v1980_v34 = vadd.f32 %v7562_v59, %v9346_v0 }
 0x249   : > { %3024 = vst.msk [vmem:[#allocation3 + $0x99] sm:$0xff] %vm269_vm2, %v2991_v6  ;;  %v2990_v2 = vmax.f32 %v2958_v20, 0.0  ;;  %v1974_v37 = vpop.f32.mrf.mxu1 }
 0x24a   : > { %3926 = vrot.lane.b32.xlu0 %v3852_v43, %s7847_s24  ;;  %3928 = vrot.lane.b32.xlu1 %v3854_v36, %s7847_s24  ;;  %v1975_v30 = vadd.f32 %v1974_v37, %v9354_v33 }
 0x24b   : > { %3023 = vst.msk [vmem:[#allocation3 + $0x91] sm:$0xff] %vm269_vm2, %v2990_v2 }
 0x250   : > { %v3575_v45 = vld [vmem:[#allocation3 + $0xa0] sm:$0x3] }
 0x251   : > { %v3682_v55 = vrot.slane %v3575_v45, 1  ;;  %v3858_v40 = vrot.slane %v3575_v45, 2 }
 0x252   : > { %v7614_v3 = vpop.f32.mrf.mxu0  ;;  %v9628_v31 = vld [vmem:[#allocation3 + $0x90] sm:$0xff]  ;;  %v9630_v52 = vld [vmem:[#allocation3 + $0x98] sm:$0xff] }
 0x253   : > { %v2923_v58 = vadd.f32 %v7614_v3, %v1980_v34  ;;  %v3679_v7 = vrot.slane %v9628_v31, 1  ;;  %v3680_v39 = vrot.slane %v9630_v52, 1  ;;  %v3855_v12 = vrot.slane %v9628_v31, 2 }
 0x254   : > { %v2811_v14 = vpop.f32.mrf.mxu0  ;;  %v3856_v19 = vrot.slane %v9630_v52, 2 }
 0x255   : > { %v2961_v0 = vadd.f32 %v9451_v56, %v2923_v58  ;;  %v2922_v53 = vadd.f32 %v2811_v14, %v1975_v30  ;;  %v3681_v33 = vsel %vm493_vm5, %v3679_v7, %v3680_v39  ;;  %v3683_v11 = vsel %vm493_vm5, %v3680_v39, %v3682_v55 }
 0x256   : > { %3754 = vrot.lane.b32.xlu0 %v3681_v33, %s7845_s25  ;;  %3756 = vrot.lane.b32.xlu1 %v3683_v11, %s7845_s25  ;;  %v3857_v35 = vsel %vm670_vm4, %v3855_v12, %v3856_v19  ;;  %v3859_v54 = vsel %vm670_vm4, %v3856_v19, %v3858_v40 }
 0x257   : > { %v2993_v57 = vmax.f32 %v2961_v0, 0.0  ;;  %v2960_v9 = vadd.f32 %v9451_v56, %v2922_v53  ;;  %v7565_v1 = vpop.f32.mrf.mxu1 }
 0x258   : > { %v1990_v6 = vadd.f32 %v7565_v1, %v9356_v25 }
 0x259   : > { %3026 = vst.msk [vmem:[#allocation3 + $0xb1] sm:$0xff] %vm269_vm2, %v2993_v57  ;;  %v2992_v32 = vmax.f32 %v2960_v9, 0.0  ;;  %v1984_v60 = vpop.f32.mrf.mxu1 }
 0x25a   : > { %3930 = vrot.lane.b32.xlu0 %v3857_v35, %s7847_s24  ;;  %3932 = vrot.lane.b32.xlu1 %v3859_v54, %s7847_s24  ;;  %v1985_v20 = vadd.f32 %v1984_v60, %v9362_v8 }
 0x25b   : > { %3025 = vst.msk [vmem:[#allocation3 + $0xa9] sm:$0xff] %vm269_vm2, %v2992_v32 }
 0x260   : > { %v3578_v23 = vld [vmem:[#allocation3 + $0xb8] sm:$0x3] }
 0x261   : > { %v3687_v45 = vrot.slane %v3578_v23, 1  ;;  %v3863_v14 = vrot.slane %v3578_v23, 2 }
 0x262   : > { %v7617_v15 = vpop.f32.mrf.mxu0  ;;  %v9650_v2 = vld [vmem:[#allocation3 + $0xa8] sm:$0xff]  ;;  %v9652_v43 = vld [vmem:[#allocation3 + $0xb0] sm:$0xff] }
 0x263   : > { %v2925_v36 = vadd.f32 %v7617_v15, %v1990_v6  ;;  %v3684_v59 = vrot.slane %v9650_v2, 1  ;;  %v3685_v37 = vrot.slane %v9652_v43, 1  ;;  %v3860_v30 = vrot.slane %v9650_v2, 2 }
 0x264   : > { %v2821_v34 = vpop.f32.mrf.mxu0  ;;  %v3861_v3 = vrot.slane %v9652_v43, 2 }
 0x265   : > { %v2963_v25 = vadd.f32 %v9451_v56, %v2925_v36  ;;  %v2924_v58 = vadd.f32 %v2821_v34, %v1985_v20  ;;  %v3686_v8 = vsel %vm493_vm5, %v3684_v59, %v3685_v37  ;;  %v3688_v7 = vsel %vm493_vm5, %v3685_v37, %v3687_v45 }
 0x266   : > { %3758 = vrot.lane.b32.xlu0 %v3686_v8, %s7845_s25  ;;  %3760 = vrot.lane.b32.xlu1 %v3688_v7, %s7845_s25  ;;  %v3862_v19 = vsel %vm670_vm4, %v3860_v30, %v3861_v3  ;;  %v3864_v0 = vsel %vm670_vm4, %v3861_v3, %v3863_v14 }
 0x267   : > { %v2995_v39 = vmax.f32 %v2963_v25, 0.0  ;;  %v2962_v55 = vadd.f32 %v9451_v56, %v2924_v58  ;;  %v7568_v53 = vpop.f32.mrf.mxu1 }
 0x268   : > { %v2000_v57 = vadd.f32 %v7568_v53, %v9366_v62 }
 0x269   : > { %3028 = vst.msk [vmem:[#allocation3 + $0xc9] sm:$0xff] %vm269_vm2, %v2995_v39  ;;  %v2994_v12 = vmax.f32 %v2962_v55, 0.0  ;;  %v1994_v33 = vpop.f32.mrf.mxu1 }
 0x26a   : > { %3934 = vrot.lane.b32.xlu0 %v3862_v19, %s7847_s24  ;;  %3936 = vrot.lane.b32.xlu1 %v3864_v0, %s7847_s24  ;;  %v1995_v9 = vadd.f32 %v1994_v33, %v9372_v21 }
 0x26b   : > { %3027 = vst.msk [vmem:[#allocation3 + $0xc1] sm:$0xff] %vm269_vm2, %v2994_v12 }
 0x270   : > { %v3581_v11 = vld [vmem:[#allocation3 + $0xd0] sm:$0x3] }
 0x271   : > { %v3692_v1 = vrot.slane %v3581_v11, 1  ;;  %v3868_v45 = vrot.slane %v3581_v11, 2 }
 0x272   : > { %v7620_v40 = vpop.f32.mrf.mxu0  ;;  %v9674_v32 = vld [vmem:[#allocation3 + $0xc8] sm:$0xff]  ;;  %v9676_v35 = vld [vmem:[#allocation3 + $0xc0] sm:$0xff] }
 0x273   : > { %v2927_v54 = vadd.f32 %v7620_v40, %v2000_v57  ;;  %v3690_v62 = vrot.slane %v9674_v32, 1  ;;  %v3689_v60 = vrot.slane %v9676_v35, 1  ;;  %v3866_v21 = vrot.slane %v9674_v32, 2 }
 0x274   : > { %v2831_v23 = vpop.f32.mrf.mxu0  ;;  %v3865_v6 = vrot.slane %v9676_v35, 2 }
 0x275   : > { %v2965_v20 = vadd.f32 %v9451_v56, %v2927_v54  ;;  %v2926_v15 = vadd.f32 %v2831_v23, %v1995_v9  ;;  %v3693_v36 = vsel %vm493_vm5, %v3690_v62, %v3692_v1  ;;  %v3691_v59 = vsel %vm493_vm5, %v3689_v60, %v3690_v62 }
 0x276   : > { %3764 = vrot.lane.b32.xlu1 %v3693_v36, %s7845_s25  ;;  %3762 = vrot.lane.b32.xlu0 %v3691_v59, %s7845_s25  ;;  %v3869_v25 = vsel %vm670_vm4, %v3866_v21, %v3868_v45  ;;  %v3867_v58 = vsel %vm670_vm4, %v3865_v6, %v3866_v21 }
 0x277   : > { %v2997_v28 = vmax.f32 %v2965_v20, 0.0  ;;  %v2964_v37 = vadd.f32 %v9451_v56, %v2926_v15  ;;  %v7571_v8 = vpop.f32.mrf.mxu1 }
 0x278   : > { %v3735_v34 = vpop.permute.xlu0 %3734  ;;  %v2010_v33 = vadd.f32 %v7571_v8, %v9379_v44 }
 0x279   : > { %3030 = vst.msk [vmem:[#allocation3 + $0xe1] sm:$0xff] %vm269_vm2, %v2997_v28  ;;  %v2996_v30 = vmax.f32 %v2964_v37, 0.0  ;;  %v3737_v3 = vpop.permute.xlu1 %3736  ;;  %v4006_v7 = vsel %vm269_vm2, %v9486_v46, %v3735_v34  ;;  %v2004_v0 = vpop.f32.mrf.mxu1 }
 0x27a   : > { %3940 = vrot.lane.b32.xlu1 %v3869_v25, %s7847_s24  ;;  %3938 = vrot.lane.b32.xlu0 %v3867_v58, %s7847_s24  ;;  %v4007_v55 = vsel %vm269_vm2, %v9488_v42, %v3737_v3  ;;  %v2005_v11 = vadd.f32 %v2004_v0, %v9382_v51 }
 0x27b   : > { %3029 = vst.msk [vmem:[#allocation3 + $0xd9] sm:$0xff] %vm269_vm2, %v2996_v30 }
 0x27c   : > { %v3911_v39 = vpop.permute.xlu0 %3910 }
 0x27d   : > { %v4038_v14 = vsel %vm3525_vm10, %v4006_v7, %v3911_v39  ;;  %v3913_v12 = vpop.permute.xlu1 %3912 }
 0x27e   : > { %v4039_v19 = vsel %vm3525_vm10, %v4007_v55, %v3913_v12  ;;  %7648 = vmatprep.mubr.msk.f32.mxu1 %vm4070_vm11, %v4038_v14 }
 0x27f   : > { %7649 = vmatmul.mubr.msk.f32.vlgmr.msra.gmra.mxu1 %vm4070_vm11, %v4039_v19 }
 0x280   : > { %v3584_v53 = vld [vmem:[#allocation3 + $0xe8] sm:$0x3] }
 0x281   : > { %v3697_v54 = vrot.slane %v3584_v53, 1  ;;  %v3873_v36 = vrot.slane %v3584_v53, 2 }
 0x282   : > { %v7623_v46 = vpop.f32.mrf.mxu0  ;;  %v9708_v57 = vld [vmem:[#allocation3 + $0xe0] sm:$0xff]  ;;  %v9710_v9 = vld [vmem:[#allocation3 + $0xd8] sm:$0xff] }
 0x283   : > { %v2929_v42 = vadd.f32 %v7623_v46, %v2010_v33  ;;  %v3695_v40 = vrot.slane %v9708_v57, 1  ;;  %v3694_v62 = vrot.slane %v9710_v9, 1  ;;  %v3871_v60 = vrot.slane %v9708_v57, 2 }
 0x284   : > { %v2841_v1 = vpop.f32.mrf.mxu0  ;;  %v3870_v23 = vrot.slane %v9710_v9, 2 }
 0x285   : > { %v2967_v44 = vadd.f32 %v9451_v56, %v2929_v42  ;;  %v2928_v21 = vadd.f32 %v2841_v1, %v2005_v11  ;;  %v3698_v51 = vsel %vm493_vm5, %v3695_v40, %v3697_v54  ;;  %v3696_v6 = vsel %vm493_vm5, %v3694_v62, %v3695_v40 }
 0x286   : > { %3768 = vrot.lane.b32.xlu1 %v3698_v51, %s7845_s25  ;;  %3766 = vrot.lane.b32.xlu0 %v3696_v6, %s7845_s25  ;;  %v3874_v45 = vsel %vm670_vm4, %v3871_v60, %v3873_v36  ;;  %v3872_v34 = vsel %vm670_vm4, %v3870_v23, %v3871_v60 }
 0x287   : > { %v2999_v20 = vmax.f32 %v2967_v44, 0.0  ;;  %v2966_v15 = vadd.f32 %v9451_v56, %v2928_v21  ;;  %v7574_v30 = vpop.f32.mrf.mxu1 }
 0x288   : > { %v3739_v59 = vpop.permute.xlu0 %3738  ;;  %v2020_v12 = vadd.f32 %v7574_v30, %v9386_v41 }
 0x289   : > { %3032 = vst.msk [vmem:[#allocation3 + $0xf9] sm:$0xff] %vm269_vm2, %v2999_v20  ;;  %v2998_v28 = vmax.f32 %v2966_v15, 0.0  ;;  %v3741_v37 = vpop.permute.xlu1 %3740  ;;  %v4008_v3 = vsel %vm269_vm2, %v9524_v48, %v3739_v59  ;;  %v2014_v55 = vpop.f32.mrf.mxu1 }
 0x28a   : > { %3944 = vrot.lane.b32.xlu1 %v3874_v45, %s7847_s24  ;;  %3942 = vrot.lane.b32.xlu0 %v3872_v34, %s7847_s24  ;;  %v4009_v58 = vsel %vm269_vm2, %v9526_v4, %v3741_v37  ;;  %v2015_v19 = vadd.f32 %v2014_v55, %v9392_v26 }
 0x28b   : > { %3031 = vst.msk [vmem:[#allocation3 + $0xf1] sm:$0xff] %vm269_vm2, %v2998_v28 }
 0x28c   : > { %v3915_v25 = vpop.permute.xlu0 %3914 }
 0x28d   : > { %v4040_v8 = vsel %vm3525_vm10, %v4008_v3, %v3915_v25  ;;  %v3917_v7 = vpop.permute.xlu1 %3916 }
 0x28e   : > { %v4041_v39 = vsel %vm3525_vm10, %v4009_v58, %v3917_v7  ;;  %7651 = vmatprep.mubr.msk.f32.mxu1 %vm4070_vm11, %v4040_v8 }
 0x28f   : > { %7652 = vmatmul.mubr.msk.f32.gmra.mxu1 %vm4070_vm11, %v4041_v39 }
 0x290   : > { %v3587_v14 = vld [vmem:[#allocation3 + $0x100] sm:$0x3] }
 0x291   : > { %v3702_v11 = vrot.slane %v3587_v14, 1  ;;  %v3878_v44 = vrot.slane %v3587_v14, 2 }
 0x292   : > { %v7626_v48 = vpop.f32.mrf.mxu0  ;;  %v9738_v0 = vld [vmem:[#allocation3 + $0xf8] sm:$0xff]  ;;  %v9740_v53 = vld [vmem:[#allocation3 + $0xf0] sm:$0xff] }
 0x293   : > { %v2931_v4 = vadd.f32 %v7626_v48, %v2020_v12  ;;  %v3700_v33 = vrot.slane %v9738_v0, 1  ;;  %v3699_v46 = vrot.slane %v9740_v53, 1  ;;  %v3876_v40 = vrot.slane %v9738_v0, 2 }
 0x294   : > { %v2851_v42 = vpop.f32.mrf.mxu0  ;;  %v3875_v54 = vrot.slane %v9740_v53, 2 }
 0x295   : > { %v2969_v41 = vadd.f32 %v9451_v56, %v2931_v4  ;;  %v2930_v62 = vadd.f32 %v2851_v42, %v2015_v19  ;;  %v3703_v26 = vsel %vm493_vm5, %v3700_v33, %v3702_v11  ;;  %v3701_v1 = vsel %vm493_vm5, %v3699_v46, %v3700_v33 }
 0x296   : > { %3772 = vrot.lane.b32.xlu1 %v3703_v26, %s7845_s25  ;;  %3770 = vrot.lane.b32.xlu0 %v3701_v1, %s7845_s25  ;;  %v3879_v20 = vsel %vm670_vm4, %v3876_v40, %v3878_v44  ;;  %v3877_v15 = vsel %vm670_vm4, %v3875_v54, %v3876_v40 }
 0x297   : > { %v3001_v60 = vmax.f32 %v2969_v41, 0.0  ;;  %v2968_v23 = vadd.f32 %v9451_v56, %v2930_v62  ;;  %v7577_v36 = vpop.f32.mrf.mxu1 }
 0x298   : > { %v3743_v21 = vpop.permute.xlu0 %3742  ;;  %v3745_v51 = vpop.permute.xlu1 %3744  ;;  %v2030_v58 = vadd.f32 %v7577_v36, %v9396_v22 }
 0x299   : > { %3034 = vst.msk [vmem:[#allocation3 + $0x111] sm:$0xff] %vm269_vm2, %v3001_v60  ;;  %v3000_v6 = vmax.f32 %v2968_v23, 0.0  ;;  %v4010_v59 = vsel %vm269_vm2, %v9562_v61, %v3743_v21  ;;  %v4011_v28 = vsel %vm269_vm2, %v9564_v50, %v3745_v51  ;;  %v2024_v3 = vpop.f32.mrf.mxu1 }
 0x29a   : > { %3948 = vrot.lane.b32.xlu1 %v3879_v20, %s7847_s24  ;;  %3946 = vrot.lane.b32.xlu0 %v3877_v15, %s7847_s24  ;;  %v2025_v8 = vadd.f32 %v2024_v3, %v9405_v13 }
 0x29b   : > { %3033 = vst.msk [vmem:[#allocation3 + $0x109] sm:$0xff] %vm269_vm2, %v3000_v6 }
 0x29c   : > { %v3919_v37 = vpop.permute.xlu0 %3918  ;;  %v3921_v45 = vpop.permute.xlu1 %3920 }
 0x29d   : > { %v4042_v34 = vsel %vm3525_vm10, %v4010_v59, %v3919_v37  ;;  %v4043_v30 = vsel %vm3525_vm10, %v4011_v28, %v3921_v45 }
 0x29e   : > { %7654 = vmatprep.mubr.msk.f32.mxu1 %vm4070_vm11, %v4042_v34 }
 0x29f   : > { %7655 = vmatmul.mubr.msk.f32.gmra.mxu1 %vm4070_vm11, %v4043_v30 }
 0x2a0   : > { %v3590_v25 = vld [vmem:[#allocation3 + $0x118] sm:$0x3] }
 0x2a1   : > { %v3707_v14 = vrot.slane %v3590_v25, 1  ;;  %v3883_v40 = vrot.slane %v3590_v25, 2 }
 0x2a2   : > { %v7629_v61 = vpop.f32.mrf.mxu0  ;;  %v9768_v7 = vld [vmem:[#allocation3 + $0x110] sm:$0xff]  ;;  %v9770_v50 = vld [vmem:[#allocation3 + $0x108] sm:$0xff] }
 0x2a3   : > { %v2933_v39 = vadd.f32 %v7629_v61, %v2030_v58  ;;  %v3705_v55 = vrot.slane %v9768_v7, 1  ;;  %v3704_v12 = vrot.slane %v9770_v50, 1  ;;  %v3881_v48 = vrot.slane %v9768_v7, 2 }
 0x2a4   : > { %v2861_v19 = vpop.f32.mrf.mxu0  ;;  %v3880_v4 = vrot.slane %v9770_v50, 2 }
 0x2a5   : > { %v2971_v22 = vadd.f32 %v9451_v56, %v2933_v39  ;;  %v2932_v33 = vadd.f32 %v2861_v19, %v2025_v8  ;;  %v3708_v13 = vsel %vm493_vm5, %v3705_v55, %v3707_v14  ;;  %v3706_v11 = vsel %vm493_vm5, %v3704_v12, %v3705_v55 }
 0x2a6   : > { %3776 = vrot.lane.b32.xlu1 %v3708_v13, %s7845_s25  ;;  %3774 = vrot.lane.b32.xlu0 %v3706_v11, %s7845_s25  ;;  %v3884_v26 = vsel %vm670_vm4, %v3881_v48, %v3883_v40  ;;  %v3882_v1 = vsel %vm670_vm4, %v3880_v4, %v3881_v48 }
 0x2a7   : > { %v3003_v46 = vmax.f32 %v2971_v22, 0.0  ;;  %v2970_v42 = vadd.f32 %v9451_v56, %v2932_v33  ;;  %v7580_v60 = vpop.f32.mrf.mxu1 }
 0x2a8   : > { %v3747_v54 = vpop.permute.xlu0 %3746  ;;  %v3749_v41 = vpop.permute.xlu1 %3748  ;;  %v2040_v59 = vadd.f32 %v7580_v60, %v9408_v27 }
 0x2a9   : > { %3036 = vst.msk [vmem:[#allocation3 + $0x129] sm:$0xff] %vm269_vm2, %v3003_v46  ;;  %v3002_v62 = vmax.f32 %v2970_v42, 0.0  ;;  %v4012_v23 = vsel %vm269_vm2, %v9584_v38, %v3747_v54  ;;  %v4013_v44 = vsel %vm269_vm2, %v9586_v63, %v3749_v41  ;;  %v2034_v15 = vpop.f32.mrf.mxu1 }
 0x2aa   : > { %3952 = vrot.lane.b32.xlu1 %v3884_v26, %s7847_s24  ;;  %3950 = vrot.lane.b32.xlu0 %v3882_v1, %s7847_s24  ;;  %v2035_v28 = vadd.f32 %v2034_v15, %v9412_v17 }
 0x2ab   : > { %3035 = vst.msk [vmem:[#allocation3 + $0x121] sm:$0xff] %vm269_vm2, %v3002_v62 }
 0x2ac   : > { %v3923_v21 = vpop.permute.xlu0 %3922  ;;  %v3925_v51 = vpop.permute.xlu1 %3924 }
 0x2ad   : > { %v4044_v6 = vsel %vm3525_vm10, %v4012_v23, %v3923_v21  ;;  %v4045_v20 = vsel %vm3525_vm10, %v4013_v44, %v3925_v51 }
 0x2ae   : > { %7657 = vmatprep.mubr.msk.f32.mxu1 %vm4070_vm11, %v4044_v6 }
 0x2af   : > { %7658 = vmatmul.mubr.msk.f32.gmra.mxu1 %vm4070_vm11, %v4045_v20 }
 0x2b0   : > { %v3593_v36 = vld [vmem:[#allocation3 + $0x130] sm:$0x3] }
 0x2b1   : > { %v3712_v30 = vrot.slane %v3593_v36, 1  ;;  %v3888_v12 = vrot.slane %v3593_v36, 2 }
 0x2b2   : > { %v7632_v38 = vpop.f32.mrf.mxu0  ;;  %v9798_v37 = vld [vmem:[#allocation3 + $0x128] sm:$0xff]  ;;  %v9800_v63 = vld [vmem:[#allocation3 + $0x120] sm:$0xff] }
 0x2b3   : > { %v2935_v45 = vadd.f32 %v7632_v38, %v2040_v59  ;;  %v3710_v34 = vrot.slane %v9798_v37, 1  ;;  %v3709_v3 = vrot.slane %v9800_v63, 1  ;;  %v3886_v58 = vrot.slane %v9798_v37, 2 }
 0x2b4   : > { %v2871_v25 = vpop.f32.mrf.mxu0  ;;  %v3885_v8 = vrot.slane %v9800_v63, 2 }
 0x2b5   : > { %v2973_v27 = vadd.f32 %v9451_v56, %v2935_v45  ;;  %v2934_v61 = vadd.f32 %v2871_v25, %v2035_v28  ;;  %v3713_v17 = vsel %vm493_vm5, %v3710_v34, %v3712_v30  ;;  %v3711_v39 = vsel %vm493_vm5, %v3709_v3, %v3710_v34 }
 0x2b6   : > { %3780 = vrot.lane.b32.xlu1 %v3713_v17, %s7845_s25  ;;  %3778 = vrot.lane.b32.xlu0 %v3711_v39, %s7845_s25  ;;  %v3889_v22 = vsel %vm670_vm4, %v3886_v58, %v3888_v12  ;;  %v3887_v33 = vsel %vm670_vm4, %v3885_v8, %v3886_v58 }
 0x2b7   : > { %v3005_v55 = vmax.f32 %v2973_v27, 0.0  ;;  %v2972_v14 = vadd.f32 %v9451_v56, %v2934_v61  ;;  %v7583_v13 = vpop.f32.mrf.mxu1 }
 0x2b8   : > { %v3751_v19 = vpop.permute.xlu0 %3750  ;;  %v3753_v48 = vpop.permute.xlu1 %3752  ;;  %v2050_v26 = vadd.f32 %v7583_v13, %v9416_v16  ;;  %v9839_v16 = vld [vmem:[%s11508_s2] ss:$0 sm:$0xff] }
 0x2b9   : > { %3038 = vst.msk [vmem:[#allocation3 + $0x141] sm:$0xff] %vm269_vm2, %v3005_v55  ;;  %v3004_v4 = vmax.f32 %v2972_v14, 0.0  ;;  %v4014_v56 = vsel %vm269_vm2, %v9606_v24, %v3751_v19  ;;  %v4015_v11 = vsel %vm269_vm2, %v9608_v49, %v3753_v48  ;;  %v2044_v41 = vpop.f32.mrf.mxu1 }
 0x2ba   : > { %3956 = vrot.lane.b32.xlu1 %v3889_v22, %s7847_s24  ;;  %3954 = vrot.lane.b32.xlu0 %v3887_v33, %s7847_s24  ;;  %v2045_v1 = vadd.f32 %v2044_v41, %v9422_v47 }
 0x2bb   : > { %3037 = vst.msk [vmem:[#allocation3 + $0x139] sm:$0xff] %vm269_vm2, %v3004_v4 }
 0x2bc   : > { %v3927_v46 = vpop.permute.xlu0 %3926  ;;  %v3929_v42 = vpop.permute.xlu1 %3928 }
 0x2bd   : > { %v4046_v40 = vsel %vm3525_vm10, %v4014_v56, %v3927_v46  ;;  %v4047_v54 = vsel %vm3525_vm10, %v4015_v11, %v3929_v42 }
 0x2be   : > { %7660 = vmatprep.mubr.msk.f32.mxu1 %vm4070_vm11, %v4046_v40 }
 0x2bf   : > { %7661 = vmatmul.mubr.msk.f32.gmra.mxu1 %vm4070_vm11, %v4047_v54 }
 0x2c0   : > { %v3596_v62 = vld [vmem:[#allocation3 + $0x148] sm:$0x3] }
 0x2c1   : > { %v3717_v21 = vrot.slane %v3596_v62, 1  ;;  %v3893_v34 = vrot.slane %v3596_v62, 2 }
 0x2c2   : > { %v7635_v24 = vpop.f32.mrf.mxu0  ;;  %v9828_v60 = vld [vmem:[#allocation3 + $0x140] sm:$0xff]  ;;  %v9830_v49 = vld [vmem:[#allocation3 + $0x138] sm:$0xff] }
 0x2c3   : > { %v2937_v23 = vadd.f32 %v7635_v24, %v2050_v26  ;;  %v3715_v44 = vrot.slane %v9828_v60, 1  ;;  %v3714_v51 = vrot.slane %v9830_v49, 1  ;;  %v3891_v20 = vrot.slane %v9828_v60, 2 }
 0x2c4   : > { %v2881_v6 = vpop.f32.mrf.mxu0  ;;  %v3890_v15 = vrot.slane %v9830_v49, 2 }
 0x2c5   : > { %v2975_v47 = vadd.f32 %v9839_v16, %v2937_v23  ;;  %v2936_v36 = vadd.f32 %v2881_v6, %v2045_v1  ;;  %v3718_v59 = vsel %vm493_vm5, %v3715_v44, %v3717_v21  ;;  %v3716_v28 = vsel %vm493_vm5, %v3714_v51, %v3715_v44 }
 0x2c6   : > { %3784 = vrot.lane.b32.xlu1 %v3718_v59, %s7845_s25  ;;  %3782 = vrot.lane.b32.xlu0 %v3716_v28, %s7845_s25  ;;  %v3894_v58 = vsel %vm670_vm4, %v3891_v20, %v3893_v34  ;;  %v3892_v8 = vsel %vm670_vm4, %v3890_v15, %v3891_v20 }
 0x2c7   : > { %v3007_v38 = vmax.f32 %v2975_v47, 0.0  ;;  %v2974_v45 = vadd.f32 %v9839_v16, %v2936_v36  ;;  %v7586_v27 = vpop.f32.mrf.mxu1 }
 0x2c8   : > { %v3755_v30 = vpop.permute.xlu0 %3754  ;;  %v3757_v3 = vpop.permute.xlu1 %3756  ;;  %v2060_v4 = vadd.f32 %v7586_v27, %v9426_v10 }
 0x2c9   : > { %3040 = vst.msk [vmem:[#allocation3 + $0x159] sm:$0xff] %vm269_vm2, %v3007_v38  ;;  %v3006_v25 = vmax.f32 %v2974_v45, 0.0  ;;  %v4016_v61 = vsel %vm269_vm2, %v9628_v31, %v3755_v30  ;;  %v4017_v17 = vsel %vm269_vm2, %v9630_v52, %v3757_v3  ;;  %v2054_v19 = vpop.f32.mrf.mxu1 }
 0x2ca   : > { %3960 = vrot.lane.b32.xlu1 %v3894_v58, %s7847_s24  ;;  %3958 = vrot.lane.b32.xlu0 %v3892_v8, %s7847_s24  ;;  %v2055_v22 = vadd.f32 %v2054_v19, %v9434_v29 }
 0x2cb   : > { %3039 = vst.msk [vmem:[#allocation3 + $0x151] sm:$0xff] %vm269_vm2, %v3006_v25 }
 0x2cc   : > { %v3931_v39 = vpop.permute.xlu0 %3930  ;;  %v3933_v55 = vpop.permute.xlu1 %3932 }
 0x2cd   : > { %v4048_v14 = vsel %vm3525_vm10, %v4016_v61, %v3931_v39  ;;  %v4049_v12 = vsel %vm3525_vm10, %v4017_v17, %v3933_v55 }
 0x2ce   : > { %7663 = vmatprep.mubr.msk.f32.mxu1 %vm4070_vm11, %v4048_v14 }
 0x2cf   : > { %7664 = vmatmul.mubr.msk.f32.gmra.mxu1 %vm4070_vm11, %v4049_v12 }
 0x2d0   : > { %v3599_v48 = vld [vmem:[#allocation3 + $0x160] sm:$0x3] }
 0x2d1   : > { %v3722_v11 = vrot.slane %v3599_v48, 1  ;;  %v3898_v24 = vrot.slane %v3599_v48, 2 }
 0x2d2   : > { %v7638_v31 = vpop.f32.mrf.mxu0  ;;  %v9863_v33 = vld [vmem:[#allocation3 + $0x158] sm:$0xff]  ;;  %v9865_v52 = vld [vmem:[#allocation3 + $0x150] sm:$0xff] }
 0x2d3   : > { %v2939_v13 = vadd.f32 %v7638_v31, %v2060_v4  ;;  %v3720_v56 = vrot.slane %v9863_v33, 1  ;;  %v3719_v46 = vrot.slane %v9865_v52, 1  ;;  %v3896_v40 = vrot.slane %v9863_v33, 2 }
 0x2d4   : > { %v2891_v42 = vpop.f32.mrf.mxu0  ;;  %v3895_v54 = vrot.slane %v9865_v52, 2 }
 0x2d5   : > { %v2977_v10 = vadd.f32 %v9839_v16, %v2939_v13  ;;  %v2938_v41 = vadd.f32 %v2891_v42, %v2055_v22  ;;  %v3723_v29 = vsel %vm493_vm5, %v3720_v56, %v3722_v11  ;;  %v3721_v62 = vsel %vm493_vm5, %v3719_v46, %v3720_v56 }
 0x2d6   : > { %3788 = vrot.lane.b32.xlu1 %v3723_v29, %s7845_s25  ;;  %3786 = vrot.lane.b32.xlu0 %v3721_v62, %s7845_s25  ;;  %v3899_v6 = vsel %vm670_vm4, %v3896_v40, %v3898_v24  ;;  %v3897_v20 = vsel %vm670_vm4, %v3895_v54, %v3896_v40  ;;  %v9917_v54 = vld [vmem:[#allocation3] sm:$0xff] }
 0x2d7   : > { %v3009_v26 = vmax.f32 %v2977_v10, 0.0  ;;  %v2976_v1 = vadd.f32 %v9839_v16, %v2938_v41  ;;  %v7589_v51 = vpop.f32.mrf.mxu1  ;;  %v9919_v10 = vld [vmem:[#allocation3 + $0x8] sm:$0xff] }
 0x2d8   : > { %v3759_v23 = vpop.permute.xlu0 %3758  ;;  %v3761_v44 = vpop.permute.xlu1 %3760  ;;  %v2070_v34 = vadd.f32 %v7589_v51, %v9436_v5  ;;  %v3142_v24 = vrot.slane %v9919_v10, 1  ;;  %v3047_v51 = vld [vmem:[#allocation3 + $0x10] sm:$0x3] }
 0x2d9   : > { %3042 = vst.msk [vmem:[#allocation3 + $0x171] sm:$0xff] %vm269_vm2, %v3009_v26  ;;  %v3008_v21 = vmax.f32 %v2976_v1, 0.0  ;;  %v4018_v15 = vsel %vm269_vm2, %v9650_v2, %v3759_v23  ;;  %v4019_v47 = vsel %vm269_vm2, %v9652_v43, %v3761_v44  ;;  %v2064_v28 = vpop.f32.mrf.mxu1  ;;  %v3141_v1 = vrot.slane %v9917_v54, 1 }
 0x2da   : > { %3964 = vrot.lane.b32.xlu1 %v3899_v6, %s7847_s24  ;;  %3962 = vrot.lane.b32.xlu0 %v3897_v20, %s7847_s24  ;;  %v2065_v3 = vadd.f32 %v2064_v28, %v9442_v18  ;;  %v387_v6 = vld [vmem:[%s11509_s3 + $0x8] sm:$0xff]  ;;  %v386_v28 = vld [vmem:[%s11509_s3] sm:$0xff] }
 0x2db   : > { %3041 = vst.msk [vmem:[#allocation3 + $0x169] sm:$0xff] %vm269_vm2, %v3008_v21 }
 0x2dc   : > { %v3935_v36 = vpop.permute.xlu0 %3934  ;;  %v3937_v59 = vpop.permute.xlu1 %3936 }
 0x2dd   : > { %v4050_v38 = vsel %vm3525_vm10, %v4018_v15, %v3935_v36  ;;  %v4051_v45 = vsel %vm3525_vm10, %v4019_v47, %v3937_v59  ;;  %v3144_v59 = vrot.slane %v3047_v51, 1 }
 0x2de   : > { %7666 = vmatprep.mubr.msk.f32.mxu1 %vm4070_vm11, %v4050_v38  ;;  %v3143_v38 = vsel %vm493_vm5, %v3141_v1, %v3142_v24  ;;  %v3050_v1 = vld [vmem:[#allocation3 + $0x28] sm:$0x3] }
 0x2df   : > { %v7641_v30 = vpop.f32.mrf.mxu0  ;;  %7667 = vmatmul.mubr.msk.f32.gmra.mxu1 %vm4070_vm11, %v4051_v45 }
 0x2e0   : > { %v2941_v2 = vadd.f32 %v7641_v30, %v2070_v34  ;;  %v3602_v25 = vld [vmem:[#allocation3 + $0x178] sm:$0x3]  ;;  %v3145_v34 = vsel %vm493_vm5, %v3142_v24, %v3144_v59  ;;  %v394_v30 = vld [vmem:[%s11509_s3 + $0x40] sm:$0xff] }
 0x2e1   : > { %v2901_v58 = vpop.f32.mrf.mxu0  ;;  %v3727_v5 = vrot.slane %v3602_v25, 1  ;;  %v3903_v22 = vrot.slane %v3602_v25, 2  ;;  %7750 = vmatprep.subr.mxu1 %v394_v30  ;;  %v10018_v59 = vld [vmem:[#allocation3 + $0x50] sm:$0xff] }
 0x2e2   : > { %v2979_v43 = vadd.f32 %v9839_v16, %v2941_v2  ;;  %v2940_v8 = vadd.f32 %v2901_v58, %v2065_v3  ;;  %v9894_v27 = vld [vmem:[#allocation3 + $0x170] sm:$0xff]  ;;  %v9896_v61 = vld [vmem:[#allocation3 + $0x168] sm:$0xff]  ;;  %v3318_v58 = vrot.slane %v9919_v10, 2  ;;  %7751 = vmatpush3.msra.mxu1 %v394_v30 }
 0x2e3   : > { %v3725_v17 = vrot.slane %v9894_v27, 1  ;;  %v3724_v39 = vrot.slane %v9896_v61, 1  ;;  %v3901_v19 = vrot.slane %v9894_v27, 2  ;;  %v3900_v48 = vrot.slane %v9896_v61, 2 }
 0x2e4   : > { %v3011_v55 = vmax.f32 %v2979_v43, 0.0  ;;  %v2978_v14 = vadd.f32 %v9839_v16, %v2940_v8  ;;  %v3320_v43 = vrot.slane %v3047_v51, 2  ;;  %v3317_v8 = vrot.slane %v9917_v54, 2 }
 0x2e5   : > { %v3728_v18 = vsel %vm493_vm5, %v3725_v17, %v3727_v5  ;;  %v3726_v12 = vsel %vm493_vm5, %v3724_v39, %v3725_v17  ;;  %v3904_v13 = vsel %vm670_vm4, %v3901_v19, %v3903_v22  ;;  %v3902_v56 = vsel %vm670_vm4, %v3900_v48, %v3901_v19  ;;  %v9961_v5 = vld [vmem:[#allocation3 + $0x38] sm:$0xff]  ;;  %v9963_v39 = vld [vmem:[#allocation3 + $0x30] sm:$0xff] }
 0x2e6   : > { %3044 = vst.msk [vmem:[#allocation3 + $0x189] sm:$0xff] %vm269_vm2, %v3011_v55  ;;  %v3010_v4 = vmax.f32 %v2978_v14, 0.0  ;;  %3792 = vrot.lane.b32.xlu1 %v3728_v18, %s7845_s25  ;;  %3790 = vrot.lane.b32.xlu0 %v3726_v12, %s7845_s25  ;;  %v393_v55 = vld [vmem:[%s11509_s3 + $0x38] sm:$0xff]  ;;  %v3321_v48 = vsel %vm670_vm4, %v3318_v58, %v3320_v43  ;;  %v3149_v51 = vrot.slane %v3050_v1, 1 }
 0x2e7   : > { %7752 = vmatprep.subr.mxu1 %v393_v55 }
 0x2e8   : > { %3043 = vst.msk [vmem:[#allocation3 + $0x181] sm:$0xff] %vm269_vm2, %v3010_v4  ;;  %v3763_v31 = vpop.permute.xlu0 %3762  ;;  %v3765_v16 = vpop.permute.xlu1 %3764  ;;  %v3319_v4 = vsel %vm670_vm4, %v3317_v8, %v3318_v58  ;;  %7753 = vmatpush3.msra.mxu1 %v393_v55  ;;  %v4719_v58 = vld [vmem:[#allocation3 + $0x58] sm:$0x3] }
 0x2e9   : > { %v4020_v11 = vsel %vm269_vm2, %v9676_v35, %v3763_v31  ;;  %v4021_v46 = vsel %vm269_vm2, %v9674_v32, %v3765_v16  ;;  %v388_v35 = vld [vmem:[%s11509_s3 + $0x10] sm:$0xff] }
 0x2ea   : > { %3968 = vrot.lane.b32.xlu1 %v3904_v13, %s7847_s24  ;;  %3966 = vrot.lane.b32.xlu0 %v3902_v56, %s7847_s24  ;;  %v4716_v16 = vld [vmem:[#allocation3 + $0x40] sm:$0x3]  ;;  %v9981_v13 = vld [vmem:[#allocation3 + $0x18] sm:$0xff] }
 0x2eb   : > { %7696 = vmatprep.subr.mxu0 %v388_v35  ;;  %v9983_v56 = vld [vmem:[#allocation3 + $0x20] sm:$0xff] }
 0x2ec   : > { %v3939_v42 = vpop.permute.xlu0 %3938  ;;  %v3941_v40 = vpop.permute.xlu1 %3940  ;;  %7697 = vmatpush3.msra.mxu0 %v388_v35  ;;  %v9999_v35 = vrot.slane %v9961_v5, 2 }
 0x2ed   : > { %v4052_v41 = vsel %vm3525_vm10, %v4020_v11, %v3939_v42  ;;  %v4053_v29 = vsel %vm3525_vm10, %v4021_v46, %v3941_v40  ;;  %v3605_v62 = vld [vmem:[#allocation3 + $0x190] sm:$0x3]  ;;  %7698 = vmatprep.subr.mxu0 %v387_v6  ;;  %v392_v11 = vld [vmem:[%s11509_s3 + $0x30] sm:$0xff]  ;;  %v4813_v46 = vrot.slane %v4716_v16, 1  ;;  %v3146_v42 = vrot.slane %v9981_v13, 1 }
 0x2ee   : > { %7669 = vmatprep.mubr.msk.f32.mxu1 %vm4070_vm11, %v4052_v41  ;;  %v3732_v44 = vrot.slane %v3605_v62, 1  ;;  %7699 = vmatpush3.msra.mxu0 %v387_v6  ;;  %v3908_v25 = vrot.slane %v3605_v62, 2  ;;  %v3147_v40 = vrot.slane %v9983_v56, 1  ;;  %v4986_v62 = vrot.slane %v9963_v39, 2 }
 0x2ef   : > { %7670 = vmatmul.mubr.msk.f32.gmra.mxu1 %vm4070_vm11, %v4053_v29  ;;  %v9928_v32 = vld [vmem:[#allocation3 + $0x188] sm:$0xff]  ;;  %v9930_v26 = vld [vmem:[#allocation3 + $0x180] sm:$0xff]  ;;  %7700 = vmatprep.subr.mxu0 %v386_v28  ;;  %v4989_v6 = vrot.slane %v4716_v16, 2  ;;  %v4994_v16 = vrot.slane %v4719_v58, 2 }
 0x2f0   : > { %v3730_v23 = vrot.slane %v9928_v32, 1  ;;  %v3729_v21 = vrot.slane %v9930_v26, 1  ;;  %v3905_v47 = vrot.slane %v9930_v26, 2  ;;  %v3906_v36 = vrot.slane %v9928_v32, 2  ;;  %7701 = vmatpush3.msra.mxu0 %v386_v28  ;;  %7754 = vmatprep.subr.mxu1 %v392_v11  ;;  %v10020_v28 = vld [vmem:[#allocation3 + $0x48] sm:$0xff] }
 0x2f1   : > { %7755 = vmatpush3.msra.mxu1 %v392_v11  ;;  %v3148_v24 = vsel %vm493_vm5, %v3146_v42, %v3147_v40  ;;  %v10056_v42 = vld [vmem:[#allocation3 + $0x60] sm:$0xff] }
 0x2f2   : > { %v3733_v20 = vsel %vm493_vm5, %v3730_v23, %v3732_v44  ;;  %v3731_v15 = vsel %vm493_vm5, %v3729_v21, %v3730_v23  ;;  %v3907_v45 = vsel %vm670_vm4, %v3905_v47, %v3906_v36  ;;  %v3909_v17 = vsel %vm670_vm4, %v3906_v36, %v3908_v25 }
 0x2f3   : > { %3796 = vrot.lane.b32.xlu1 %v3733_v20, %s7845_s25  ;;  %3794 = vrot.lane.b32.xlu0 %v3731_v15, %s7845_s25  ;;  %v10006_v23 = vsel %vm670_vm4, %v4986_v62, %v9999_v35  ;;  %v3150_v20 = vsel %vm493_vm5, %v3147_v40, %v3149_v51  ;;  %v4990_v15 = vsel %vm670_vm4, %v9999_v35, %v4989_v6  ;;  %v3323_v47 = vrot.slane %v9983_v56, 2 }
 0x2f4   : > { %v3322_v36 = vrot.slane %v9981_v13, 2 }
 0x2f6   : > { %v3324_v8 = vsel %vm670_vm4, %v3322_v36, %v3323_v47 }
 0x2f7   : > { %3221 = vrot.lane.b32.xlu1 %v3143_v38, %s7845_s25  ;;  %3970 = vrot.lane.b32.xlu0 %v3907_v45, %s7847_s24 }
 0x2f8   : > { %v3767_v3 = vpop.permute.xlu0 %3766  ;;  %v3769_v2 = vpop.permute.xlu1 %3768 }
 0x2f9   : > { %v4022_v14 = vsel %vm269_vm2, %v9710_v9, %v3767_v3  ;;  %v4023_v18 = vsel %vm269_vm2, %v9708_v57, %v3769_v2  ;;  %v9978_v9 = vrot.slane %v9961_v5, 1  ;;  %v4810_v57 = vrot.slane %v9963_v39, 1 }
 0x2fa   : > { %v3325_v3 = vrot.slane %v3050_v1, 2 }
 0x2fb   : > { %3223 = vrot.lane.b32.xlu1 %v3145_v34, %s7845_s25  ;;  %3972 = vrot.lane.b32.xlu0 %v3909_v17, %s7847_s24  ;;  %v4814_v41 = vsel %vm493_vm5, %v9978_v9, %v4813_v46  ;;  %v4812_v29 = vsel %vm493_vm5, %v4810_v57, %v9978_v9  ;;  %v4816_v17 = vrot.slane %v10018_v59, 1  ;;  %v10054_v46 = vld [vmem:[#allocation3 + $0x68] sm:$0xff] }
 0x2fc   : > { %v3943_v12 = vpop.permute.xlu0 %3942  ;;  %v3945_v19 = vpop.permute.xlu1 %3944  ;;  %v3326_v43 = vsel %vm670_vm4, %v3323_v47, %v3325_v3  ;;  %v4821_v51 = vrot.slane %v10054_v46, 1  ;;  %v3056_v47 = vld [vmem:[#allocation3 + $0x58] sm:$0x3] }
 0x2fd   : > { %v4054_v22 = vsel %vm3525_vm10, %v4022_v14, %v3943_v12  ;;  %v4055_v31 = vsel %vm3525_vm10, %v4023_v18, %v3945_v19  ;;  %v4991_v18 = vrot.slane %v10020_v28, 2  ;;  %v10040_v12 = vrot.slane %v10018_v59, 2  ;;  %v3053_v19 = vld [vmem:[#allocation3 + $0x40] sm:$0x3] }
 0x2fe   : > { %7672 = vmatprep.mubr.msk.f32.mxu1 %vm4070_vm11, %v4054_v22 }
 0x2ff   : > { %3399 = vrot.lane.b32.xlu1 %v3321_v48, %s7847_s24  ;;  %3397 = vrot.lane.b32.xlu0 %v3319_v4, %s7847_s24  ;;  %v4993_v48 = vsel %vm670_vm4, %v4991_v18, %v10040_v12  ;;  %v4995_v11 = vsel %vm670_vm4, %v10040_v12, %v4994_v16 }
 0x300   : > { %7673 = vmatmul.mubr.msk.f32.gmra.mxu1 %vm4070_vm11, %v4055_v31  ;;  %v3154_v31 = vrot.slane %v3053_v19, 1 }
 0x302   : > { %v3155_v57 = vsel %vm493_vm5, %v9978_v9, %v3154_v31  ;;  %v3330_v9 = vrot.slane %v3053_v19, 2 }
 0x303   : > { %4892 = vrot.lane.b32.xlu1 %v4814_v41, %s7845_s25  ;;  %4890 = vrot.lane.b32.xlu0 %v4812_v29, %s7845_s25 }
 0x307   : > { %3225 = vrot.lane.b32.xlu1 %v3148_v24, %s7845_s25  ;;  %5066 = vrot.lane.b32.xlu0 %v10006_v23, %s7847_s24 }
 0x308   : > { %v3771_v44 = vpop.permute.xlu0 %3770  ;;  %v3773_v21 = vpop.permute.xlu1 %3772 }
 0x309   : > { %v4024_v38 = vsel %vm269_vm2, %v9740_v53, %v3771_v44  ;;  %v4025_v45 = vsel %vm269_vm2, %v9738_v0, %v3773_v21  ;;  %v4815_v53 = vrot.slane %v10020_v28, 1  ;;  %v4818_v0 = vrot.slane %v4719_v58, 1  ;;  %v4722_v44 = vld [vmem:[#allocation3 + $0x70] sm:$0x3] }
 0x30a   : > { %v3331_v21 = vsel %vm670_vm4, %v9999_v35, %v3330_v9  ;;  %v10077_v35 = vrot.slane %v10054_v46, 2  ;;  %v10125_v9 = vld [vmem:[#allocation3 + $0x90] sm:$0xff] }
 0x30b   : > { %3227 = vrot.lane.b32.xlu1 %v3150_v20, %s7845_s25  ;;  %5068 = vrot.lane.b32.xlu0 %v4990_v15, %s7847_s24  ;;  %v4819_v55 = vsel %vm493_vm5, %v4816_v17, %v4818_v0  ;;  %v4817_v14 = vsel %vm493_vm5, %v4815_v53, %v4816_v17  ;;  %v4996_v15 = vrot.slane %v10056_v42, 2 }
 0x30c   : > { %v3947_v34 = vpop.permute.xlu0 %3946  ;;  %v3949_v30 = vpop.permute.xlu1 %3948 }
 0x30d   : > { %v4056_v2 = vsel %vm3525_vm10, %v4024_v38, %v3947_v34  ;;  %v4057_v25 = vsel %vm3525_vm10, %v4025_v45, %v3949_v30  ;;  %v3159_v45 = vrot.slane %v3056_v47, 1  ;;  %v4999_v34 = vrot.slane %v4722_v44, 2 }
 0x30e   : > { %7675 = vmatprep.mubr.msk.f32.mxu1 %vm4070_vm11, %v4056_v2  ;;  %v10090_v2 = vld [vmem:[#allocation3 + $0x80] sm:$0xff] }
 0x30f   : > { %3403 = vrot.lane.b32.xlu1 %v3326_v43, %s7847_s24  ;;  %3401 = vrot.lane.b32.xlu0 %v3324_v8, %s7847_s24  ;;  %v3160_v30 = vsel %vm493_vm5, %v4816_v17, %v3159_v45  ;;  %v5000_v3 = vsel %vm670_vm4, %v10077_v35, %v4999_v34  ;;  %v3335_v17 = vrot.slane %v3056_v47, 2  ;;  %v4826_v19 = vrot.slane %v10090_v2, 1 }
 0x310   : > { %7676 = vmatmul.mubr.msk.f32.gmra.mxu1 %vm4070_vm11, %v4057_v25  ;;  %v10092_v25 = vld [vmem:[#allocation3 + $0x78] sm:$0xff]  ;;  %v10112_v16 = vrot.slane %v10090_v2, 2  ;;  %v4830_v47 = vrot.slane %v10125_v9, 1  ;;  %v5006_v45 = vrot.slane %v10125_v9, 2 }
 0x311   : > { %v3336_v18 = vsel %vm670_vm4, %v10040_v12, %v3335_v17  ;;  %v5001_v31 = vrot.slane %v10092_v25, 2  ;;  %v3059_v12 = vld [vmem:[#allocation3 + $0x70] sm:$0x3]  ;;  %v10160_v17 = vld [vmem:[#allocation3 + $0xa8] sm:$0xff] }
 0x313   : > { %4896 = vrot.lane.b32.xlu1 %v4819_v55, %s7845_s25  ;;  %4894 = vrot.lane.b32.xlu0 %v4817_v14, %s7845_s25 }
 0x317   : > { %3229 = vrot.lane.b32.xlu1 %v4812_v29, %s7845_s25  ;;  %5070 = vrot.lane.b32.xlu0 %v4993_v48, %s7847_s24 }
 0x318   : > { %v3775_v4 = vpop.permute.xlu0 %3774  ;;  %v3777_v22 = vpop.permute.xlu1 %3776 }
 0x319   : > { %v4026_v40 = vsel %vm269_vm2, %v9770_v50, %v3775_v4  ;;  %v4027_v41 = vsel %vm269_vm2, %v9768_v7, %v3777_v22  ;;  %v4820_v50 = vrot.slane %v10056_v42, 1  ;;  %v4823_v7 = vrot.slane %v4722_v44, 1 }
 0x31b   : > { %3231 = vrot.lane.b32.xlu1 %v3155_v57, %s7845_s25  ;;  %5072 = vrot.lane.b32.xlu0 %v4995_v11, %s7847_s24  ;;  %v4824_v6 = vsel %vm493_vm5, %v4821_v51, %v4823_v7  ;;  %v4822_v20 = vsel %vm493_vm5, %v4820_v50, %v4821_v51 }
 0x31c   : > { %v3951_v29 = vpop.permute.xlu0 %3950  ;;  %v3953_v62 = vpop.permute.xlu1 %3952 }
 0x31d   : > { %v4058_v1 = vsel %vm3525_vm10, %v4026_v40, %v3951_v29  ;;  %v4059_v24 = vsel %vm3525_vm10, %v4027_v41, %v3953_v62  ;;  %v3164_v40 = vrot.slane %v3059_v12, 1 }
 0x31e   : > { %7678 = vmatprep.mubr.msk.f32.mxu1 %vm4070_vm11, %v4058_v1  ;;  %v10127_v1 = vld [vmem:[#allocation3 + $0x98] sm:$0xff] }
 0x31f   : > { %3407 = vrot.lane.b32.xlu1 %v3331_v21, %s7847_s24  ;;  %3405 = vrot.lane.b32.xlu0 %v10006_v23, %s7847_s24  ;;  %v4998_v23 = vsel %vm670_vm4, %v4996_v15, %v10077_v35  ;;  %v3165_v29 = vsel %vm493_vm5, %v4821_v51, %v3164_v40  ;;  %v3340_v51 = vrot.slane %v3059_v12, 2  ;;  %v10147_v34 = vrot.slane %v10127_v1, 2 }
 0x320   : > { %7679 = vmatmul.mubr.msk.f32.gmra.mxu1 %vm4070_vm11, %v4059_v24  ;;  %v4835_v12 = vrot.slane %v10160_v17, 1  ;;  %v5011_v40 = vrot.slane %v10160_v17, 2 }
 0x321   : > { %v3341_v15 = vsel %vm670_vm4, %v10077_v35, %v3340_v51  ;;  %v3062_v35 = vld [vmem:[#allocation3 + $0x88] sm:$0x3]  ;;  %v10198_v51 = vld [vmem:[#allocation3 + $0xc0] sm:$0xff] }
 0x323   : > { %4900 = vrot.lane.b32.xlu1 %v4824_v6, %s7845_s25  ;;  %4898 = vrot.lane.b32.xlu0 %v4822_v20, %s7845_s25 }
 0x327   : > { %3233 = vrot.lane.b32.xlu1 %v4817_v14, %s7845_s25  ;;  %5074 = vrot.lane.b32.xlu0 %v4998_v23, %s7847_s24  ;;  %v4725_v14 = vld [vmem:[#allocation3 + $0x88] sm:$0x3] }
 0x328   : > { %v3779_v36 = vpop.permute.xlu0 %3778  ;;  %v3781_v38 = vpop.permute.xlu1 %3780  ;;  %v5004_v41 = vrot.slane %v4725_v14, 2 }
 0x329   : > { %v4028_v58 = vsel %vm269_vm2, %v9800_v63, %v3779_v36  ;;  %v4029_v43 = vsel %vm269_vm2, %v9798_v37, %v3781_v38  ;;  %v4825_v63 = vrot.slane %v10092_v25, 1  ;;  %v4828_v37 = vrot.slane %v4725_v14, 1 }
 0x32a   : > { %v5005_v62 = vsel %vm670_vm4, %v10112_v16, %v5004_v41 }
 0x32b   : > { %3235 = vrot.lane.b32.xlu1 %v3160_v30, %s7845_s25  ;;  %5076 = vrot.lane.b32.xlu0 %v5000_v3, %s7847_s24  ;;  %v4829_v4 = vsel %vm493_vm5, %v4826_v19, %v4828_v37  ;;  %v4827_v22 = vsel %vm493_vm5, %v4825_v63, %v4826_v19  ;;  %v3345_v37 = vrot.slane %v3062_v35, 2 }
 0x32c   : > { %v3955_v8 = vpop.permute.xlu0 %3954  ;;  %v3957_v53 = vpop.permute.xlu1 %3956 }
 0x32d   : > { %v4060_v0 = vsel %vm3525_vm10, %v4028_v58, %v3955_v8  ;;  %v4061_v55 = vsel %vm3525_vm10, %v4029_v43, %v3957_v53  ;;  %v3169_v43 = vrot.slane %v3062_v35, 1  ;;  %v4840_v35 = vrot.slane %v10198_v51, 1 }
 0x32e   : > { %7681 = vmatprep.mubr.msk.f32.mxu1 %vm4070_vm11, %v4060_v0  ;;  %v10162_v0 = vld [vmem:[#allocation3 + $0xb0] sm:$0xff] }
 0x32f   : > { %3411 = vrot.lane.b32.xlu1 %v3336_v18, %s7847_s24  ;;  %3409 = vrot.lane.b32.xlu0 %v4993_v48, %s7847_s24  ;;  %v5003_v48 = vsel %vm670_vm4, %v5001_v31, %v10112_v16  ;;  %v3170_v53 = vsel %vm493_vm5, %v4826_v19, %v3169_v43  ;;  %v3346_v31 = vsel %vm670_vm4, %v10112_v16, %v3345_v37  ;;  %v10182_v41 = vrot.slane %v10162_v0, 2  ;;  %v3065_v16 = vld [vmem:[#allocation3 + $0xa0] sm:$0x3] }
 0x330   : > { %7682 = vmatmul.mubr.msk.f32.gmra.mxu1 %vm4070_vm11, %v4061_v55 }
 0x333   : > { %4904 = vrot.lane.b32.xlu1 %v4829_v4, %s7845_s25  ;;  %4902 = vrot.lane.b32.xlu0 %v4827_v22, %s7845_s25 }
 0x337   : > { %3237 = vrot.lane.b32.xlu1 %v4822_v20, %s7845_s25  ;;  %5078 = vrot.lane.b32.xlu0 %v5003_v48, %s7847_s24  ;;  %v4728_v20 = vld [vmem:[#allocation3 + $0xa0] sm:$0x3] }
 0x338   : > { %v3783_v57 = vpop.permute.xlu0 %3782  ;;  %v3785_v11 = vpop.permute.xlu1 %3784  ;;  %v5009_v58 = vrot.slane %v4728_v20, 2 }
 0x339   : > { %v4030_v24 = vsel %vm269_vm2, %v9830_v49, %v3783_v57  ;;  %v4031_v44 = vsel %vm269_vm2, %v9828_v60, %v3785_v11  ;;  %v4831_v49 = vrot.slane %v10127_v1, 1  ;;  %v4833_v60 = vrot.slane %v4728_v20, 1 }
 0x33a   : > { %v5010_v8 = vsel %vm670_vm4, %v10147_v34, %v5009_v58 }
 0x33b   : > { %3239 = vrot.lane.b32.xlu1 %v3165_v29, %s7845_s25  ;;  %5080 = vrot.lane.b32.xlu0 %v5005_v62, %s7847_s24  ;;  %v4832_v36 = vsel %vm493_vm5, %v4830_v47, %v4831_v49  ;;  %v4834_v38 = vsel %vm493_vm5, %v4831_v49, %v4833_v60  ;;  %v3350_v60 = vrot.slane %v3065_v16, 2 }
 0x33c   : > { %v3959_v21 = vpop.permute.xlu0 %3958  ;;  %v3961_v50 = vpop.permute.xlu1 %3960 }
 0x33d   : > { %v4062_v7 = vsel %vm3525_vm10, %v4030_v24, %v3959_v21  ;;  %v4063_v6 = vsel %vm3525_vm10, %v4031_v44, %v3961_v50  ;;  %v3174_v44 = vrot.slane %v3065_v16, 1  ;;  %v4737_v16 = vld [vmem:[#allocation3 + $0xe8] sm:$0x3] }
 0x33e   : > { %7684 = vmatprep.mubr.msk.f32.mxu1 %vm4070_vm11, %v4062_v7  ;;  %v10200_v7 = vld [vmem:[#allocation3 + $0xc8] sm:$0xff] }
 0x33f   : > { %3413 = vrot.lane.b32.xlu0 %v4998_v23, %s7847_s24  ;;  %3415 = vrot.lane.b32.xlu1 %v3341_v15, %s7847_s24  ;;  %v5008_v23 = vsel %vm670_vm4, %v5006_v45, %v10147_v34  ;;  %v3175_v50 = vsel %vm493_vm5, %v4831_v49, %v3174_v44  ;;  %v3351_v45 = vsel %vm670_vm4, %v10147_v34, %v3350_v60  ;;  %v5016_v34 = vrot.slane %v10198_v51, 2 }
 0x340   : > { %7685 = vmatmul.mubr.msk.f32.gmra.mxu1 %vm4070_vm11, %v4063_v6  ;;  %v10224_v58 = vrot.slane %v10200_v7, 2 }
 0x343   : > { %4906 = vrot.lane.b32.xlu0 %v4832_v36, %s7845_s25  ;;  %4908 = vrot.lane.b32.xlu1 %v4834_v38, %s7845_s25  ;;  %v4734_v38 = vld [vmem:[#allocation3 + $0xd0] sm:$0x3] }
 0x347   : > { %5082 = vrot.lane.b32.xlu0 %v5008_v23, %s7847_s24  ;;  %3241 = vrot.lane.b32.xlu1 %v4827_v22, %s7845_s25  ;;  %v4731_v22 = vld [vmem:[#allocation3 + $0xb8] sm:$0x3] }
 0x348   : > { %v3787_v30 = vpop.permute.xlu0 %3786  ;;  %v3789_v3 = vpop.permute.xlu1 %3788  ;;  %v5014_v24 = vrot.slane %v4731_v22, 2 }
 0x349   : > { %v4032_v55 = vsel %vm269_vm2, %v9865_v52, %v3787_v30  ;;  %v4033_v14 = vsel %vm269_vm2, %v9863_v33, %v3789_v3  ;;  %v4836_v52 = vrot.slane %v10162_v0, 1  ;;  %v4838_v33 = vrot.slane %v4731_v22, 1 }
 0x34a   : > { %v5015_v21 = vsel %vm670_vm4, %v10182_v41, %v5014_v24 }
 0x34b   : > { %5084 = vrot.lane.b32.xlu0 %v5010_v8, %s7847_s24  ;;  %3243 = vrot.lane.b32.xlu1 %v3170_v53, %s7845_s25  ;;  %v4837_v57 = vsel %vm493_vm5, %v4835_v12, %v4836_v52  ;;  %v4839_v11 = vsel %vm493_vm5, %v4836_v52, %v4838_v33  ;;  %v3068_v8 = vld [vmem:[#allocation3 + $0xb8] sm:$0x3]  ;;  %v10230_v53 = vsel %vm670_vm4, %v5016_v34, %v10224_v58  ;;  %v10243_v12 = vld [vmem:[#allocation3 + $0xe0] sm:$0xff] }
 0x34c   : > { %v3963_v18 = vpop.permute.xlu0 %3962  ;;  %v3965_v63 = vpop.permute.xlu1 %3964 }
 0x34d   : > { %v4064_v4 = vsel %vm3525_vm10, %v4032_v55, %v3963_v18  ;;  %v4065_v19 = vsel %vm3525_vm10, %v4033_v14, %v3965_v63  ;;  %v5019_v55 = vrot.slane %v4734_v38, 2  ;;  %v3179_v14 = vrot.slane %v3068_v8, 1 }
 0x34e   : > { %7687 = vmatprep.mubr.msk.f32.mxu1 %vm4070_vm11, %v4064_v4 }
 0x34f   : > { %3417 = vrot.lane.b32.xlu0 %v5003_v48, %s7847_s24  ;;  %3419 = vrot.lane.b32.xlu1 %v3346_v31, %s7847_s24  ;;  %v10188_v48 = vsel %vm670_vm4, %v5011_v40, %v10182_v41  ;;  %v3180_v22 = vsel %vm493_vm5, %v4836_v52, %v3179_v14  ;;  %v10241_v31 = vld [vmem:[#allocation3 + $0xd8] sm:$0xff]  ;;  %v10252_v52 = vrot.slane %v10243_v12, 1 }
 0x350   : > { %7688 = vmatmul.mubr.msk.f32.gmra.mxu1 %vm4070_vm11, %v4065_v19  ;;  %v5020_v19 = vsel %vm670_vm4, %v10224_v58, %v5019_v55  ;;  %v4845_v40 = vrot.slane %v10241_v31, 1 }
 0x353   : > { %4910 = vrot.lane.b32.xlu0 %v4837_v57, %s7845_s25  ;;  %4912 = vrot.lane.b32.xlu1 %v4839_v11, %s7845_s25 }
 0x357   : > { %5086 = vrot.lane.b32.xlu0 %v10188_v48, %s7847_s24  ;;  %3245 = vrot.lane.b32.xlu1 %v4832_v36, %s7845_s25 }
 0x358   : > { %v3791_v29 = vpop.permute.xlu0 %3790  ;;  %v3793_v62 = vpop.permute.xlu1 %3792 }
 0x359   : > { %v4034_v6 = vsel %vm269_vm2, %v9896_v61, %v3791_v29  ;;  %v4035_v20 = vsel %vm269_vm2, %v9894_v27, %v3793_v62  ;;  %v10213_v61 = vrot.slane %v10200_v7, 1  ;;  %v4843_v27 = vrot.slane %v4734_v38, 1 }
 0x35b   : > { %5088 = vrot.lane.b32.xlu0 %v5015_v21, %s7847_s24  ;;  %3247 = vrot.lane.b32.xlu1 %v3175_v50, %s7845_s25  ;;  %v4842_v30 = vsel %vm493_vm5, %v4840_v35, %v10213_v61  ;;  %v4844_v3 = vsel %vm493_vm5, %v10213_v61, %v4843_v27  ;;  %v10265_v21 = vsel %vm493_vm5, %v4845_v40, %v10252_v52  ;;  %v5021_v50 = vrot.slane %v10241_v31, 2 }
 0x35c   : > { %v3967_v15 = vpop.permute.xlu0 %3966  ;;  %v3969_v47 = vpop.permute.xlu1 %3968 }
 0x35d   : > { %v4066_v36 = vsel %vm3525_vm10, %v4034_v6, %v3967_v15  ;;  %v4067_v49 = vsel %vm3525_vm10, %v4035_v20, %v3969_v47  ;;  %v10274_v15 = vrot.slane %v10243_v12, 2  ;;  %v3071_v47 = vld [vmem:[#allocation3 + $0xd0] sm:$0x3] }
 0x35e   : > { %7690 = vmatprep.mubr.msk.f32.mxu1 %vm4070_vm11, %v4066_v36  ;;  %v3184_v38 = vrot.slane %v3071_v47, 1 }
 0x35f   : > { %3421 = vrot.lane.b32.xlu0 %v5008_v23, %s7847_s24  ;;  %3423 = vrot.lane.b32.xlu1 %v3351_v45, %s7847_s24  ;;  %v10284_v36 = vsel %vm670_vm4, %v5021_v50, %v10274_v15 }
 0x360   : > { %7691 = vmatmul.mubr.msk.f32.gmra.mxu1 %vm4070_vm11, %v4067_v49  ;;  %v5024_v49 = vrot.slane %v4737_v16, 2 }
 0x362   : > { %v5025_v34 = vsel %vm670_vm4, %v10274_v15, %v5024_v49 }
 0x363   : > { %4914 = vrot.lane.b32.xlu0 %v4842_v30, %s7845_s25  ;;  %4916 = vrot.lane.b32.xlu1 %v4844_v3, %s7845_s25 }
 0x365   : > { %v3795_v23 = vpop.permute.xlu0 %3794  ;;  %v3797_v43 = vpop.permute.xlu1 %3796 }
 0x366   : > { %v4036_v18 = vsel %vm269_vm2, %v9930_v26, %v3795_v23  ;;  %v3355_v26 = vrot.slane %v3068_v8, 2  ;;  %v4037_v33 = vsel %vm269_vm2, %v9928_v32, %v3797_v43  ;;  %v4848_v32 = vrot.slane %v4737_v16, 1  ;;  %v10296_v43 = vld [vmem:[#allocation3 + $0xf0] sm:$0xff]  ;;  %v10298_v8 = vld [vmem:[#allocation3 + $0xf8] sm:$0xff] }
 0x367   : > { %5090 = vrot.lane.b32.xlu0 %v10230_v53, %s7847_s24  ;;  %3249 = vrot.lane.b32.xlu1 %v4837_v57, %s7845_s25  ;;  %v3185_v23 = vsel %vm493_vm5, %v10213_v61, %v3184_v38  ;;  %v4740_v61 = vld [vmem:[#allocation3 + $0x100] sm:$0x3] }
 0x368   : > { %v3356_v62 = vsel %vm670_vm4, %v10182_v41, %v3355_v26  ;;  %v4849_v20 = vsel %vm493_vm5, %v10252_v52, %v4848_v32 }
 0x369   : > { %v3971_v63 = vpop.permute.xlu0 %3970  ;;  %v3222_v37 = vpop.permute.xlu1 %3221 }
 0x36a   : > { %v4068_v4 = vsel %vm3525_vm10, %v4036_v18, %v3971_v63  ;;  %v3493_v24 = vsel %vm269_vm2, %v9917_v54, %v3222_v37  ;;  %v4850_v18 = vrot.slane %v10296_v43, 1  ;;  %v10307_v63 = vrot.slane %v10298_v8, 1 }
 0x36b   : > { %5092 = vrot.lane.b32.xlu0 %v5020_v19, %s7847_s24  ;;  %3251 = vrot.lane.b32.xlu1 %v3180_v22, %s7845_s25  ;;  %v4853_v22 = vrot.slane %v4740_v61, 1 }
 0x36c   : > { %7693 = vmatprep.mubr.msk.f32.mxu1 %vm4070_vm11, %v4068_v4 }
 0x36d   : > { %v3973_v57 = vpop.permute.xlu0 %3972  ;;  %v3224_v11 = vpop.permute.xlu1 %3223  ;;  %v4854_v16 = vsel %vm493_vm5, %v10307_v63, %v4853_v22 }
 0x36e   : > { %v4069_v29 = vsel %vm3525_vm10, %v4037_v33, %v3973_v57  ;;  %v3494_v41 = vsel %vm269_vm2, %v9919_v10, %v3224_v11  ;;  %v10320_v57 = vsel %vm493_vm5, %v4850_v18, %v10307_v63  ;;  %v5026_v11 = vrot.slane %v10296_v43, 2 }
 0x36f   : > { %3425 = vrot.lane.b32.xlu0 %v10188_v48, %s7847_s24  ;;  %3427 = vrot.lane.b32.xlu1 %v3356_v62, %s7847_s24  ;;  %v3074_v62 = vld [vmem:[#allocation3 + $0xe8] sm:$0x3] }
 0x370   : > { %7694 = vmatmul.mubr.msk.f32.gmra.mxu1 %vm4070_vm11, %v4069_v29  ;;  %v10329_v29 = vrot.slane %v10298_v8, 2  ;;  %v3189_v50 = vrot.slane %v3074_v62, 1 }
 0x371   : > { %v3398_v44 = vpop.permute.xlu0 %3397  ;;  %v3400_v6 = vpop.permute.xlu1 %3399 }
 0x372   : > { %v3526_v48 = vsel %vm3525_vm10, %v3493_v24, %v3398_v44  ;;  %v3527_v54 = vsel %vm3525_vm10, %v3494_v41, %v3400_v6  ;;  %v10339_v24 = vsel %vm670_vm4, %v5026_v11, %v10329_v29  ;;  %v5029_v44 = vrot.slane %v4740_v61, 2 }
 0x373   : > { %4918 = vrot.lane.b32.xlu0 %v10265_v21, %s7845_s25  ;;  %4920 = vrot.lane.b32.xlu1 %v4849_v20, %s7845_s25 }
 0x374   : > { %7702 = vmatprep.mubr.msk.f32.mxu0 %vm4070_vm11, %v3526_v48 }
 0x375   : > { %7703 = vmatmul.mubr.msk.f32.vlgmr.msra.gmra.mxu0 %vm4070_vm11, %v3527_v54  ;;  %v4891_v10 = vpop.permute.xlu0 %4890  ;;  %v4893_v60 = vpop.permute.xlu1 %4892  ;;  %v5030_v54 = vsel %vm670_vm4, %v10329_v29, %v5029_v44 }
 0x376   : > { %v5162_v45 = vsel %vm269_vm2, %v9963_v39, %v4891_v10  ;;  %v5163_v55 = vsel %vm269_vm2, %v9961_v5, %v4893_v60  ;;  %v3190_v10 = vsel %vm493_vm5, %v10252_v52, %v3189_v50  ;;  %v10354_v60 = vld [vmem:[#allocation3 + $0x110] sm:$0xff]  ;;  %v4743_v52 = vld [vmem:[#allocation3 + $0x118] sm:$0x3] }
 0x377   : > { %5094 = vrot.lane.b32.xlu0 %v10284_v36, %s7847_s24  ;;  %3253 = vrot.lane.b32.xlu1 %v4842_v30, %s7845_s25  ;;  %v3360_v30 = vrot.slane %v3071_v47, 2  ;;  %v10352_v47 = vld [vmem:[#allocation3 + $0x108] sm:$0xff] }
 0x378   : > { %v5031_v18 = vrot.slane %v10352_v47, 2 }
 0x379   : > { %v5067_v35 = vpop.permute.xlu0 %5066  ;;  %v3226_v3 = vpop.permute.xlu1 %3225  ;;  %v3361_v19 = vsel %vm670_vm4, %v10224_v58, %v3360_v30 }
 0x37a   : > { %v5194_v27 = vsel %vm3525_vm10, %v5162_v45, %v5067_v35  ;;  %v3495_v26 = vsel %vm269_vm2, %v9981_v13, %v3226_v3  ;;  %v4855_v45 = vrot.slane %v10352_v47, 1  ;;  %v10363_v35 = vrot.slane %v10354_v60, 1 }
 0x37b   : > { %5096 = vrot.lane.b32.xlu0 %v5025_v34, %s7847_s24  ;;  %3255 = vrot.lane.b32.xlu1 %v3185_v23, %s7845_s25  ;;  %v4858_v23 = vrot.slane %v4743_v52, 1 }
 0x37c   : > { %7756 = vmatprep.mubr.msk.f32.mxu1 %vm4070_vm11, %v5194_v27 }
 0x37d   : > { %v5069_v14 = vpop.permute.xlu0 %5068  ;;  %v3228_v4 = vpop.permute.xlu1 %3227 }
 0x37e   : > { %v5195_v37 = vsel %vm3525_vm10, %v5163_v55, %v5069_v14  ;;  %v3496_v58 = vsel %vm269_vm2, %v9983_v56, %v3228_v4  ;;  %v10376_v14 = vsel %vm493_vm5, %v4855_v45, %v10363_v35  ;;  %v10385_v4 = vrot.slane %v10354_v60, 2 }
 0x37f   : > { %3429 = vrot.lane.b32.xlu0 %v10230_v53, %s7847_s24  ;;  %3431 = vrot.lane.b32.xlu1 %v3361_v19, %s7847_s24  ;;  %v3077_v19 = vld [vmem:[#allocation3 + $0x100] sm:$0x3] }
 0x380   : > { %7757 = vmatmul.mubr.msk.f32.vlgmr.msra.gmra.mxu1 %vm4070_vm11, %v5195_v37  ;;  %v4859_v37 = vsel %vm493_vm5, %v10363_v35, %v4858_v23  ;;  %v3194_v11 = vrot.slane %v3077_v19, 1 }
 0x381   : > { %v3402_v33 = vpop.permute.xlu0 %3401  ;;  %v3404_v40 = vpop.permute.xlu1 %3403 }
 0x382   : > { %v3528_v53 = vsel %vm3525_vm10, %v3495_v26, %v3402_v33  ;;  %v3529_v13 = vsel %vm3525_vm10, %v3496_v58, %v3404_v40  ;;  %v10395_v26 = vsel %vm670_vm4, %v5031_v18, %v10385_v4  ;;  %v5034_v33 = vrot.slane %v4743_v52, 2 }
 0x383   : > { %4922 = vrot.lane.b32.xlu0 %v10320_v57, %s7845_s25  ;;  %4924 = vrot.lane.b32.xlu1 %v4854_v16, %s7845_s25 }
 0x384   : > { %7705 = vmatprep.mubr.msk.f32.mxu0 %vm4070_vm11, %v3528_v53 }
 0x385   : > { %7706 = vmatmul.mubr.msk.f32.gmra.mxu0 %vm4070_vm11, %v3529_v13  ;;  %v4895_v56 = vpop.permute.xlu0 %4894  ;;  %v4897_v32 = vpop.permute.xlu1 %4896  ;;  %v5035_v13 = vsel %vm670_vm4, %v10385_v4, %v5034_v33 }
 0x386   : > { %v5164_v41 = vsel %vm269_vm2, %v10020_v28, %v4895_v56  ;;  %v5165_v49 = vsel %vm269_vm2, %v10018_v59, %v4897_v32  ;;  %v3195_v56 = vsel %vm493_vm5, %v10307_v63, %v3194_v11  ;;  %v10410_v32 = vld [vmem:[#allocation3 + $0x128] sm:$0xff]  ;;  %v4746_v63 = vld [vmem:[#allocation3 + $0x130] sm:$0x3] }
 0x387   : > { %5098 = vrot.lane.b32.xlu0 %v10339_v24, %s7847_s24  ;;  %3257 = vrot.lane.b32.xlu1 %v10265_v21, %s7845_s25  ;;  %v3365_v21 = vrot.slane %v3074_v62, 2  ;;  %v10408_v62 = vld [vmem:[#allocation3 + $0x120] sm:$0xff] }
 0x388   : > { %v5036_v45 = vrot.slane %v10408_v62, 2 }
 0x389   : > { %v5071_v48 = vpop.permute.xlu0 %5070  ;;  %v3230_v20 = vpop.permute.xlu1 %3229  ;;  %v3366_v34 = vsel %vm670_vm4, %v10274_v15, %v3365_v21 }
 0x38a   : > { %v5196_v6 = vsel %vm3525_vm10, %v5164_v41, %v5071_v48  ;;  %v3497_v30 = vsel %vm269_vm2, %v9963_v39, %v3230_v20  ;;  %v4860_v41 = vrot.slane %v10408_v62, 1  ;;  %v10419_v48 = vrot.slane %v10410_v32, 1 }
 0x38b   : > { %5100 = vrot.lane.b32.xlu0 %v5030_v54, %s7847_s24  ;;  %3259 = vrot.lane.b32.xlu1 %v3190_v10, %s7845_s25  ;;  %v4863_v10 = vrot.slane %v4746_v63, 1 }
 0x38c   : > { %7759 = vmatprep.mubr.msk.f32.mxu1 %vm4070_vm11, %v5196_v6 }
 0x38d   : > { %v5073_v38 = vpop.permute.xlu0 %5072  ;;  %v3232_v3 = vpop.permute.xlu1 %3231 }
 0x38e   : > { %v5197_v27 = vsel %vm3525_vm10, %v5165_v49, %v5073_v38  ;;  %v3498_v15 = vsel %vm269_vm2, %v9961_v5, %v3232_v3  ;;  %v10432_v38 = vsel %vm493_vm5, %v4860_v41, %v10419_v48  ;;  %v10441_v3 = vrot.slane %v10410_v32, 2 }
 0x38f   : > { %3433 = vrot.lane.b32.xlu0 %v10284_v36, %s7847_s24  ;;  %3435 = vrot.lane.b32.xlu1 %v3366_v34, %s7847_s24  ;;  %v3080_v34 = vld [vmem:[#allocation3 + $0x118] sm:$0x3] }
 0x390   : > { %7760 = vmatmul.mubr.msk.f32.gmra.mxu1 %vm4070_vm11, %v5197_v27  ;;  %v4864_v27 = vsel %vm493_vm5, %v10419_v48, %v4863_v10  ;;  %v3199_v18 = vrot.slane %v3080_v34, 1 }
 0x391   : > { %v3406_v55 = vpop.permute.xlu0 %3405  ;;  %v3408_v61 = vpop.permute.xlu1 %3407 }
 0x392   : > { %v3530_v36 = vsel %vm3525_vm10, %v3497_v30, %v3406_v55  ;;  %v3531_v39 = vsel %vm3525_vm10, %v3498_v15, %v3408_v61  ;;  %v10451_v30 = vsel %vm670_vm4, %v5036_v45, %v10441_v3  ;;  %v5039_v55 = vrot.slane %v4746_v63, 2 }
 0x393   : > { %4926 = vrot.lane.b32.xlu0 %v10376_v14, %s7845_s25  ;;  %4928 = vrot.lane.b32.xlu1 %v4859_v37, %s7845_s25 }
 0x394   : > { %7708 = vmatprep.mubr.msk.f32.mxu0 %vm4070_vm11, %v3530_v36 }
 0x395   : > { %7709 = vmatmul.mubr.msk.f32.gmra.mxu0 %vm4070_vm11, %v3531_v39  ;;  %v4899_v5 = vpop.permute.xlu0 %4898  ;;  %v4901_v22 = vpop.permute.xlu1 %4900  ;;  %v5040_v39 = vsel %vm670_vm4, %v10441_v3, %v5039_v55 }
 0x396   : > { %v5166_v58 = vsel %vm269_vm2, %v10056_v42, %v4899_v5  ;;  %v5167_v44 = vsel %vm269_vm2, %v10054_v46, %v4901_v22  ;;  %v3200_v5 = vsel %vm493_vm5, %v10363_v35, %v3199_v18  ;;  %v10466_v22 = vld [vmem:[#allocation3 + $0x140] sm:$0xff]  ;;  %v4749_v35 = vld [vmem:[#allocation3 + $0x148] sm:$0x3] }
 0x397   : > { %5102 = vrot.lane.b32.xlu0 %v10395_v26, %s7847_s24  ;;  %3261 = vrot.lane.b32.xlu1 %v10320_v57, %s7845_s25  ;;  %v3370_v57 = vrot.slane %v3077_v19, 2  ;;  %v10464_v19 = vld [vmem:[#allocation3 + $0x138] sm:$0xff] }
 0x398   : > { %v5041_v41 = vrot.slane %v10464_v19, 2 }
 0x399   : > { %v5075_v53 = vpop.permute.xlu0 %5074  ;;  %v3234_v16 = vpop.permute.xlu1 %3233  ;;  %v3371_v54 = vsel %vm670_vm4, %v10329_v29, %v3370_v57 }
 0x39a   : > { %v5198_v40 = vsel %vm3525_vm10, %v5166_v58, %v5075_v53  ;;  %v3499_v21 = vsel %vm269_vm2, %v10020_v28, %v3234_v16  ;;  %v4865_v58 = vrot.slane %v10464_v19, 1  ;;  %v10475_v53 = vrot.slane %v10466_v22, 1 }
 0x39b   : > { %5104 = vrot.lane.b32.xlu0 %v5035_v13, %s7847_s24  ;;  %3263 = vrot.lane.b32.xlu1 %v3195_v56, %s7845_s25  ;;  %v4868_v56 = vrot.slane %v4749_v35, 1 }
 0x39c   : > { %7762 = vmatprep.mubr.msk.f32.mxu1 %vm4070_vm11, %v5198_v40 }
 0x39d   : > { %v5077_v50 = vpop.permute.xlu0 %5076  ;;  %v3236_v20 = vpop.permute.xlu1 %3235 }
 0x39e   : > { %v5199_v6 = vsel %vm3525_vm10, %v5167_v44, %v5077_v50  ;;  %v3500_v29 = vsel %vm269_vm2, %v10018_v59, %v3236_v20  ;;  %v10488_v50 = vsel %vm493_vm5, %v4865_v58, %v10475_v53  ;;  %v10497_v20 = vrot.slane %v10466_v22, 2 }
 0x39f   : > { %3437 = vrot.lane.b32.xlu0 %v10339_v24, %s7847_s24  ;;  %3439 = vrot.lane.b32.xlu1 %v3371_v54, %s7847_s24  ;;  %v3083_v54 = vld [vmem:[#allocation3 + $0x130] sm:$0x3] }
 0x3a0   : > { %7763 = vmatmul.mubr.msk.f32.gmra.mxu1 %vm4070_vm11, %v5199_v6  ;;  %v4869_v6 = vsel %vm493_vm5, %v10475_v53, %v4868_v56  ;;  %v3204_v45 = vrot.slane %v3083_v54, 1 }
 0x3a1   : > { %v3410_v49 = vpop.permute.xlu0 %3409  ;;  %v3412_v52 = vpop.permute.xlu1 %3411 }
 0x3a2   : > { %v3532_v24 = vsel %vm3525_vm10, %v3499_v21, %v3410_v49  ;;  %v3533_v28 = vsel %vm3525_vm10, %v3500_v29, %v3412_v52  ;;  %v10507_v21 = vsel %vm670_vm4, %v5041_v41, %v10497_v20  ;;  %v5044_v49 = vrot.slane %v4749_v35, 2 }
 0x3a3   : > { %4930 = vrot.lane.b32.xlu0 %v10432_v38, %s7845_s25  ;;  %4932 = vrot.lane.b32.xlu1 %v4864_v27, %s7845_s25 }
 0x3a4   : > { %7711 = vmatprep.mubr.msk.f32.mxu0 %vm4070_vm11, %v3532_v24 }
 0x3a5   : > { %7712 = vmatmul.mubr.msk.f32.gmra.mxu0 %vm4070_vm11, %v3533_v28  ;;  %v4903_v59 = vpop.permute.xlu0 %4902  ;;  %v4905_v23 = vpop.permute.xlu1 %4904  ;;  %v5045_v28 = vsel %vm670_vm4, %v10497_v20, %v5044_v49  ;;  %v4755_v49 = vld [vmem:[#allocation3 + $0x178] sm:$0x3] }
 0x3a6   : > { %v5168_v15 = vsel %vm269_vm2, %v10092_v25, %v4903_v59  ;;  %v5169_v33 = vsel %vm269_vm2, %v10090_v2, %v4905_v23  ;;  %v3205_v59 = vsel %vm493_vm5, %v10419_v48, %v3204_v45  ;;  %v10522_v23 = vld [vmem:[#allocation3 + $0x158] sm:$0xff]  ;;  %v4752_v48 = vld [vmem:[#allocation3 + $0x160] sm:$0x3] }
 0x3a7   : > { %5106 = vrot.lane.b32.xlu0 %v10451_v30, %s7847_s24  ;;  %3265 = vrot.lane.b32.xlu1 %v10376_v14, %s7845_s25  ;;  %v3375_v14 = vrot.slane %v3080_v34, 2  ;;  %v10520_v34 = vld [vmem:[#allocation3 + $0x150] sm:$0xff] }
 0x3a8   : > { %v5046_v58 = vrot.slane %v10520_v34, 2 }
 0x3a9   : > { %v5079_v36 = vpop.permute.xlu0 %5078  ;;  %v3238_v37 = vpop.permute.xlu1 %3237  ;;  %v3376_v13 = vsel %vm670_vm4, %v10385_v4, %v3375_v14 }
 0x3aa   : > { %v5200_v61 = vsel %vm3525_vm10, %v5168_v15, %v5079_v36  ;;  %v3501_v57 = vsel %vm269_vm2, %v10056_v42, %v3238_v37  ;;  %v4870_v15 = vrot.slane %v10520_v34, 1  ;;  %v10531_v36 = vrot.slane %v10522_v23, 1 }
 0x3ab   : > { %5108 = vrot.lane.b32.xlu0 %v5040_v39, %s7847_s24  ;;  %3267 = vrot.lane.b32.xlu1 %v3200_v5, %s7845_s25  ;;  %v4873_v5 = vrot.slane %v4752_v48, 1 }
 0x3ac   : > { %7765 = vmatprep.mubr.msk.f32.mxu1 %vm4070_vm11, %v5200_v61 }
 0x3ad   : > { %v5081_v11 = vpop.permute.xlu0 %5080  ;;  %v3240_v16 = vpop.permute.xlu1 %3239 }
 0x3ae   : > { %v5201_v40 = vsel %vm3525_vm10, %v5169_v33, %v5081_v11  ;;  %v3502_v4 = vsel %vm269_vm2, %v10054_v46, %v3240_v16  ;;  %v10544_v11 = vsel %vm493_vm5, %v4870_v15, %v10531_v36  ;;  %v10553_v16 = vrot.slane %v10522_v23, 2 }
 0x3af   : > { %3441 = vrot.lane.b32.xlu0 %v10395_v26, %s7847_s24  ;;  %3443 = vrot.lane.b32.xlu1 %v3376_v13, %s7847_s24  ;;  %v3086_v13 = vld [vmem:[#allocation3 + $0x148] sm:$0x3] }
 0x3b0   : > { %7766 = vmatmul.mubr.msk.f32.gmra.mxu1 %vm4070_vm11, %v5201_v40  ;;  %v4874_v40 = vsel %vm493_vm5, %v10531_v36, %v4873_v5  ;;  %v3209_v41 = vrot.slane %v3086_v13, 1 }
 0x3b1   : > { %v3414_v44 = vpop.permute.xlu0 %3413  ;;  %v3416_v63 = vpop.permute.xlu1 %3415 }
 0x3b2   : > { %v3534_v26 = vsel %vm3525_vm10, %v3501_v57, %v3414_v44  ;;  %v3535_v42 = vsel %vm3525_vm10, %v3502_v4, %v3416_v63  ;;  %v10563_v57 = vsel %vm670_vm4, %v5046_v58, %v10553_v16  ;;  %v5049_v44 = vrot.slane %v4752_v48, 2 }
 0x3b3   : > { %4934 = vrot.lane.b32.xlu0 %v10488_v50, %s7845_s25  ;;  %4936 = vrot.lane.b32.xlu1 %v4869_v6, %s7845_s25 }
 0x3b4   : > { %7714 = vmatprep.mubr.msk.f32.mxu0 %vm4070_vm11, %v3534_v26 }
 0x3b5   : > { %7715 = vmatmul.mubr.msk.f32.gmra.mxu0 %vm4070_vm11, %v3535_v42  ;;  %v4907_v46 = vpop.permute.xlu0 %4906  ;;  %v4909_v10 = vpop.permute.xlu1 %4908  ;;  %v5050_v42 = vsel %vm670_vm4, %v10553_v16, %v5049_v44 }
 0x3b6   : > { %v5170_v29 = vsel %vm269_vm2, %v10125_v9, %v4907_v46  ;;  %v5171_v55 = vsel %vm269_vm2, %v10127_v1, %v4909_v10  ;;  %v3210_v46 = vsel %vm493_vm5, %v10475_v53, %v3209_v41  ;;  %v10578_v10 = vld [vmem:[#allocation3 + $0x170] sm:$0xff] }
 0x3b7   : > { %5110 = vrot.lane.b32.xlu0 %v10507_v21, %s7847_s24  ;;  %3269 = vrot.lane.b32.xlu1 %v10432_v38, %s7845_s25  ;;  %v3380_v38 = vrot.slane %v3083_v54, 2  ;;  %v10576_v54 = vld [vmem:[#allocation3 + $0x168] sm:$0xff]  ;;  %v10587_v53 = vrot.slane %v10578_v10, 1 }
 0x3b9   : > { %v5083_v24 = vpop.permute.xlu0 %5082  ;;  %v3242_v27 = vpop.permute.xlu1 %3241  ;;  %v3381_v39 = vsel %vm670_vm4, %v10441_v3, %v3380_v38 }
 0x3ba   : > { %v5202_v52 = vsel %vm3525_vm10, %v5170_v29, %v5083_v24  ;;  %v3503_v14 = vsel %vm269_vm2, %v10092_v25, %v3242_v27  ;;  %v4875_v24 = vrot.slane %v10576_v54, 1 }
 0x3bb   : > { %5112 = vrot.lane.b32.xlu0 %v5045_v28, %s7847_s24  ;;  %3271 = vrot.lane.b32.xlu1 %v3205_v59, %s7845_s25  ;;  %v4878_v59 = vrot.slane %v4755_v49, 1 }
 0x3bc   : > { %7768 = vmatprep.mubr.msk.f32.mxu1 %vm4070_vm11, %v5202_v52 }
 0x3bd   : > { %v5085_v18 = vpop.permute.xlu0 %5084  ;;  %v3244_v37 = vpop.permute.xlu1 %3243  ;;  %v4879_v15 = vsel %vm493_vm5, %v10587_v53, %v4878_v59  ;;  %v3092_v59 = vld [vmem:[#allocation3 + $0x178] sm:$0x3] }
 0x3be   : > { %v5203_v61 = vsel %vm3525_vm10, %v5171_v55, %v5085_v18  ;;  %v3504_v3 = vsel %vm269_vm2, %v10090_v2, %v3244_v37  ;;  %v10600_v18 = vsel %vm493_vm5, %v4875_v24, %v10587_v53  ;;  %v10609_v37 = vrot.slane %v10578_v10, 2 }
 0x3bf   : > { %3445 = vrot.lane.b32.xlu0 %v10451_v30, %s7847_s24  ;;  %3447 = vrot.lane.b32.xlu1 %v3381_v39, %s7847_s24  ;;  %v3089_v39 = vld [vmem:[#allocation3 + $0x160] sm:$0x3] }
 0x3c0   : > { %7769 = vmatmul.mubr.msk.f32.gmra.mxu1 %vm4070_vm11, %v5203_v61  ;;  %v5051_v61 = vrot.slane %v10576_v54, 2  ;;  %v3214_v58 = vrot.slane %v3089_v39, 1 }
 0x3c1   : > { %v3418_v33 = vpop.permute.xlu0 %3417  ;;  %v3420_v35 = vpop.permute.xlu1 %3419 }
 0x3c2   : > { %v3536_v30 = vsel %vm3525_vm10, %v3503_v14, %v3418_v33  ;;  %v3537_v25 = vsel %vm3525_vm10, %v3504_v3, %v3420_v35  ;;  %v10619_v14 = vsel %vm670_vm4, %v5051_v61, %v10609_v37  ;;  %v5054_v33 = vrot.slane %v4755_v49, 2 }
 0x3c3   : > { %4938 = vrot.lane.b32.xlu0 %v10544_v11, %s7845_s25  ;;  %4940 = vrot.lane.b32.xlu1 %v4874_v40, %s7845_s25 }
 0x3c4   : > { %7717 = vmatprep.mubr.msk.f32.mxu0 %vm4070_vm11, %v3536_v30 }
 0x3c5   : > { %7718 = vmatmul.mubr.msk.f32.gmra.mxu0 %vm4070_vm11, %v3537_v25  ;;  %v4911_v2 = vpop.permute.xlu0 %4910  ;;  %v4913_v56 = vpop.permute.xlu1 %4912  ;;  %v5055_v25 = vsel %vm670_vm4, %v10609_v37, %v5054_v33 }
 0x3c6   : > { %v5172_v4 = vsel %vm269_vm2, %v10160_v17, %v4911_v2  ;;  %v5173_v45 = vsel %vm269_vm2, %v10162_v0, %v4913_v56  ;;  %v3215_v2 = vsel %vm493_vm5, %v10531_v36, %v3214_v58  ;;  %v3390_v56 = vrot.slane %v3089_v39, 2 }
 0x3c7   : > { %5114 = vrot.lane.b32.xlu0 %v10563_v57, %s7847_s24  ;;  %3273 = vrot.lane.b32.xlu1 %v10488_v50, %s7845_s25  ;;  %v3385_v50 = vrot.slane %v3086_v13, 2  ;;  %v10636_v13 = vld [vmem:[#allocation3 + $0x188] sm:$0xff] }
 0x3c8   : > { %v3391_v36 = vsel %vm670_vm4, %v10553_v16, %v3390_v56  ;;  %v5057_v16 = vrot.slane %v10636_v13, 2 }
 0x3c9   : > { %v5087_v26 = vpop.permute.xlu0 %5086  ;;  %v3246_v6 = vpop.permute.xlu1 %3245  ;;  %v3386_v28 = vsel %vm670_vm4, %v10497_v20, %v3385_v50 }
 0x3ca   : > { %v5204_v63 = vsel %vm3525_vm10, %v5172_v4, %v5087_v26  ;;  %v3505_v38 = vsel %vm269_vm2, %v10125_v9, %v3246_v6  ;;  %v4758_v4 = vld [vmem:[#allocation3 + $0x190] sm:$0x3] }
 0x3cb   : > { %5116 = vrot.lane.b32.xlu0 %v5050_v42, %s7847_s24  ;;  %3275 = vrot.lane.b32.xlu1 %v3210_v46, %s7845_s25  ;;  %v4881_v42 = vrot.slane %v10636_v13, 1  ;;  %v4883_v46 = vrot.slane %v4758_v4, 1 }
 0x3cc   : > { %7771 = vmatprep.mubr.msk.f32.mxu1 %vm4070_vm11, %v5204_v63 }
 0x3cd   : > { %v5089_v29 = vpop.permute.xlu0 %5088  ;;  %v3248_v27 = vpop.permute.xlu1 %3247 }
 0x3ce   : > { %v5205_v52 = vsel %vm3525_vm10, %v5173_v45, %v5089_v29  ;;  %v3506_v20 = vsel %vm269_vm2, %v10127_v1, %v3248_v27  ;;  %v4884_v27 = vsel %vm493_vm5, %v4881_v42, %v4883_v46 }
 0x3cf   : > { %3449 = vrot.lane.b32.xlu0 %v10507_v21, %s7847_s24  ;;  %3451 = vrot.lane.b32.xlu1 %v3386_v28, %s7847_s24 }
 0x3d0   : > { %7772 = vmatmul.mubr.msk.f32.gmra.mxu1 %vm4070_vm11, %v5205_v52 }
 0x3d1   : > { %v3422_v55 = vpop.permute.xlu0 %3421  ;;  %v3424_v48 = vpop.permute.xlu1 %3423 }
 0x3d2   : > { %v3538_v21 = vsel %vm3525_vm10, %v3505_v38, %v3422_v55  ;;  %v3539_v9 = vsel %vm3525_vm10, %v3506_v20, %v3424_v48  ;;  %v5059_v55 = vrot.slane %v4758_v4, 2  ;;  %v10668_v20 = vld [vmem:[#allocation3 + $0x198] sm:$0xff] }
 0x3d3   : > { %4942 = vrot.lane.b32.xlu0 %v10600_v18, %s7845_s25  ;;  %4944 = vrot.lane.b32.xlu1 %v4879_v15, %s7845_s25  ;;  %v3219_v15 = vrot.slane %v3092_v59, 1 }
 0x3d4   : > { %7720 = vmatprep.mubr.msk.f32.mxu0 %vm4070_vm11, %v3538_v21  ;;  %v10670_v21 = vld [vmem:[#allocation3 + $0x1a0] sm:$0xff] }
 0x3d5   : > { %7721 = vmatmul.mubr.msk.f32.gmra.mxu0 %vm4070_vm11, %v3539_v9  ;;  %v4915_v1 = vpop.permute.xlu0 %4914  ;;  %v4917_v5 = vpop.permute.xlu1 %4916  ;;  %v4761_v9 = vld [vmem:[#allocation3 + $0x1a8] sm:$0x3]  ;;  %v3220_v33 = vsel %vm493_vm5, %v10587_v53, %v3219_v15  ;;  %v4886_v58 = vrot.slane %v10670_v21, 1  ;;  %v5062_v4 = vrot.slane %v10670_v21, 2 }
 0x3d6   : > { %v5174_v3 = vsel %vm269_vm2, %v10198_v51, %v4915_v1  ;;  %v5175_v44 = vsel %vm269_vm2, %v10200_v7, %v4917_v5  ;;  %v5060_v5 = vsel %vm670_vm4, %v5057_v16, %v5059_v55 }
 0x3d7   : > { %5118 = vrot.lane.b32.xlu0 %v10619_v14, %s7847_s24  ;;  %3277 = vrot.lane.b32.xlu1 %v10544_v11, %s7845_s25  ;;  %v10634_v11 = vld [vmem:[#allocation3 + $0x180] sm:$0xff] }
 0x3d8   : > { %v4880_v6 = vrot.slane %v10634_v11, 1  ;;  %v5056_v45 = vrot.slane %v10634_v11, 2 }
 0x3d9   : > { %v5091_v30 = vpop.permute.xlu0 %5090  ;;  %v3250_v40 = vpop.permute.xlu1 %3249 }
 0x3da   : > { %v5206_v35 = vsel %vm3525_vm10, %v5174_v3, %v5091_v30  ;;  %v3507_v50 = vsel %vm269_vm2, %v10160_v17, %v3250_v40  ;;  %v5058_v38 = vsel %vm670_vm4, %v5056_v45, %v5057_v16  ;;  %v3395_v3 = vrot.slane %v3092_v59, 2 }
 0x3db   : > { %5120 = vrot.lane.b32.xlu0 %v5055_v25, %s7847_s24  ;;  %3279 = vrot.lane.b32.xlu1 %v3215_v2, %s7845_s25  ;;  %v4888_v30 = vrot.slane %v4761_v9, 1 }
 0x3dc   : > { %7774 = vmatprep.mubr.msk.f32.mxu1 %vm4070_vm11, %v5206_v35  ;;  %v3396_v53 = vsel %vm670_vm4, %v10609_v37, %v3395_v3 }
 0x3dd   : > { %v5093_v41 = vpop.permute.xlu0 %5092  ;;  %v3252_v63 = vpop.permute.xlu1 %3251 }
 0x3de   : > { %v5207_v26 = vsel %vm3525_vm10, %v5175_v44, %v5093_v41  ;;  %v3508_v29 = vsel %vm269_vm2, %v10162_v0, %v3252_v63  ;;  %v4889_v44 = vsel %vm493_vm5, %v4886_v58, %v4888_v30  ;;  %v5061_v41 = vrot.slane %v10668_v20, 2 }
 0x3df   : > { %3453 = vrot.lane.b32.xlu0 %v10563_v57, %s7847_s24  ;;  %3455 = vrot.lane.b32.xlu1 %v3391_v36, %s7847_s24  ;;  %v4882_v57 = vsel %vm493_vm5, %v4880_v6, %v4881_v42 }
 0x3e0   : > { %7775 = vmatmul.mubr.msk.f32.gmra.mxu1 %vm4070_vm11, %v5207_v26  ;;  %v5064_v26 = vrot.slane %v4761_v9, 2  ;;  %v5063_v46 = vsel %vm670_vm4, %v5061_v41, %v5062_v4 }
 0x3e1   : > { %v3426_v49 = vpop.permute.xlu0 %3425  ;;  %v3428_v52 = vpop.permute.xlu1 %3427 }
 0x3e2   : > { %v3540_v24 = vsel %vm3525_vm10, %v3507_v50, %v3426_v49  ;;  %v3541_v28 = vsel %vm3525_vm10, %v3508_v29, %v3428_v52  ;;  %v5065_v50 = vsel %vm670_vm4, %v5062_v4, %v5064_v26  ;;  %vm6942_vm4 = vcmask 457728  }
 0x3e3   : > { %4946 = vrot.lane.b32.xlu0 %v4882_v57, %s7845_s25  ;;  %4948 = vrot.lane.b32.xlu1 %v4884_v27, %s7845_s25 }
 0x3e4   : > { %7723 = vmatprep.mubr.msk.f32.mxu0 %vm4070_vm11, %v3540_v24 }
 0x3e5   : > { %7724 = vmatmul.mubr.msk.f32.gmra.mxu0 %vm4070_vm11, %v3541_v28  ;;  %v4919_v17 = vpop.permute.xlu0 %4918  ;;  %v4921_v0 = vpop.permute.xlu1 %4920 }
 0x3e6   : > { %v5176_v48 = vsel %vm269_vm2, %v10241_v31, %v4919_v17  ;;  %v5177_v35 = vsel %vm269_vm2, %v10243_v12, %v4921_v0 }
 0x3e7   : > { %5122 = vrot.lane.b32.xlu0 %v5058_v38, %s7847_s24  ;;  %3281 = vrot.lane.b32.xlu1 %v10600_v18, %s7845_s25  ;;  %v4885_v18 = vrot.slane %v10668_v20, 1 }
 0x3e9   : > { %v5095_v61 = vpop.permute.xlu0 %5094  ;;  %v3254_v39 = vpop.permute.xlu1 %3253  ;;  %v4887_v56 = vsel %vm493_vm5, %v4885_v18, %v4886_v58  ;;  %vm6944_vm5 = vcmask 523264  }
 0x3ea   : > { %v5208_v1 = vsel %vm3525_vm10, %v5176_v48, %v5095_v61  ;;  %v3509_v63 = vsel %vm269_vm2, %v10198_v51, %v3254_v39 }
 0x3eb   : > { %5124 = vrot.lane.b32.xlu0 %v5060_v5, %s7847_s24  ;;  %3283 = vrot.lane.b32.xlu1 %v3220_v33, %s7845_s25 }
 0x3ec   : > { %7777 = vmatprep.mubr.msk.f32.mxu1 %vm4070_vm11, %v5208_v1 }
 0x3ed   : > { %v5097_v40 = vpop.permute.xlu0 %5096  ;;  %v3256_v2 = vpop.permute.xlu1 %3255 }
 0x3ee   : > { %v5209_v25 = vsel %vm3525_vm10, %v5177_v35, %v5097_v40 }
 0x3ef   : > { %3457 = vrot.lane.b32.xlu0 %v10619_v14, %s7847_s24  ;;  %3459 = vrot.lane.b32.xlu1 %v3396_v53, %s7847_s24  ;;  %v3510_v14 = vsel %vm269_vm2, %v10200_v7, %v3256_v2  ;;  %v10742_v53 = vpop.f32.mrf.mxu1 }
 0x3f0   : > { %7778 = vmatmul.mubr.msk.f32.gmra.mxu1 %vm4070_vm11, %v5209_v25 }
 0x3f1   : > { %v3430_v37 = vpop.permute.xlu0 %3429  ;;  %v3432_v6 = vpop.permute.xlu1 %3431 }
 0x3f2   : > { %v3542_v36 = vsel %vm3525_vm10, %v3509_v63, %v3430_v37  ;;  %v3543_v42 = vsel %vm3525_vm10, %v3510_v14, %v3432_v6  ;;  %v10747_v41 = vpop.f32.mrf.mxu1 }
 0x3f3   : > { %4950 = vrot.lane.b32.xlu0 %v4887_v56, %s7845_s25  ;;  %4952 = vrot.lane.b32.xlu1 %v4889_v44, %s7845_s25 }
 0x3f4   : > { %7726 = vmatprep.mubr.msk.f32.mxu0 %vm4070_vm11, %v3542_v36  ;;  %v10750_v4 = vpop.f32.mrf.mxu1 }
 0x3f5   : > { %7727 = vmatmul.mubr.msk.f32.gmra.mxu0 %vm4070_vm11, %v3543_v42  ;;  %v4923_v51 = vpop.permute.xlu0 %4922  ;;  %v4925_v49 = vpop.permute.xlu1 %4924 }
 0x3f6   : > { %v5178_v7 = vsel %vm269_vm2, %v10296_v43, %v4923_v51  ;;  %v5179_v24 = vsel %vm269_vm2, %v10298_v8, %v4925_v49  ;;  %v10756_v36 = vpop.f32.mrf.mxu1 }
 0x3f7   : > { %5126 = vrot.lane.b32.xlu0 %v5063_v46, %s7847_s24  ;;  %5128 = vrot.lane.b32.xlu1 %v5065_v50, %s7847_s24 }
 0x3f8   : > { %v10763_v49 = vpop.f32.mrf.mxu1 }
 0x3f9   : > { %v5099_v45 = vpop.permute.xlu0 %5098  ;;  %v3258_v29 = vpop.permute.xlu1 %3257 }
 0x3fa   : > { %v5210_v16 = vsel %vm3525_vm10, %v5178_v7, %v5099_v45  ;;  %v3511_v28 = vsel %vm269_vm2, %v10241_v31, %v3258_v29  ;;  %v10768_v29 = vpop.f32.mrf.mxu1 }
 0x3fb   : > { %7780 = vmatprep.mubr.msk.f32.mxu1 %vm4070_vm11, %v5210_v16 }
 0x3fd   : > { %v5101_v52 = vpop.permute.xlu0 %5100  ;;  %v3260_v27 = vpop.permute.xlu1 %3259 }
 0x3fe   : > { %v5211_v57 = vsel %vm3525_vm10, %v5179_v24, %v5101_v52  ;;  %v3512_v59 = vsel %vm269_vm2, %v10243_v12, %v3260_v27 }
 0x3ff   : > { %7781 = vmatmul.mubr.msk.f32.gmra.mxu1 %vm4070_vm11, %v5211_v57 }
 0x401   : > { %v3434_v17 = vpop.permute.xlu0 %3433  ;;  %v3436_v38 = vpop.permute.xlu1 %3435 }
 0x402   : > { %v3544_v0 = vsel %vm3525_vm10, %v3511_v28, %v3434_v17  ;;  %v3545_v55 = vsel %vm3525_vm10, %v3512_v59, %v3436_v38 }
 0x403   : > { %7729 = vmatprep.mubr.msk.f32.mxu0 %vm4070_vm11, %v3544_v0 }
 0x404   : > { %7730 = vmatmul.mubr.msk.f32.gmra.mxu0 %vm4070_vm11, %v3545_v55 }
 0x405   : > { %v4927_v15 = vpop.permute.xlu0 %4926  ;;  %v4929_v48 = vpop.permute.xlu1 %4928 }
 0x406   : > { %v5180_v61 = vsel %vm269_vm2, %v10352_v47, %v4927_v15  ;;  %v5181_v12 = vsel %vm269_vm2, %v10354_v60, %v4929_v48 }
 0x409   : > { %v5103_v9 = vpop.permute.xlu0 %5102  ;;  %v3262_v1 = vpop.permute.xlu1 %3261 }
 0x40a   : > { %v5212_v31 = vsel %vm3525_vm10, %v5180_v61, %v5103_v9  ;;  %v3513_v18 = vsel %vm269_vm2, %v10296_v43, %v3262_v1 }
 0x40b   : > { %7783 = vmatprep.mubr.msk.f32.mxu1 %vm4070_vm11, %v5212_v31 }
 0x40d   : > { %v5105_v39 = vpop.permute.xlu0 %5104  ;;  %v3264_v33 = vpop.permute.xlu1 %3263 }
 0x40e   : > { %v5213_v5 = vsel %vm3525_vm10, %v5181_v12, %v5105_v39  ;;  %v3514_v3 = vsel %vm269_vm2, %v10298_v8, %v3264_v33 }
 0x40f   : > { %7784 = vmatmul.mubr.msk.f32.gmra.mxu1 %vm4070_vm11, %v5213_v5 }
 0x411   : > { %v3438_v58 = vpop.permute.xlu0 %3437  ;;  %v3440_v35 = vpop.permute.xlu1 %3439 }
 0x412   : > { %v3546_v30 = vsel %vm3525_vm10, %v3513_v18, %v3438_v58  ;;  %v3547_v40 = vsel %vm3525_vm10, %v3514_v3, %v3440_v35 }
 0x413   : > { %7732 = vmatprep.mubr.msk.f32.mxu0 %vm4070_vm11, %v3546_v30 }
 0x414   : > { %7733 = vmatmul.mubr.msk.f32.gmra.mxu0 %vm4070_vm11, %v3547_v40 }
 0x415   : > { %v4931_v25 = vpop.permute.xlu0 %4930  ;;  %v4933_v2 = vpop.permute.xlu1 %4932 }
 0x416   : > { %v5182_v43 = vsel %vm269_vm2, %v10408_v62, %v4931_v25  ;;  %v5183_v26 = vsel %vm269_vm2, %v10410_v32, %v4933_v2 }
 0x419   : > { %v5107_v56 = vpop.permute.xlu0 %5106  ;;  %v3266_v8 = vpop.permute.xlu1 %3265 }
 0x41a   : > { %v5214_v44 = vsel %vm3525_vm10, %v5182_v43, %v5107_v56  ;;  %v3515_v6 = vsel %vm269_vm2, %v10352_v47, %v3266_v8  ;;  %v10770_v47 = vpop.f32.mrf.mxu1 }
 0x41b   : > { %7786 = vmatprep.mubr.msk.f32.mxu1 %vm4070_vm11, %v5214_v44 }
 0x41c   : > { %v10776_v27 = vpop.f32.mrf.mxu1 }
 0x41d   : > { %v5109_v63 = vpop.permute.xlu0 %5108  ;;  %v3268_v14 = vpop.permute.xlu1 %3267 }
 0x41e   : > { %v5215_v37 = vsel %vm3525_vm10, %v5183_v26, %v5109_v63  ;;  %v3516_v46 = vsel %vm269_vm2, %v10354_v60, %v3268_v14  ;;  %v10781_v38 = vpop.f32.mrf.mxu1 }
 0x41f   : > { %7787 = vmatmul.mubr.msk.f32.gmra.mxu1 %vm4070_vm11, %v5215_v37 }
 0x420   : > { %v10789_v31 = vpop.f32.mrf.mxu1 }
 0x421   : > { %v3442_v42 = vpop.permute.xlu0 %3441  ;;  %v3444_v51 = vpop.permute.xlu1 %3443 }
 0x422   : > { %v3548_v50 = vsel %vm3525_vm10, %v3515_v6, %v3442_v42  ;;  %v3549_v7 = vsel %vm3525_vm10, %v3516_v46, %v3444_v51  ;;  %v10794_v12 = vpop.f32.mrf.mxu1 }
 0x423   : > { %7735 = vmatprep.mubr.msk.f32.mxu0 %vm4070_vm11, %v3548_v50 }
 0x424   : > { %7736 = vmatmul.mubr.msk.f32.gmra.mxu0 %vm4070_vm11, %v3549_v7 }
 0x425   : > { %v4935_v45 = vpop.permute.xlu0 %4934  ;;  %v4937_v16 = vpop.permute.xlu1 %4936 }
 0x426   : > { %v5184_v60 = vsel %vm269_vm2, %v10464_v19, %v4935_v45  ;;  %v5185_v28 = vsel %vm269_vm2, %v10466_v22, %v4937_v16 }
 0x429   : > { %v5111_v24 = vpop.permute.xlu0 %5110  ;;  %v3270_v57 = vpop.permute.xlu1 %3269 }
 0x42a   : > { %v5216_v52 = vsel %vm3525_vm10, %v5184_v60, %v5111_v24  ;;  %v3517_v55 = vsel %vm269_vm2, %v10408_v62, %v3270_v57  ;;  %v10796_v62 = vpop.f32.mrf.mxu1 }
 0x42b   : > { %7789 = vmatprep.mubr.msk.f32.mxu1 %vm4070_vm11, %v5216_v52 }
 0x42c   : > { %v10801_v3 = vpop.f32.mrf.mxu1 }
 0x42d   : > { %v5113_v17 = vpop.permute.xlu0 %5112  ;;  %v3272_v0 = vpop.permute.xlu1 %3271 }
 0x42e   : > { %v5217_v59 = vsel %vm3525_vm10, %v5185_v28, %v5113_v17  ;;  %v3518_v48 = vsel %vm269_vm2, %v10410_v32, %v3272_v0  ;;  %v10807_v2 = vpop.f32.mrf.mxu1 }
 0x42f   : > { %7790 = vmatmul.mubr.msk.f32.gmra.mxu1 %vm4070_vm11, %v5217_v59 }
 0x430   : > { %v10810_v43 = vpop.f32.mrf.mxu1 }
 0x431   : > { %v3446_v15 = vpop.permute.xlu0 %3445  ;;  %v3448_v9 = vpop.permute.xlu1 %3447 }
 0x432   : > { %v3550_v61 = vsel %vm3525_vm10, %v3517_v55, %v3446_v15  ;;  %v3551_v1 = vsel %vm3525_vm10, %v3518_v48, %v3448_v9  ;;  %v10820_v14 = vpop.f32.mrf.mxu1 }
 0x433   : > { %7738 = vmatprep.mubr.msk.f32.mxu0 %vm4070_vm11, %v3550_v61 }
 0x434   : > { %7739 = vmatmul.mubr.msk.f32.gmra.mxu0 %vm4070_vm11, %v3551_v1  ;;  %v10822_v46 = vpop.f32.mrf.mxu1 }
 0x435   : > { %v4939_v39 = vpop.permute.xlu0 %4938  ;;  %v4941_v5 = vpop.permute.xlu1 %4940 }
 0x436   : > { %v5186_v32 = vsel %vm269_vm2, %v10520_v34, %v4939_v39  ;;  %v5187_v30 = vsel %vm269_vm2, %v10522_v23, %v4941_v5  ;;  %v10827_v7 = vpop.f32.mrf.mxu1 }
 0x438   : > { %v10830_v45 = vpop.f32.mrf.mxu1 }
 0x439   : > { %v5115_v33 = vpop.permute.xlu0 %5114  ;;  %v3274_v58 = vpop.permute.xlu1 %3273 }
 0x43a   : > { %v5218_v18 = vsel %vm3525_vm10, %v5186_v32, %v5115_v33  ;;  %v3519_v56 = vsel %vm269_vm2, %v10464_v19, %v3274_v58  ;;  %v10836_v57 = vpop.f32.mrf.mxu1 }
 0x43b   : > { %7792 = vmatprep.mubr.msk.f32.mxu1 %vm4070_vm11, %v5218_v18 }
 0x43c   : > { %v10843_v15 = vpop.f32.mrf.mxu1 }
 0x43d   : > { %v5117_v35 = vpop.permute.xlu0 %5116  ;;  %v3276_v25 = vpop.permute.xlu1 %3275 }
 0x43e   : > { %v5219_v40 = vsel %vm3525_vm10, %v5187_v30, %v5117_v35  ;;  %v3520_v8 = vsel %vm269_vm2, %v10466_v22, %v3276_v25  ;;  %v10848_v1 = vpop.f32.mrf.mxu1 }
 0x43f   : > { %7793 = vmatmul.mubr.msk.f32.gmra.mxu1 %vm4070_vm11, %v5219_v40  ;;  %11553 = vst [vmem:[#allocation4_spill] sm:$0xff] %v10848_v1 }
 0x441   : > { %v3450_v44 = vpop.permute.xlu0 %3449  ;;  %v3452_v63 = vpop.permute.xlu1 %3451 }
 0x442   : > { %v3552_v26 = vsel %vm3525_vm10, %v3519_v56, %v3450_v44  ;;  %v3553_v37 = vsel %vm3525_vm10, %v3520_v8, %v3452_v63 }
 0x443   : > { %7741 = vmatprep.mubr.msk.f32.mxu0 %vm4070_vm11, %v3552_v26 }
 0x444   : > { %7742 = vmatmul.mubr.msk.f32.gmra.mxu0 %vm4070_vm11, %v3553_v37 }
 0x445   : > { %v4943_v6 = vpop.permute.xlu0 %4942  ;;  %v4945_v42 = vpop.permute.xlu1 %4944 }
 0x446   : > { %v5188_v19 = vsel %vm269_vm2, %v10576_v54, %v4943_v6  ;;  %v5189_v16 = vsel %vm269_vm2, %v10578_v10, %v4945_v42 }
 0x449   : > { %v5119_v50 = vpop.permute.xlu0 %5118  ;;  %v3278_v51 = vpop.permute.xlu1 %3277 }
 0x44a   : > { %v5220_v22 = vsel %vm3525_vm10, %v5188_v19, %v5119_v50  ;;  %v3521_v28 = vsel %vm269_vm2, %v10520_v34, %v3278_v51  ;;  %v10850_v34 = vpop.f32.mrf.mxu1 }
 0x44b   : > { %7795 = vmatprep.mubr.msk.f32.mxu1 %vm4070_vm11, %v5220_v22 }
 0x44c   : > { %v10856_v33 = vpop.f32.mrf.mxu1 }
 0x44d   : > { %v5121_v60 = vpop.permute.xlu0 %5120  ;;  %v3280_v52 = vpop.permute.xlu1 %3279  ;;  %11554 = vst [vmem:[#allocation5_spill] sm:$0xff] %v10856_v33 }
 0x44e   : > { %v5221_v24 = vsel %vm3525_vm10, %v5189_v16, %v5121_v60  ;;  %v3522_v59 = vsel %vm269_vm2, %v10522_v23, %v3280_v52  ;;  %v10861_v40 = vpop.f32.mrf.mxu1  ;;  %v10894_v52 = vpop.f32.mrf.mxu0 }
 0x44f   : > { %7796 = vmatmul.mubr.msk.f32.gmra.mxu1 %vm4070_vm11, %v5221_v24  ;;  %11555 = vst [vmem:[#allocation6_spill] sm:$0xff] %v10861_v40 }
 0x450   : > { %v10867_v8 = vpop.f32.mrf.mxu1 }
 0x451   : > { %v3454_v17 = vpop.permute.xlu0 %3453  ;;  %v3456_v55 = vpop.permute.xlu1 %3455  ;;  %11556 = vst [vmem:[#allocation7_spill] sm:$0xff] %v10867_v8 }
 0x452   : > { %v3554_v0 = vsel %vm3525_vm10, %v3521_v28, %v3454_v17  ;;  %v3555_v48 = vsel %vm3525_vm10, %v3522_v59, %v3456_v55  ;;  %v10873_v63 = vpop.f32.mrf.mxu1  ;;  %v4554_v28 = vpop.f32.mrf.mxu0 }
 0x453   : > { %7744 = vmatprep.mubr.msk.f32.mxu0 %vm4070_vm11, %v3554_v0  ;;  %11557 = vst [vmem:[#allocation8_spill] sm:$0xff] %v10873_v63 }
 0x454   : > { %7745 = vmatmul.mubr.msk.f32.gmra.mxu0 %vm4070_vm11, %v3555_v48  ;;  %v10898_v59 = vpop.f32.mrf.mxu0 }
 0x455   : > { %v4947_v61 = vpop.permute.xlu0 %4946  ;;  %v4949_v9 = vpop.permute.xlu1 %4948 }
 0x456   : > { %v5190_v23 = vsel %vm269_vm2, %v10634_v11, %v4947_v61  ;;  %v5191_v18 = vsel %vm269_vm2, %v10636_v13, %v4949_v9  ;;  %v4564_v55 = vpop.f32.mrf.mxu0 }
 0x458   : > { %v10902_v61 = vpop.f32.mrf.mxu0 }
 0x459   : > { %v5123_v39 = vpop.permute.xlu0 %5122  ;;  %v3282_v32 = vpop.permute.xlu1 %3281 }
 0x45a   : > { %v5222_v5 = vsel %vm3525_vm10, %v5190_v23, %v5123_v39  ;;  %v3523_v11 = vsel %vm269_vm2, %v10576_v54, %v3282_v32  ;;  %v10876_v54 = vpop.f32.mrf.mxu1  ;;  %v4574_v23 = vpop.f32.mrf.mxu0 }
 0x45b   : > { %7798 = vmatprep.mubr.msk.f32.mxu1 %vm4070_vm11, %v5222_v5  ;;  %11558 = vst [vmem:[#allocation9_spill] sm:$0xff] %v10876_v54 }
 0x45c   : > { %v10883_v51 = vpop.f32.mrf.mxu1 }
 0x45d   : > { %v5125_v58 = vpop.permute.xlu0 %5124  ;;  %v3284_v35 = vpop.permute.xlu1 %3283  ;;  %11559 = vst [vmem:[#allocation10_spill] sm:$0xff] %v10883_v51 }
 0x45e   : > { %v5223_v30 = vsel %vm3525_vm10, %v5191_v18, %v5125_v58  ;;  %v3524_v13 = vsel %vm269_vm2, %v10578_v10, %v3284_v35  ;;  %v10888_v60 = vpop.f32.mrf.mxu1 }
 0x45f   : > { %7799 = vmatmul.mubr.msk.f32.gmra.mxu1 %vm4070_vm11, %v5223_v30  ;;  %11560 = vst [vmem:[#allocation11_spill] sm:$0xff] %v10888_v60 }
 0x460   : > { %v10890_v24 = vpop.f32.mrf.mxu1 }
 0x461   : > { %v3458_v25 = vpop.permute.xlu0 %3457  ;;  %v3460_v44 = vpop.permute.xlu1 %3459  ;;  %11561 = vst [vmem:[#allocation12_spill] sm:$0xff] %v10890_v24 }
 0x462   : > { %v3556_v56 = vsel %vm3525_vm10, %v3523_v11, %v3458_v25  ;;  %v3557_v26 = vsel %vm3525_vm10, %v3524_v13, %v3460_v44 }
 0x463   : > { %7747 = vmatprep.mubr.msk.f32.mxu0 %vm4070_vm11, %v3556_v56 }
 0x464   : > { %7748 = vmatmul.mubr.msk.f32.gmra.mxu0 %vm4070_vm11, %v3557_v26 }
 0x465   : > { %v4951_v37 = vpop.permute.xlu0 %4950  ;;  %v4953_v6 = vpop.permute.xlu1 %4952 }
 0x466   : > { %v5192_v42 = vsel %vm269_vm2, %v10668_v20, %v4951_v37  ;;  %v5193_v50 = vsel %vm269_vm2, %v10670_v21, %v4953_v6  ;;  %v10892_v20 = vpop.f32.mrf.mxu1  ;;  %v10906_v5 = vpop.f32.mrf.mxu0  ;;  %v4565_v37 = vadd.f32 %v4564_v55, %v10756_v36  ;;  %v4575_v6 = vadd.f32 %v4574_v23, %v10768_v29 }
 0x467   : > { %11562 = vst [vmem:[#allocation13_spill] sm:$0xff] %v10892_v20  ;;  %v10926_v20 = vld [vmem:[%s11510_s4] ss:$0 sm:$0xff]  ;;  %v7848_v55 = vmov 1983009808  }
 0x468   : > { %v10896_v21 = vpop.f32.mrf.mxu1  ;;  %v4584_v18 = vpop.f32.mrf.mxu0  ;;  %v5683_v23 = vunpack.c.l.s4 %v7848_v55 }
 0x469   : > { %v5127_v19 = vpop.permute.xlu0 %5126  ;;  %v5129_v22 = vpop.permute.xlu1 %5128  ;;  %v4585_v13 = vadd.f32 %v4584_v18, %v10776_v27 }
 0x46a   : > { %v5224_v10 = vsel %vm3525_vm10, %v5192_v42, %v5127_v19  ;;  %v5225_v16 = vsel %vm3525_vm10, %v5193_v50, %v5129_v22  ;;  %v5388_v17 = vpop.f32.mrf.mxu1 }
 0x46b   : > { %7801 = vmatprep.mubr.msk.f32.mxu1 %vm4070_vm11, %v5224_v10  ;;  %v4555_v10 = vadd.f32 %v4554_v28, %v10747_v41 }
 0x46c   : > { %7802 = vmatmul.mubr.msk.f32.gmra.mxu1 %vm4070_vm11, %v5225_v16  ;;  %v10900_v0 = vpop.f32.mrf.mxu1 }
 0x46d   : > { %v5547_v24 = vadd.f32 %v5388_v17, %v4555_v10 }
 0x46e   : > { %v5398_v48 = vpop.f32.mrf.mxu1 }
 0x46f   : > { %v5549_v22 = vadd.f32 %v5398_v48, %v4565_v37  ;;  %v5585_v48 = vadd.f32 %v10926_v20, %v5547_v24 }
 0x470   : > { %v10904_v9 = vpop.f32.mrf.mxu1 }
 0x472   : > { %v5408_v39 = vpop.f32.mrf.mxu1 }
 0x473   : > { %v5551_v16 = vadd.f32 %v5408_v39, %v4575_v6  ;;  %v5617_v6 = vmax.f32 %v5585_v48, 0.0 }
 0x474   : > { %v10908_v32 = vpop.f32.mrf.mxu1 }
 0x475   : > { %v10910_v30 = vpop.f32.mrf.mxu0  ;;  %v5589_v41 = vadd.f32 %v10926_v20, %v5551_v16 }
 0x476   : > { %v5418_v58 = vpop.f32.mrf.mxu1 }
 0x477   : > { %v4594_v11 = vpop.f32.mrf.mxu0  ;;  %v5553_v42 = vadd.f32 %v5418_v58, %v4585_v13  ;;  %v5685_v58 = vlaneseq }
 0x478   : > { %v4595_v27 = vadd.f32 %v4594_v11, %v10789_v31  ;;  %v5684_v31 = vunpack.c.0.s8 %v5683_v23 }
 0x479   : > { %v5591_v36 = vadd.f32 %v10926_v20, %v5553_v42  ;;  %v10935_v11 = vshrl.u32 %v5685_v58, 7 }
 0x47b   : > { %v5623_v39 = vmax.f32 %v5591_v36, 0.0 }
 0x480   : > { %v10912_v35 = vpop.f32.mrf.mxu1 }
 0x482   : > { %v5428_v25 = vpop.f32.mrf.mxu1 }
 0x483   : > { %v5555_v29 = vadd.f32 %v5428_v25, %v4595_v27 }
 0x485   : > { %v10914_v56 = vpop.f32.mrf.mxu0  ;;  %v5593_v13 = vadd.f32 %v10926_v20, %v5555_v29 }
 0x487   : > { %v4604_v26 = vpop.f32.mrf.mxu0 }
 0x488   : > { %v4605_v50 = vadd.f32 %v4604_v26, %v10796_v62  ;;  %v5587_v62 = vadd.f32 %v10926_v20, %v5549_v22  ;;  %v5621_v26 = vmax.f32 %v5589_v41, 0.0 }
 0x48a   : > { %v5619_v17 = vmax.f32 %v5587_v62, 0.0  ;;  %v10939_v42 = vmax.f32 %v5621_v26, %v5623_v39 }
 0x48c   : > { %v10944_v10 = vmax.f32 %v5617_v6, %v5619_v17 }
 0x490   : > { %v10916_v44 = vpop.f32.mrf.mxu1 }
 0x492   : > { %v5438_v19 = vpop.f32.mrf.mxu1 }
 0x493   : > { %v5557_v18 = vadd.f32 %v5438_v19, %v4605_v50  ;;  %v5625_v19 = vmax.f32 %v5593_v13, 0.0  ;;  %v10942_v50 = vsub.s32 %v5684_v31, %v10935_v11 }
 0x495   : > { %v5595_v28 = vadd.f32 %v10926_v20, %v5557_v18  ;;  %v10937_v37 = vpop.f32.mrf.mxu0  ;;  %v5722_v27 = vrot.slane %v10939_v42, %v10942_v50  ;;  %v5688_v36 = vrot.slane %v10944_v10, %v10942_v50 }
 0x497   : > { %v5627_v25 = vmax.f32 %v5595_v28, 0.0  ;;  %v4614_v22 = vpop.f32.mrf.mxu0  ;;  %v5730_v23 = vcombine.high %v5722_v27, %v5722_v27  ;;  %v5696_v41 = vcombine.high %v5688_v36, %v5688_v36 }
 0x498   : > { %v4615_v58 = vadd.f32 %v4614_v22, %v10807_v2  ;;  %v7212_v2 = vrot.slane %v5722_v27, 9 }
 0x499   : > { %v10946_v24 = vmax.f32 %v5625_v19, %v5627_v25  ;;  %v7213_v13 = vrot.slane %v5730_v23, 9  ;;  %v7205_v26 = vrot.slane %v5696_v41, 9 }
 0x49b   : > { %v5756_v29 = vrot.slane %v10946_v24, %v10942_v50  ;;  %v6218_v60 = vmax.f32 %v5730_v23, %v7213_v13  ;;  %v6210_v8 = vmax.f32 %v5696_v41, %v7205_v26  ;;  %v4570_v23 = vadd.f32 %v10898_v59, %v10750_v4 }
 0x49c   : > { %v7849_v59 = vmov 1934713408  }
 0x49d   : > { %v5764_v48 = vcombine.high %v5756_v29, %v5756_v29  ;;  %v6373_v63 = vrot.slane %v6218_v60, 7  ;;  %v7220_v1 = vrot.slane %v5756_v29, 9  ;;  %v5550_v60 = vadd.f32 %v10900_v0, %v4570_v23 }
 0x49f   : > { %v7221_v19 = vrot.slane %v5764_v48, 9  ;;  %v5588_v0 = vadd.f32 %v10926_v20, %v5550_v60 }
 0x4a0   : > { %v10948_v16 = vpop.f32.mrf.mxu1 }
 0x4a2   : > { %v5448_v55 = vpop.f32.mrf.mxu1 }
 0x4a3   : > { %v5559_v28 = vadd.f32 %v5448_v55, %v4615_v58  ;;  %v6226_v55 = vmax.f32 %v5764_v48, %v7221_v19  ;;  %v7204_v58 = vrot.slane %v5688_v36, 9 }
 0x4a5   : > { %v10952_v18 = vpop.f32.mrf.mxu0  ;;  %v5597_v25 = vadd.f32 %v10926_v20, %v5559_v28  ;;  %v6401_v33 = vrot.slane %v6226_v55, 7  ;;  %v6209_v41 = vmax.f32 %v5688_v36, %v7204_v58  ;;  %v6601_v36 = vunpack.c.l.s4 %v7849_v59 }
 0x4a7   : > { %v4624_v62 = vpop.f32.mrf.mxu0  ;;  %v5629_v22 = vmax.f32 %v5597_v25, 0.0  ;;  %v6602_v55 = vunpack.c.0.s8 %v6601_v36  ;;  %v5681_v36 = vcombine.high %v10944_v10, %v10944_v10 }
 0x4a8   : > { %v4625_v31 = vadd.f32 %v4624_v62, %v10820_v14  ;;  %v6341_v14 = vrot.slane %v6210_v8, 7  ;;  %v6217_v62 = vmax.f32 %v5722_v27, %v7212_v2 }
 0x4a9   : > { %v5695_v10 = vrot.slane %v5681_v36, %v10942_v50 }
 0x4aa   : > { %v6374_v13 = vsel %vm6342_vm12, %v6373_v63, %v6217_v62  ;;  %v6343_v8 = vsel %vm6342_vm12, %v6341_v14, %v6209_v41  ;;  %v5620_v41 = vmax.f32 %v5588_v0, 0.0  ;;  %v4610_v0 = vadd.f32 %v10914_v56, %v10794_v12 }
 0x4ab   : > { %v6375_v27 = vsel %vm6344_vm13, %v6373_v63, %v6374_v13 }
 0x4ac   : > { %v6376_v25 = vsel %vm6346_vm14, %v6373_v63, %v6375_v27 }
 0x4ad   : > { %v6377_v62 = vsel %vm6348_vm15, %v6373_v63, %v6376_v25  ;;  %v11001_v63 = vsub.s32 %v6602_v55, %v10935_v11  ;;  %v4630_v25 = vadd.f32 %v10952_v18, %v10810_v43  ;;  %v5697_v55 = vcombine.high %v5695_v10, %v5695_v10 }
 0x4b0   : > { %v10959_v39 = vpop.f32.mrf.mxu1 }
 0x4b2   : > { %v5458_v17 = vpop.f32.mrf.mxu1 }
 0x4b3   : > { %v5561_v6 = vadd.f32 %v5458_v17, %v4625_v31 }
 0x4b5   : > { %v5599_v51 = vadd.f32 %v10926_v20, %v5561_v6  ;;  %v4580_v6 = vadd.f32 %v10902_v61, %v10763_v49 }
 0x4b7   : > { %v5631_v54 = vmax.f32 %v5599_v51, 0.0  ;;  %v6225_v51 = vmax.f32 %v5756_v29, %v7220_v1  ;;  %v6345_v1 = vsel %vm6344_vm13, %v6341_v14, %v6343_v8 }
 0x4b9   : > { %v10964_v40 = vmax.f32 %v5629_v22, %v5631_v54  ;;  %v4560_v54 = vadd.f32 %v10894_v52, %v10742_v53  ;;  %v6402_v31 = vsel %vm6342_vm12, %v6401_v33, %v6225_v51  ;;  %v4590_v53 = vadd.f32 %v10906_v5, %v10770_v47 }
 0x4ba   : > { %v6403_v29 = vsel %vm6344_vm13, %v6401_v33, %v6402_v31  ;;  %v6347_v47 = vsel %vm6346_vm14, %v6341_v14, %v6345_v1  ;;  %v5552_v5 = vadd.f32 %v10904_v9, %v4580_v6  ;;  %v4600_v6 = vadd.f32 %v10910_v30, %v10781_v38 }
 0x4bb   : > { %v5790_v28 = vrot.slane %v10964_v40, %v10942_v50  ;;  %v5548_v4 = vadd.f32 %v10896_v21, %v4560_v54  ;;  %v5554_v21 = vadd.f32 %v10908_v32, %v4590_v53  ;;  %v6404_v23 = vsel %vm6346_vm14, %v6401_v33, %v6403_v29 }
 0x4bc   : > { %v6349_v32 = vsel %vm6348_vm15, %v6341_v14, %v6347_v47  ;;  %v6405_v51 = vsel %vm6348_vm15, %v6401_v33, %v6404_v23  ;;  %v5590_v54 = vadd.f32 %v10926_v20, %v5552_v5  ;;  %v5556_v43 = vadd.f32 %v10912_v35, %v4600_v6 }
 0x4bd   : > { %v5798_v48 = vcombine.high %v5790_v28, %v5790_v28  ;;  %v7228_v17 = vrot.slane %v5790_v28, 9  ;;  %v5586_v22 = vadd.f32 %v10926_v20, %v5548_v4  ;;  %v5592_v61 = vadd.f32 %v10926_v20, %v5554_v21 }
 0x4be   : > { %v5558_v21 = vadd.f32 %v10916_v44, %v4610_v0 }
 0x4bf   : > { %v7229_v26 = vrot.slane %v5798_v48, 9  ;;  %v6233_v19 = vmax.f32 %v5790_v28, %v7228_v17  ;;  %v5618_v13 = vmax.f32 %v5586_v22, 0.0  ;;  %v5624_v27 = vmax.f32 %v5592_v61, 0.0 }
 0x4c0   : > { %v5622_v17 = vmax.f32 %v5590_v54, 0.0  ;;  %v5596_v30 = vadd.f32 %v10926_v20, %v5558_v21 }
 0x4c1   : > { %v6234_v52 = vmax.f32 %v5798_v48, %v7229_v26  ;;  %v6599_v48 = vcombine.low %v6349_v32, %v6377_v62  ;;  %v5650_v8 = vmax.f32 %v5618_v13, %v5620_v41 }
 0x4c2   : > { %v5652_v4 = vmax.f32 %v5622_v17, %v5624_v27  ;;  %v5628_v23 = vmax.f32 %v5596_v30, 0.0 }
 0x4c3   : > { %v6429_v2 = vrot.slane %v6234_v52, 7  ;;  %v11007_v14 = vrot.slane %v6599_v48, %v11001_v63  ;;  %v5698_v26 = vcombine.high %v5650_v8, %v5650_v8  ;;  %v5705_v59 = vrot.slane %v5650_v8, %v10942_v50 }
 0x4c4   : > { %v5732_v1 = vcombine.high %v5652_v4, %v5652_v4  ;;  %v5739_v53 = vrot.slane %v5652_v4, %v10942_v50  ;;  %v5715_v52 = vcombine.high %v10939_v42, %v10939_v42  ;;  %v5562_v42 = vadd.f32 %v10959_v39, %v4630_v25 }
 0x4c5   : > { %v6430_v58 = vsel %vm6342_vm12, %v6429_v2, %v6233_v19  ;;  %v5712_v11 = vrot.slane %v5698_v26, %v10942_v50  ;;  %v5713_v29 = vcombine.high %v5705_v59, %v5705_v59  ;;  %v5594_v39 = vadd.f32 %v10926_v20, %v5556_v43 }
 0x4c6   : > { %v6431_v49 = vsel %vm6344_vm13, %v6429_v2, %v6430_v58  ;;  %v5746_v22 = vrot.slane %v5732_v1, %v10942_v50  ;;  %v5747_v12 = vcombine.high %v5739_v53, %v5739_v53  ;;  %v5729_v56 = vrot.slane %v5715_v52, %v10942_v50 }
 0x4c7   : > { %v6432_v28 = vsel %vm6346_vm14, %v6429_v2, %v6431_v49  ;;  %v5714_v19 = vcombine.high %v5712_v11, %v5712_v11  ;;  %v7209_v18 = vrot.slane %v5713_v29, 9  ;;  %v5600_v47 = vadd.f32 %v10926_v20, %v5562_v42 }
 0x4c8   : > { %v6433_v9 = vsel %vm6348_vm15, %v6429_v2, %v6432_v28  ;;  %v4620_v2 = vadd.f32 %v10937_v37, %v10801_v3  ;;  %v5748_v5 = vcombine.high %v5746_v22, %v5746_v22  ;;  %v7217_v3 = vrot.slane %v5747_v12, 9 }
 0x4c9   : > { %v6608_v60 = vcombine.low %v6405_v51, %v6433_v9  ;;  %v7211_v44 = vrot.slane %v5714_v19, 9  ;;  %v5731_v37 = vcombine.high %v5729_v56, %v5729_v56  ;;  %v6214_v58 = vmax.f32 %v5713_v29, %v7209_v18 }
 0x4ca   : > { %v5560_v38 = vadd.f32 %v10948_v16, %v4620_v2  ;;  %v7208_v41 = vrot.slane %v5705_v59, 9  ;;  %v7207_v49 = vrot.slane %v5697_v55, 9  ;;  %v5632_v61 = vmax.f32 %v5600_v47, 0.0  ;;  %v7728_v2 = vpop.f32.mrf.mxu0 }
 0x4cb   : > { %v11004_v31 = vrot.slane %v6608_v60, %v11001_v63  ;;  %v6216_v35 = vmax.f32 %v5714_v19, %v7211_v44  ;;  %v7219_v16 = vrot.slane %v5748_v5, 9  ;;  %v6222_v32 = vmax.f32 %v5747_v12, %v7217_v3  ;;  %v11048_v44 = vpop.f32.mrf.mxu1 }
 0x4cc   : > { %v5598_v62 = vadd.f32 %v10926_v20, %v5560_v38  ;;  %v7215_v28 = vrot.slane %v5731_v37, 9  ;;  %v5626_v13 = vmax.f32 %v5594_v39, 0.0  ;;  %v7210_v51 = vrot.slane %v5712_v11, 9  ;;  %v11054_v39 = vpop.f32.mrf.mxu0 }
 0x4cd   : > { %v6747_v33 = vcombine.low %v11007_v14, %v11004_v31  ;;  %v6359_v9 = vrot.slane %v6214_v58, 7  ;;  %v7216_v54 = vrot.slane %v5739_v53, 9  ;;  %v6213_v8 = vmax.f32 %v5705_v59, %v7208_v41 }
 0x4ce   : > { %v5630_v48 = vmax.f32 %v5598_v62, 0.0  ;;  %v5654_v60 = vmax.f32 %v5626_v13, %v5628_v23  ;;  %v6366_v27 = vrot.slane %v6216_v35, 7  ;;  %v6212_v17 = vmax.f32 %v5697_v55, %v7207_v49  ;;  %v11069_v49 = vpop.f32.mrf.mxu1 }
 0x4cf   : > { %v6224_v4 = vmax.f32 %v5748_v5, %v7219_v16  ;;  %v6387_v36 = vrot.slane %v6222_v32, 7  ;;  %v6220_v1 = vmax.f32 %v5731_v37, %v7215_v28  ;;  %v6215_v52 = vmax.f32 %v5712_v11, %v7210_v51 }
 0x4d0   : > { %v5656_v26 = vmax.f32 %v5630_v48, %v5632_v61  ;;  %v6360_v0 = vsel %vm6342_vm12, %v6359_v9, %v6213_v8  ;;  %v7206_v29 = vrot.slane %v5695_v10, 9  ;;  %v7218_v25 = vrot.slane %v5746_v22, 9  ;;  %v7731_v61 = vpop.f32.mrf.mxu0  ;;  %v7785_v51 = vpop.f32.mrf.mxu1 }
 0x4d1   : > { %v6221_v6 = vmax.f32 %v5739_v53, %v7216_v54  ;;  %v7214_v21 = vrot.slane %v5729_v56, 9  ;;  %v11039_v19 = vrot.slane %v5654_v60, %v10942_v50  ;;  %v6367_v42 = vsel %vm6342_vm12, %v6366_v27, %v6215_v52 }
 0x4d2   : > { %v6352_v59 = vrot.slane %v6212_v17, 7  ;;  %v5766_v12 = vcombine.high %v5654_v60, %v5654_v60  ;;  %v11043_v43 = vrot.slane %v5656_v26, %v10942_v50  ;;  %v11046_v11 = vrot.slane %v6224_v4, 7  ;;  %v4644_v4 = vpop.f32.mrf.mxu0 }
 0x4d3   : > { %v6388_v18 = vsel %vm6342_vm12, %v6387_v36, %v6221_v6  ;;  %v6380_v38 = vrot.slane %v6220_v1, 7  ;;  %v5800_v30 = vcombine.high %v5656_v26, %v5656_v26  ;;  %v6361_v53 = vsel %vm6344_vm13, %v6359_v9, %v6360_v0  ;;  %v5478_v6 = vpop.f32.mrf.mxu1 }
 0x4d4   : > { %v6211_v55 = vmax.f32 %v5695_v10, %v7206_v29  ;;  %v6368_v47 = vsel %vm6344_vm13, %v6366_v27, %v6367_v42  ;;  %v6223_v5 = vmax.f32 %v5746_v22, %v7218_v25  ;;  %v6219_v3 = vmax.f32 %v5729_v56, %v7214_v21  ;;  %v7734_v21 = vpop.f32.mrf.mxu0 }
 0x4d5   : > { %v5781_v37 = vcombine.high %v11039_v19, %v11039_v19  ;;  %v6389_v62 = vsel %vm6344_vm13, %v6387_v36, %v6388_v18  ;;  %v5780_v23 = vrot.slane %v5766_v12, %v10942_v50  ;;  %v5815_v41 = vcombine.high %v11043_v43, %v11043_v43 }
 0x4d6   : > { %v6353_v58 = vsel %vm6342_vm12, %v6352_v59, %v6211_v55  ;;  %v6395_v10 = vsel %vm6342_vm12, %v11046_v11, %v6223_v5  ;;  %v6381_v22 = vsel %vm6342_vm12, %v6380_v38, %v6219_v3  ;;  %v5749_v56 = vcombine.high %v10946_v24, %v10946_v24 }
 0x4d7   : > { %v11067_v35 = vrot.slane %v5800_v30, %v10942_v50  ;;  %v5783_v16 = vcombine.high %v10964_v40, %v10964_v40  ;;  %v6362_v32 = vsel %vm6346_vm14, %v6359_v9, %v6361_v53  ;;  %v6354_v28 = vsel %vm6344_vm13, %v6352_v59, %v6353_v58 }
 0x4d8   : > { %v7225_v13 = vrot.slane %v5781_v37, 9  ;;  %v6390_v48 = vsel %vm6346_vm14, %v6387_v36, %v6389_v62  ;;  %v6369_v54 = vsel %vm6346_vm14, %v6366_v27, %v6368_v47  ;;  %v6396_v24 = vsel %vm6344_vm13, %v11046_v11, %v6395_v10 }
 0x4d9   : > { %v6382_v60 = vsel %vm6344_vm13, %v6380_v38, %v6381_v22  ;;  %v5782_v8 = vcombine.high %v5780_v23, %v5780_v23  ;;  %v7233_v17 = vrot.slane %v5815_v41, 9  ;;  %v5763_v26 = vrot.slane %v5749_v56, %v10942_v50 }
 0x4da   : > { %v5816_v40 = vcombine.high %v11067_v35, %v11067_v35  ;;  %v11084_v1 = vrot.slane %v5783_v16, %v10942_v50  ;;  %v11087_v52 = vsel %vm6348_vm15, %v6359_v9, %v6362_v32  ;;  %v6355_v0 = vsel %vm6346_vm14, %v6352_v59, %v6354_v28 }
 0x4db   : > { %v11091_v29 = vsel %vm6348_vm15, %v6366_v27, %v6369_v54  ;;  %v6230_v25 = vmax.f32 %v5781_v37, %v7225_v13  ;;  %v11094_v42 = vsel %vm6348_vm15, %v6387_v36, %v6390_v48  ;;  %v6383_v12 = vsel %vm6346_vm14, %v6380_v38, %v6382_v60 }
 0x4dc   : > { %v6397_v18 = vsel %vm6346_vm14, %v11046_v11, %v6396_v24  ;;  %v7224_v30 = vrot.slane %v11039_v19, 9  ;;  %v7227_v9 = vrot.slane %v5782_v8, 9  ;;  %v6238_v53 = vmax.f32 %v5815_v41, %v7233_v17  ;;  %v4654_v41 = vpop.f32.mrf.mxu0 }
 0x4dd   : > { %v4650_v55 = vadd.f32 %v7731_v61, %v10830_v45  ;;  %v7226_v47 = vrot.slane %v5780_v23, 9  ;;  %v5765_v27 = vcombine.high %v5763_v26, %v5763_v26  ;;  %v7235_v5 = vrot.slane %v5816_v40, 9 }
 0x4de   : > { %v11102_v37 = vsel %vm6348_vm15, %v6352_v59, %v6355_v0  ;;  %v7232_v36 = vrot.slane %v11043_v43, 9  ;;  %v5799_v58 = vcombine.high %v11084_v1, %v11084_v1  ;;  %v4640_v62 = vadd.f32 %v7728_v2, %v10822_v46 }
 0x4df   : > { %v7788_v3 = vpop.f32.mrf.mxu1  ;;  %v5566_v10 = vadd.f32 %v7785_v51, %v4650_v55  ;;  %v11108_v22 = vrot.slane %v6230_v25, 7  ;;  %v6671_v45 = vcombine.low %v11087_v52, %v11094_v42  ;;  %v11113_v56 = vsel %vm6348_vm15, %v6380_v38, %v6383_v12 }
 0x4e0   : > { %v11117_v59 = vsel %vm6348_vm15, %v11046_v11, %v6397_v18  ;;  %v6229_v61 = vmax.f32 %v11039_v19, %v7224_v30  ;;  %v6232_v16 = vmax.f32 %v5782_v8, %v7227_v9  ;;  %v6443_v32 = vrot.slane %v6238_v53, 7 }
 0x4e1   : > { %v5564_v46 = vadd.f32 %v11048_v44, %v4640_v62  ;;  %v7222_v2 = vrot.slane %v5763_v26, 9  ;;  %v7223_v28 = vrot.slane %v5765_v27, 9  ;;  %v6240_v13 = vmax.f32 %v5816_v40, %v7235_v5  ;;  %v5488_v48 = vpop.f32.mrf.mxu1  ;;  %v11563_v62 = vld [vmem:[#allocation5_spill] sm:$0xff] }
 0x4e2   : > { %v4645_v51 = vadd.f32 %v4644_v4, %v10836_v57  ;;  %v6231_v24 = vmax.f32 %v5780_v23, %v7226_v47  ;;  %v6237_v38 = vmax.f32 %v11043_v43, %v7232_v36  ;;  %v7231_v60 = vrot.slane %v5799_v58, 9 }
 0x4e3   : > { %v5604_v11 = vadd.f32 %v10926_v20, %v5566_v10  ;;  %v6416_v19 = vsel %vm6342_vm12, %v11108_v22, %v6229_v61  ;;  %v7234_v8 = vrot.slane %v11067_v35, 9  ;;  %v4635_v44 = vadd.f32 %v11054_v39, %v10827_v7 }
 0x4e4   : > { %v7737_v54 = vpop.f32.mrf.mxu0  ;;  %v5565_v17 = vadd.f32 %v5478_v6, %v4645_v51  ;;  %v11129_v0 = vrot.slane %v6232_v16, 7  ;;  %v6444_v57 = vsel %vm6342_vm12, %v6443_v32, %v6237_v38  ;;  %v5602_v23 = vadd.f32 %v10926_v20, %v5564_v46 }
 0x4e5   : > { %v4670_v43 = vadd.f32 %v7737_v54, %v10850_v34  ;;  %v6227_v4 = vmax.f32 %v5763_v26, %v7222_v2  ;;  %v6228_v25 = vmax.f32 %v5765_v27, %v7223_v28  ;;  %v6450_v12 = vrot.slane %v6240_v13, 7  ;;  %v11564_v28 = vld [vmem:[#allocation4_spill] sm:$0xff] }
 0x4e6   : > { %v5563_v18 = vadd.f32 %v11069_v49, %v4635_v44  ;;  %v6236_v30 = vmax.f32 %v5799_v58, %v7231_v60  ;;  %v5636_v9 = vmax.f32 %v5604_v11, 0.0  ;;  %v4660_v53 = vadd.f32 %v7734_v21, %v10843_v15  ;;  %v4664_v7 = vpop.f32.mrf.mxu0 }
 0x4e7   : > { %v6417_v6 = vsel %vm6344_vm13, %v11108_v22, %v6416_v19  ;;  %v6239_v55 = vmax.f32 %v11067_v35, %v7234_v8  ;;  %v6445_v47 = vsel %vm6344_vm13, %v6443_v32, %v6444_v57  ;;  %v5603_v34 = vadd.f32 %v10926_v20, %v5565_v17 }
 0x4e8   : > { %v6423_v26 = vsel %vm6342_vm12, %v11129_v0, %v6231_v24  ;;  %v7230_v49 = vrot.slane %v11084_v1, 9  ;;  %v5634_v27 = vmax.f32 %v5602_v23, 0.0  ;;  %v5568_v5 = vadd.f32 %v7788_v3, %v4660_v53 }
 0x4e9   : > { %v11144_v15 = vrot.slane %v6228_v25, 7  ;;  %v6451_v21 = vsel %vm6342_vm12, %v6450_v12, %v6239_v55  ;;  %v5601_v58 = vadd.f32 %v10926_v20, %v5563_v18  ;;  %v4665_v35 = vadd.f32 %v4664_v7, %v11563_v62 }
 0x4ea   : > { %v6436_v10 = vrot.slane %v6236_v30, 7  ;;  %v5658_v61 = vmax.f32 %v5634_v27, %v5636_v9  ;;  %v6446_v46 = vsel %vm6346_vm14, %v6443_v32, %v6445_v47  ;;  %v5635_v2 = vmax.f32 %v5603_v34, 0.0 }
 0x4eb   : > { %v4655_v13 = vadd.f32 %v4654_v41, %v11564_v28  ;;  %v6418_v3 = vsel %vm6346_vm14, %v11108_v22, %v6417_v6  ;;  %v6424_v54 = vsel %vm6344_vm13, %v11129_v0, %v6423_v26  ;;  %v6452_v24 = vsel %vm6344_vm13, %v6450_v12, %v6451_v21  ;;  %v11566_v28 = vld [vmem:[#allocation8_spill] sm:$0xff] }
 0x4ec   : > { %v6235_v38 = vmax.f32 %v11084_v1, %v7230_v49  ;;  %v5606_v60 = vadd.f32 %v10926_v20, %v5568_v5  ;;  %v6409_v11 = vsel %vm6342_vm12, %v11144_v15, %v6227_v4  ;;  %v5633_v19 = vmax.f32 %v5601_v58, 0.0 }
 0x4ed   : > { %v5567_v8 = vadd.f32 %v5488_v48, %v4655_v13  ;;  %v6447_v41 = vsel %vm6348_vm15, %v6443_v32, %v6446_v46  ;;  %v5834_v17 = vcombine.high %v5658_v61, %v5658_v61  ;;  %v6453_v25 = vsel %vm6346_vm14, %v6450_v12, %v6452_v24 }
 0x4ee   : > { %v6437_v44 = vsel %vm6342_vm12, %v6436_v10, %v6235_v38  ;;  %v6707_v4 = vcombine.low %v11091_v29, %v11117_v59  ;;  %v5638_v18 = vmax.f32 %v5606_v60, 0.0  ;;  %v6419_v32 = vsel %vm6348_vm15, %v11108_v22, %v6418_v3 }
 0x4ef   : > { %v7791_v40 = vpop.f32.mrf.mxu1  ;;  %v6635_v48 = vcombine.low %v11102_v37, %v11113_v56  ;;  %v6425_v30 = vsel %vm6346_vm14, %v11129_v0, %v6424_v54  ;;  %v6410_v9 = vsel %vm6344_vm13, %v11144_v15, %v6409_v11  ;;  %v6438_v53 = vsel %vm6344_vm13, %v6436_v10, %v6437_v44 }
 0x4f0   : > { %v5570_v39 = vadd.f32 %v7791_v40, %v4670_v43  ;;  %v11164_v40 = vrot.slane %v5658_v61, %v10942_v50  ;;  %v5657_v43 = vmax.f32 %v5633_v19, %v5635_v2  ;;  %v5605_v7 = vadd.f32 %v10926_v20, %v5567_v8  ;;  %v11565_v61 = vld [vmem:[#allocation6_spill] sm:$0xff] }
 0x4f1   : > { %v5498_v36 = vpop.f32.mrf.mxu1  ;;  %v11181_v29 = vrot.slane %v5834_v17, %v10942_v50  ;;  %v6454_v56 = vsel %vm6348_vm15, %v6450_v12, %v6453_v25  ;;  %v11190_v34 = vrot.slane %v6671_v45, %v11001_v63  ;;  %v11193_v26 = vrot.slane %v6707_v4, %v11001_v63  ;;  %v11567_v25 = vld [vmem:[#allocation9_spill] sm:$0xff] }
 0x4f2   : > { %v5608_v16 = vadd.f32 %v10926_v20, %v5570_v39  ;;  %v5569_v51 = vadd.f32 %v5498_v36, %v4665_v35  ;;  %v6680_v39 = vcombine.low %v6419_v32, %v6447_v41  ;;  %v5849_v22 = vcombine.high %v11164_v40, %v11164_v40 }
 0x4f3   : > { %v5817_v55 = vcombine.high %v5657_v43, %v5657_v43  ;;  %v11196_v49 = vrot.slane %v5657_v43, %v10942_v50  ;;  %v6439_v5 = vsel %vm6346_vm14, %v6436_v10, %v6438_v53  ;;  %v11200_v36 = vrot.slane %v6635_v48, %v11001_v63 }
 0x4f4   : > { %v5640_v57 = vmax.f32 %v5608_v16, 0.0  ;;  %v7740_v23 = vpop.f32.mrf.mxu0  ;;  %v5607_v1 = vadd.f32 %v10926_v20, %v5569_v51  ;;  %v6426_v12 = vsel %vm6348_vm15, %v11129_v0, %v6425_v30  ;;  %v5637_v21 = vmax.f32 %v5605_v7, 0.0  ;;  %v11568_v7 = vld [vmem:[#allocation7_spill] sm:$0xff] }
 0x4f5   : > { %v6687_v52 = vrot.slane %v6680_v39, %v11001_v63  ;;  %v6411_v42 = vsel %vm6346_vm14, %v11144_v15, %v6410_v9  ;;  %v6716_v45 = vcombine.low %v6426_v12, %v6454_v56  ;;  %v5850_v58 = vcombine.high %v11181_v29, %v11181_v29 }
 0x4f6   : > { %v5660_v59 = vmax.f32 %v5638_v18, %v5640_v57  ;;  %v4674_v6 = vpop.f32.mrf.mxu0  ;;  %v5639_v47 = vmax.f32 %v5607_v1, 0.0  ;;  %v7241_v62 = vrot.slane %v5849_v22, 9  ;;  %v4680_v16 = vadd.f32 %v7740_v23, %v11565_v61 }
 0x4f7   : > { %v11214_v2 = vrot.slane %v5817_v55, %v10942_v50  ;;  %v6440_v51 = vsel %vm6348_vm15, %v6436_v10, %v6439_v5  ;;  %v5832_v3 = vcombine.high %v11196_v49, %v11196_v49  ;;  %v6412_v11 = vsel %vm6348_vm15, %v11144_v15, %v6411_v42 }
 0x4f8   : > { %v11210_v35 = vrot.slane %v5660_v59, %v10942_v50  ;;  %v5659_v0 = vmax.f32 %v5637_v21, %v5639_v47  ;;  %v5868_v54 = vcombine.high %v5660_v59, %v5660_v59  ;;  %v7272_v8 = vcombine.high %v11190_v34, %v6687_v52 }
 0x4f9   : > { %v6841_v41 = vcombine.low %v11190_v34, %v6687_v52  ;;  %v11225_v44 = vrot.slane %v6716_v45, %v11001_v63  ;;  %v7243_v17 = vrot.slane %v5850_v58, 9  ;;  %v6246_v10 = vmax.f32 %v5849_v22, %v7241_v62 }
 0x4fa   : > { %v5883_v57 = vcombine.high %v11210_v35, %v11210_v35  ;;  %v6644_v43 = vcombine.low %v6412_v11, %v6440_v51  ;;  %v5833_v1 = vcombine.high %v11214_v2, %v11214_v2  ;;  %v11232_v15 = vrot.slane %v5659_v0, %v10942_v50 }
 0x4fb   : > { %v7237_v32 = vrot.slane %v5832_v3, 9  ;;  %v11237_v48 = vrot.slane %v5868_v54, %v10942_v50  ;;  %v5851_v30 = vcombine.high %v5659_v0, %v5659_v0  ;;  %v7240_v53 = vrot.slane %v11164_v40, 9 }
 0x4fc   : > { %v4675_v39 = vadd.f32 %v4674_v6, %v11568_v7  ;;  %v11243_v59 = vrot.slane %v7272_v8, %v10942_v50  ;;  %v6248_v56 = vmax.f32 %v5850_v58, %v7243_v17  ;;  %v7249_v55 = vrot.slane %v5883_v57, 9 }
 0x4fd   : > { %v11246_v34 = vrot.slane %v6246_v10, 7  ;;  %v5866_v5 = vcombine.high %v11232_v15, %v11232_v15  ;;  %v6242_v21 = vmax.f32 %v5832_v3, %v7237_v32  ;;  %v5884_v6 = vcombine.high %v11237_v48, %v11237_v48 }
 0x4fe   : > { %v11253_v52 = vrot.slane %v5851_v30, %v10942_v50  ;;  %v6245_v45 = vmax.f32 %v11164_v40, %v7240_v53  ;;  %v7236_v58 = vrot.slane %v11196_v49, 9  ;;  %v11259_v61 = vrot.slane %v6841_v41, %v10942_v50 }
 0x4ff   : > { %v7794_v37 = vpop.f32.mrf.mxu1  ;;  %v6254_v0 = vmax.f32 %v5883_v57, %v7249_v55  ;;  %v7245_v3 = vrot.slane %v5866_v5, 9  ;;  %v11265_v40 = vrot.slane %v6242_v21, 7  ;;  %v11273_v8 = vrot.slane %v6644_v43, %v11001_v63 }
 0x500   : > { %v5572_v24 = vadd.f32 %v7794_v37, %v4680_v16  ;;  %v7242_v37 = vrot.slane %v11181_v29, 9  ;;  %v6241_v11 = vmax.f32 %v11196_v49, %v7236_v58  ;;  %v7244_v53 = vrot.slane %v11232_v15, 9 }
 0x501   : > { %v5508_v46 = vpop.f32.mrf.mxu1  ;;  %v6499_v10 = vrot.slane %v6254_v0, 7 }
 0x502   : > { %v5610_v9 = vadd.f32 %v10926_v20, %v5572_v24  ;;  %v5571_v12 = vadd.f32 %v5508_v46, %v4675_v39  ;;  %v6247_v16 = vmax.f32 %v11181_v29, %v7242_v37  ;;  %v6478_v46 = vrot.slane %v6248_v56, 7 }
 0x503   : > { %v7248_v24 = vrot.slane %v11210_v35, 9  ;;  %v7238_v29 = vrot.slane %v11214_v2, 9  ;;  %v6458_v49 = vsel %vm6342_vm12, %v11265_v40, %v6241_v11  ;;  %v11569_v11 = vld [vmem:[#allocation10_spill] sm:$0xff] }
 0x504   : > { %v7743_v27 = vpop.f32.mrf.mxu0  ;;  %v5642_v42 = vmax.f32 %v5610_v9, 0.0  ;;  %v5609_v54 = vadd.f32 %v10926_v20, %v5571_v12  ;;  %v6479_v17 = vsel %vm6342_vm12, %v6478_v46, %v6247_v16  ;;  %v6459_v55 = vsel %vm6344_vm13, %v11265_v40, %v6458_v49 }
 0x505   : > { %v4690_v13 = vadd.f32 %v7743_v27, %v11566_v28  ;;  %v7239_v27 = vrot.slane %v5833_v1, 9  ;;  %v6253_v43 = vmax.f32 %v11210_v35, %v7248_v24  ;;  %v6480_v30 = vsel %vm6344_vm13, %v6478_v46, %v6479_v17 }
 0x506   : > { %v4684_v38 = vpop.f32.mrf.mxu0  ;;  %v6243_v9 = vmax.f32 %v11214_v2, %v7238_v29  ;;  %v7246_v12 = vrot.slane %v11253_v52, 9 }
 0x507   : > { %v4685_v4 = vadd.f32 %v4684_v38, %v11567_v25  ;;  %v6244_v51 = vmax.f32 %v5833_v1, %v7239_v27  ;;  %v7251_v38 = vrot.slane %v5884_v6, 9  ;;  %v6250_v1 = vmax.f32 %v5866_v5, %v7245_v3 }
 0x508   : > { %v5641_v25 = vmax.f32 %v5609_v54, 0.0  ;;  %v6500_v37 = vsel %vm6342_vm12, %v6499_v10, %v6253_v43  ;;  %v11570_v43 = vld [vmem:[#allocation11_spill] sm:$0xff] }
 0x50f   : > { %v7797_v60 = vpop.f32.mrf.mxu1 }
 0x510   : > { %v5574_v19 = vadd.f32 %v7797_v60, %v4690_v13  ;;  %v6472_v13 = vsel %vm6342_vm12, %v11246_v34, %v6245_v45  ;;  %v5867_v60 = vcombine.high %v11253_v52, %v11253_v52  ;;  %v6249_v45 = vmax.f32 %v11232_v15, %v7244_v53 }
 0x511   : > { %v5518_v23 = vpop.f32.mrf.mxu1  ;;  %v6473_v41 = vsel %vm6344_vm13, %v11246_v34, %v6472_v13 }
 0x512   : > { %v5612_v18 = vadd.f32 %v10926_v20, %v5574_v19  ;;  %v5573_v22 = vadd.f32 %v5518_v23, %v4685_v4  ;;  %v11281_v23 = vrot.slane %v6244_v51, 7  ;;  %v7247_v32 = vrot.slane %v5867_v60, 9 }
 0x513   : > { %v6474_v35 = vsel %vm6346_vm14, %v11246_v34, %v6473_v41  ;;  %v6251_v41 = vmax.f32 %v11253_v52, %v7246_v12 }
 0x514   : > { %v5644_v47 = vmax.f32 %v5612_v18, 0.0  ;;  %v5611_v62 = vadd.f32 %v10926_v20, %v5573_v22  ;;  %v6256_v18 = vmax.f32 %v5884_v6, %v7251_v38  ;;  %v7746_v39 = vpop.f32.mrf.mxu0  ;;  %v7250_v22 = vrot.slane %v11237_v48, 9 }
 0x515   : > { %v6465_v2 = vsel %vm6342_vm12, %v11281_v23, %v6243_v9  ;;  %v6252_v21 = vmax.f32 %v5867_v60, %v7247_v32  ;;  %v6481_v6 = vsel %vm6346_vm14, %v6478_v46, %v6480_v30  ;;  %v6475_v3 = vsel %vm6348_vm15, %v11246_v34, %v6474_v35 }
 0x516   : > { %v5662_v28 = vmax.f32 %v5642_v42, %v5644_v47  ;;  %v5643_v19 = vmax.f32 %v5611_v62, 0.0  ;;  %v11299_v47 = vrot.slane %v6250_v1, 7  ;;  %v11304_v5 = vrot.slane %v6256_v18, 7  ;;  %v4694_v16 = vpop.f32.mrf.mxu0 }
 0x517   : > { %v6501_v42 = vsel %vm6344_vm13, %v6499_v10, %v6500_v37  ;;  %v6255_v13 = vmax.f32 %v11237_v48, %v7250_v22  ;;  %v6460_v38 = vsel %vm6346_vm14, %v11265_v40, %v6459_v55  ;;  %v11325_v60 = vsel %vm6348_vm15, %v6478_v46, %v6481_v6 }
 0x518   : > { %v11279_v57 = vrot.slane %v5662_v28, %v10942_v50  ;;  %v5902_v4 = vcombine.high %v5662_v28, %v5662_v28  ;;  %v5661_v7 = vmax.f32 %v5641_v25, %v5643_v19  ;;  %v6466_v28 = vsel %vm6344_vm13, %v11281_v23, %v6465_v2 }
 0x519   : > { %v6486_v54 = vsel %vm6342_vm12, %v11299_v47, %v6249_v45  ;;  %v6507_v48 = vsel %vm6342_vm12, %v11304_v5, %v6255_v13  ;;  %v11329_v29 = vrot.slane %v6252_v21, 7  ;;  %v4700_v34 = vadd.f32 %v7746_v39, %v11569_v11 }
 0x51a   : > { %v5917_v56 = vcombine.high %v11279_v57, %v11279_v57  ;;  %v11302_v27 = vrot.slane %v5902_v4, %v10942_v50  ;;  %v5885_v58 = vcombine.high %v5661_v7, %v5661_v7  ;;  %v11311_v62 = vrot.slane %v5661_v7, %v10942_v50 }
 0x51b   : > { %v6502_v19 = vsel %vm6346_vm14, %v6499_v10, %v6501_v42  ;;  %v6467_v46 = vsel %vm6346_vm14, %v11281_v23, %v6466_v28  ;;  %v6487_v4 = vsel %vm6344_vm13, %v11299_v47, %v6486_v54  ;;  %v4695_v18 = vadd.f32 %v4694_v16, %v11570_v43  ;;  %v11572_v42 = vld [vmem:[#allocation13_spill] sm:$0xff] }
 0x51c   : > { %v7257_v51 = vrot.slane %v5917_v56, 9  ;;  %v5918_v15 = vcombine.high %v11302_v27, %v11302_v27  ;;  %v11335_v17 = vrot.slane %v5885_v58, %v10942_v50  ;;  %v5900_v1 = vcombine.high %v11311_v62, %v11311_v62 }
 0x51d   : > { %v6508_v52 = vsel %vm6344_vm13, %v11304_v5, %v6507_v48  ;;  %v6503_v53 = vsel %vm6348_vm15, %v6499_v10, %v6502_v19  ;;  %v11349_v7 = vsel %vm6348_vm15, %v11265_v40, %v6460_v38  ;;  %v6493_v39 = vsel %vm6342_vm12, %v11329_v29, %v6251_v41 }
 0x51e   : > { %v6262_v49 = vmax.f32 %v5917_v56, %v7257_v51  ;;  %v7259_v30 = vrot.slane %v5918_v15, 9  ;;  %v7256_v22 = vrot.slane %v11279_v57, 9  ;;  %v11571_v56 = vld [vmem:[#allocation12_spill] sm:$0xff]  ;;  %v5901_v55 = vcombine.high %v11335_v17, %v11335_v17 }
 0x51f   : > { %v7800_v0 = vpop.f32.mrf.mxu1  ;;  %v7253_v2 = vrot.slane %v5900_v1, 9  ;;  %v6488_v10 = vsel %vm6346_vm14, %v11299_v47, %v6487_v4  ;;  %v11361_v40 = vsel %vm6348_vm15, %v11281_v23, %v6467_v46  ;;  %v6494_v16 = vsel %vm6344_vm13, %v11329_v29, %v6493_v39 }
 0x520   : > { %v5576_v32 = vadd.f32 %v7800_v0, %v4700_v34  ;;  %v6527_v21 = vrot.slane %v6262_v49, 7  ;;  %v6264_v0 = vmax.f32 %v5918_v15, %v7259_v30  ;;  %v6689_v13 = vcombine.low %v6475_v3, %v6503_v53 }
 0x521   : > { %v5528_v25 = vpop.f32.mrf.mxu1  ;;  %v6509_v51 = vsel %vm6346_vm14, %v11304_v5, %v6508_v52  ;;  %v6261_v54 = vmax.f32 %v11279_v57, %v7256_v22  ;;  %v7258_v48 = vrot.slane %v11302_v27, 9  ;;  %v7255_v11 = vrot.slane %v5901_v55, 9 }
 0x522   : > { %v5575_v37 = vadd.f32 %v5528_v25, %v4695_v18  ;;  %v5614_v6 = vadd.f32 %v10926_v20, %v5576_v32  ;;  %v6258_v34 = vmax.f32 %v5900_v1, %v7253_v2  ;;  %v11375_v19 = vsel %vm6348_vm15, %v11299_v47, %v6488_v10 }
 0x523   : > { %v6528_v3 = vsel %vm6342_vm12, %v6527_v21, %v6261_v54  ;;  %v11379_v57 = vrot.slane %v6264_v0, 7  ;;  %v7252_v46 = vrot.slane %v11311_v62, 9  ;;  %v11383_v4 = vrot.slane %v6689_v13, %v11001_v63 }
 0x524   : > { %v7749_v24 = vpop.f32.mrf.mxu0  ;;  %v5613_v23 = vadd.f32 %v10926_v20, %v5575_v37  ;;  %v5646_v15 = vmax.f32 %v5614_v6, 0.0  ;;  %v11387_v1 = vsel %vm6348_vm15, %v11304_v5, %v6509_v51  ;;  %v6495_v18 = vsel %vm6346_vm14, %v11329_v29, %v6494_v16 }
 0x525   : > { %v4710_v35 = vadd.f32 %v7749_v24, %v11571_v56  ;;  %v6263_v32 = vmax.f32 %v11302_v27, %v7258_v48  ;;  %v6260_v52 = vmax.f32 %v5901_v55, %v7255_v11  ;;  %v11393_v30 = vrot.slane %v6258_v34, 7 }
 0x526   : > { %v4704_v9 = vpop.f32.mrf.mxu0  ;;  %v5645_v49 = vmax.f32 %v5613_v23, 0.0  ;;  %v6257_v37 = vmax.f32 %v11311_v62, %v7252_v46  ;;  %v6617_v56 = vcombine.low %v11349_v7, %v11375_v19  ;;  %v6725_v27 = vcombine.low %v11325_v60, %v11387_v1 }
 0x527   : > { %v4705_v45 = vadd.f32 %v4704_v9, %v11572_v42  ;;  %v7254_v9 = vrot.slane %v11335_v17, 9  ;;  %v6535_v22 = vsel %vm6342_vm12, %v11379_v57, %v6263_v32  ;;  %v6520_v6 = vrot.slane %v6260_v52, 7 }
 0x528   : > { %v6514_v10 = vsel %vm6342_vm12, %v11393_v30, %v6257_v37  ;;  %v11411_v62 = vsel %vm6348_vm15, %v11329_v29, %v6495_v18 }
 0x529   : > { %v6515_v23 = vsel %vm6344_vm13, %v11393_v30, %v6514_v10 }
 0x52c   : > { %v7803_v12 = vpop.f32.mrf.mxu1 }
 0x52d   : > { %v5578_v58 = vadd.f32 %v7803_v12, %v4710_v35 }
 0x52e   : > { %v5538_v28 = vpop.f32.mrf.mxu1 }
 0x52f   : > { %v5616_v24 = vadd.f32 %v10926_v20, %v5578_v58  ;;  %v5577_v38 = vadd.f32 %v5538_v28, %v4705_v45  ;;  %v6259_v45 = vmax.f32 %v11335_v17, %v7254_v9  ;;  %v6536_v28 = vsel %vm6344_vm13, %v11379_v57, %v6535_v22 }
 0x531   : > { %v5648_v41 = vmax.f32 %v5616_v24, 0.0  ;;  %v5615_v25 = vadd.f32 %v10926_v20, %v5577_v38  ;;  %v6529_v20 = vsel %vm6344_vm13, %v6527_v21, %v6528_v3  ;;  %v6521_v48 = vsel %vm6342_vm12, %v6520_v6, %v6259_v45 }
 0x532   : > { %v6530_v12 = vsel %vm6346_vm14, %v6527_v21, %v6529_v20 }
 0x533   : > { %v5664_v47 = vmax.f32 %v5646_v15, %v5648_v41  ;;  %v5647_v43 = vmax.f32 %v5615_v25, 0.0  ;;  %v6531_v54 = vsel %vm6348_vm15, %v6527_v21, %v6530_v12  ;;  %v6516_v21 = vsel %vm6346_vm14, %v11393_v30, %v6515_v23 }
 0x535   : > { %v5936_v53 = vcombine.high %v5664_v47, %v5664_v47  ;;  %v5943_v39 = vrot.slane %v5664_v47, %v10942_v50  ;;  %v5663_v5 = vmax.f32 %v5645_v49, %v5647_v43  ;;  %v6537_v47 = vsel %vm6346_vm14, %v11379_v57, %v6536_v28 }
 0x536   : > { %v6522_v43 = vsel %vm6344_vm13, %v6520_v6, %v6521_v48  ;;  %v6517_v28 = vsel %vm6348_vm15, %v11393_v30, %v6516_v21 }
 0x537   : > { %v5950_v35 = vrot.slane %v5936_v53, %v10942_v50  ;;  %v5951_v55 = vcombine.high %v5943_v39, %v5943_v39  ;;  %v5919_v2 = vcombine.high %v5663_v5, %v5663_v5  ;;  %v5926_v42 = vrot.slane %v5663_v5, %v10942_v50 }
 0x538   : > { %v7264_v16 = vrot.slane %v5943_v39, 9 }
 0x539   : > { %v5952_v58 = vcombine.high %v5950_v35, %v5950_v35  ;;  %v7265_v0 = vrot.slane %v5951_v55, 9  ;;  %v5933_v13 = vrot.slane %v5919_v2, %v10942_v50  ;;  %v5934_v51 = vcombine.high %v5926_v42, %v5926_v42 }
 0x53a   : > { %v7266_v24 = vrot.slane %v5950_v35, 9  ;;  %v7260_v11 = vrot.slane %v5926_v42, 9  ;;  %v6269_v3 = vmax.f32 %v5943_v39, %v7264_v16 }
 0x53b   : > { %v7267_v38 = vrot.slane %v5952_v58, 9  ;;  %v6270_v29 = vmax.f32 %v5951_v55, %v7265_v0  ;;  %v5935_v17 = vcombine.high %v5933_v13, %v5933_v13  ;;  %v7261_v34 = vrot.slane %v5934_v51, 9 }
 0x53c   : > { %v7262_v25 = vrot.slane %v5933_v13, 9  ;;  %v6271_v18 = vmax.f32 %v5950_v35, %v7266_v24  ;;  %v6265_v9 = vmax.f32 %v5926_v42, %v7260_v11  ;;  %v6538_v55 = vsel %vm6348_vm15, %v11379_v57, %v6537_v47 }
 0x53d   : > { %v6272_v15 = vmax.f32 %v5952_v58, %v7267_v38  ;;  %v6555_v41 = vrot.slane %v6270_v29, 7  ;;  %v7263_v46 = vrot.slane %v5935_v17, 9  ;;  %v6266_v49 = vmax.f32 %v5934_v51, %v7261_v34 }
 0x53e   : > { %v6267_v22 = vmax.f32 %v5933_v13, %v7262_v25  ;;  %v6523_v58 = vsel %vm6346_vm14, %v6520_v6, %v6522_v43 }
 0x53f   : > { %v6556_v32 = vsel %vm6342_vm12, %v6555_v41, %v6269_v3  ;;  %v6562_v20 = vrot.slane %v6272_v15, 7  ;;  %v6268_v53 = vmax.f32 %v5935_v17, %v7263_v46  ;;  %v6541_v39 = vrot.slane %v6266_v49, 7 }
 0x540   : > { %v6557_v52 = vsel %vm6344_vm13, %v6555_v41, %v6556_v32  ;;  %v6524_v29 = vsel %vm6348_vm15, %v6520_v6, %v6523_v58  ;;  %v6653_v17 = vcombine.low %v11361_v40, %v11411_v62  ;;  %v6624_v15 = vrot.slane %v6617_v56, %v11001_v63 }
 0x541   : > { %v6563_v5 = vsel %vm6342_vm12, %v6562_v20, %v6271_v18  ;;  %v6558_v37 = vsel %vm6346_vm14, %v6555_v41, %v6557_v52  ;;  %v6542_v35 = vsel %vm6342_vm12, %v6541_v39, %v6265_v9  ;;  %v6548_v12 = vrot.slane %v6268_v53, 7 }
 0x542   : > { %v6564_v2 = vsel %vm6344_vm13, %v6562_v20, %v6563_v5  ;;  %v6559_v10 = vsel %vm6348_vm15, %v6555_v41, %v6558_v37  ;;  %v6543_v45 = vsel %vm6344_vm13, %v6541_v39, %v6542_v35  ;;  %v7268_v41 = vcombine.high %v11007_v14, %v11004_v31 }
 0x543   : > { %v6698_v42 = vcombine.low %v6531_v54, %v6559_v10  ;;  %v6565_v16 = vsel %vm6346_vm14, %v6562_v20, %v6564_v2  ;;  %v6549_v0 = vsel %vm6342_vm12, %v6548_v12, %v6267_v22  ;;  %v6544_v57 = vsel %vm6346_vm14, %v6541_v39, %v6543_v45 }
 0x544   : > { %v6566_v13 = vsel %vm6348_vm15, %v6562_v20, %v6565_v16  ;;  %v6550_v51 = vsel %vm6344_vm13, %v6548_v12, %v6549_v0  ;;  %v6545_v24 = vsel %vm6348_vm15, %v6541_v39, %v6544_v57  ;;  %v6732_v46 = vrot.slane %v6725_v27, %v11001_v63 }
 0x545   : > { %v6705_v23 = vrot.slane %v6698_v42, %v11001_v63  ;;  %v6734_v54 = vcombine.low %v6538_v55, %v6566_v13  ;;  %v6626_v38 = vcombine.low %v6517_v28, %v6545_v24  ;;  %v6551_v48 = vsel %vm6346_vm14, %v6548_v12, %v6550_v51 }
 0x546   : > { %v6552_v34 = vsel %vm6348_vm15, %v6548_v12, %v6551_v48  ;;  %v6660_v19 = vrot.slane %v6653_v17, %v11001_v63  ;;  %v6755_v18 = vrot.slane %v6747_v33, %v10942_v50  ;;  %v6889_v14 = vcombine.low %v11193_v26, %v11225_v44 }
 0x547   : > { %v7273_v30 = vcombine.high %v11383_v4, %v6705_v23  ;;  %v6842_v11 = vcombine.low %v11383_v4, %v6705_v23  ;;  %v6741_v3 = vrot.slane %v6734_v54, %v11001_v63  ;;  %v6633_v6 = vrot.slane %v6626_v38, %v11001_v63 }
 0x548   : > { %v6662_v25 = vcombine.low %v6524_v29, %v6552_v34  ;;  %v6793_v4 = vcombine.low %v11200_v36, %v11273_v8 }
 0x549   : > { %v6880_v40 = vrot.slane %v7273_v30, %v10942_v50  ;;  %v6856_v62 = vrot.slane %v6842_v11, %v10942_v50  ;;  %v7269_v7 = vcombine.high %v6624_v15, %v6633_v6  ;;  %v6748_v49 = vcombine.low %v6624_v15, %v6633_v6 }
 0x54a   : > { %v6669_v56 = vrot.slane %v6662_v25, %v11001_v63  ;;  %v6890_v43 = vcombine.low %v6732_v46, %v6741_v3  ;;  %v6777_v63 = vrot.slane %v7268_v41, %v10942_v50  ;;  %v7275_v9 = vcombine.high %v6732_v46, %v6741_v3 }
 0x54b   : > { %v6881_v21 = vcombine.low %v11243_v59, %v6880_v40  ;;  %v6857_v47 = vcombine.low %v11259_v61, %v6856_v62  ;;  %v6784_v32 = vrot.slane %v7269_v7, %v10942_v50  ;;  %v6762_v27 = vrot.slane %v6748_v49, %v10942_v50 }
 0x54c   : > { %v6794_v60 = vcombine.low %v6660_v19, %v6669_v56  ;;  %v7271_v1 = vcombine.high %v6660_v19, %v6669_v56  ;;  %v7270_v59 = vcombine.high %v11200_v36, %v11273_v8  ;;  %v6801_v61 = vrot.slane %v6793_v4, %v10942_v50 }
 0x54d   : > { %6882 = vrot.lane.b32.xlu0 %v6881_v21, %s7850_s17  ;;  %6858 = vrot.lane.b32.xlu1 %v6857_v47, %s7851_s20  ;;  %v6763_v33 = vcombine.low %v6755_v18, %v6762_v27  ;;  %v6785_v20 = vcombine.low %v6777_v63, %v6784_v32  ;;  %v6904_v39 = vrot.slane %v6890_v43, %v10942_v50 }
 0x54e   : > { %v6808_v31 = vrot.slane %v6794_v60, %v10942_v50  ;;  %v6832_v52 = vrot.slane %v7271_v1, %v10942_v50  ;;  %v6825_v5 = vrot.slane %v7270_v59, %v10942_v50  ;;  %v7274_v36 = vcombine.high %v11193_v26, %v11225_v44 }
 0x54f   : > { %v6897_v8 = vrot.slane %v6889_v14, %v10942_v50  ;;  %v6928_v37 = vrot.slane %v7275_v9, %v10942_v50 }
 0x550   : > { %v6809_v53 = vcombine.low %v6801_v61, %v6808_v31  ;;  %v6833_v22 = vcombine.low %v6825_v5, %v6832_v52  ;;  %v6921_v2 = vrot.slane %v7274_v36, %v10942_v50 }
 0x551   : > { %6786 = vrot.lane.b32.xlu0 %v6785_v20, %s7845_s25  ;;  %v6905_v55 = vcombine.low %v6897_v8, %v6904_v39  ;;  %s7854_s25 = smov 56  }
 0x552   : > { %6810 = vrot.lane.b32.xlu1 %v6809_v53, %s7847_s24  ;;  %v6929_v35 = vcombine.low %v6921_v2, %v6928_v37 }
 0x555   : > { %6834 = vrot.lane.b32.xlu0 %v6833_v22, %s7852_s21 }
 0x556   : > { %6906 = vrot.lane.b32.xlu1 %v6905_v55, %s7853_s22 }
 0x559   : > { %6930 = vrot.lane.b32.xlu0 %v6929_v35, %s7854_s25 }
 0x5bf   : > { %v6883_v12 = vpop.permute.xlu0 %6882  ;;  %v6859_v26 = vpop.permute.xlu1 %6858 }
 0x5c3   : > { %v6787_v44 = vpop.permute.xlu0 %6786 }
 0x5c4   : > { %v6933_v10 = vsel %vm269_vm2, %v6763_v33, %v6787_v44  ;;  %v6811_v45 = vpop.permute.xlu1 %6810 }
 0x5c5   : > { %v6934_v42 = vsel %vm3525_vm10, %v6933_v10, %v6811_v45 }
 0x5c7   : > { %v6835_v58 = vpop.permute.xlu0 %6834 }
 0x5c8   : > { %v6935_v16 = vsel %vm4070_vm11, %v6934_v42, %v6835_v58  ;;  %v6907_v28 = vpop.permute.xlu1 %6906 }
 0x5c9   : > { %v6937_v50 = vsel %vm6936_vm0, %v6935_v16, %v6859_v26 }
 0x5ca   : > { %v6939_v0 = vsel %vm6938_vm1, %v6937_v50, %v6883_v12 }
 0x5cb   : > { %v6941_v57 = vsel %vm6940_vm3, %v6939_v0, %v6907_v28  ;;  %v6931_v13 = vpop.permute.xlu0 %6930 }
 0x5cc   : > { %v6943_v51 = vsel %vm6942_vm4, %v6941_v57, %v6931_v13 }
 0x5cd   : > { %6945 = vst.msk [vmem:[%s222_s27] sm:$0xff] %vm6944_vm5, %v6943_v51 }
 0x5ce PF: > { %s15_s18 = sadd.s32 1, %s7842_s18  }
 0x5cf   : > { %p12_p4 = scmp.ge.s32.totalorder %s15_s18, 4  }
 0x5d1   :  { %14 = sbr.rel (!%p12_p4) target bundleno = 1 (0x1), region = 76 }

</bundles_post_ra>
